<compile_context>
chip_gen: v7x
topology: tpu7x:2x2x1
jax: 0.10.0
libtpu: 0.0.40
codegen_flags: <defaults>
</compile_context>

<pallas_src>
import jax
import jax.numpy as jnp
from jax.experimental import pallas as pl
from jax.experimental.pallas import tpu as pltpu


def linear_kernel(x_ref, w_ref, b_ref, o_ref):
    # x_ref: [M, K]  f32 (cast to bf16 on the VPU, ~0.2 us, hidden under DMA)
    # w_ref: [K, tn] bf16 (pre-transposed, pre-cast static parameter)
    # b_ref: [1, tn] f32
    # o_ref: [M, tn] f32
    x_bf16 = x_ref[...].astype(jnp.bfloat16)
    acc = jnp.dot(x_bf16, w_ref[...], preferred_element_type=jnp.float32)
    # Single write: matmul result + bias (broadcast (1, tn) over the M rows).
    o_ref[...] = acc + b_ref[...]


def linear_pallas(x2d, w_kn_bf16, bias2d, *, tn=512):
    """x2d: [M, K] f32, w_kn_bf16: [K, N] bf16, bias2d: [1, N] f32."""
    M, K = x2d.shape
    Kw, N = w_kn_bf16.shape
    assert K == Kw
    assert N % tn == 0 and tn % 128 == 0

    grid = (N // tn,)  # (2,) for 1024 outputs with tn=512
    return pl.pallas_call(
        linear_kernel,
        out_shape=jax.ShapeDtypeStruct((M, N), jnp.float32),
        grid_spec=pltpu.PrefetchScalarGridSpec(
            num_scalar_prefetch=0,
            grid=grid,
            in_specs=[
                # x: full array as one block; constant index_map -> DMA'd once.
                pl.BlockSpec((M, K), lambda j: (0, 0)),
                # weight: full-K column stripe per grid step.
                pl.BlockSpec((K, tn), lambda j: (0, j)),
                # bias: matching column stripe.
                pl.BlockSpec((1, tn), lambda j: (0, j)),
            ],
            out_specs=pl.BlockSpec((M, tn), lambda j: (0, j)),
        ),
        compiler_params=pltpu.CompilerParams(
            dimension_semantics=("parallel",),
            vmem_limit_bytes=32 * 1024 * 1024,
        ),
    )(x2d, w_kn_bf16, bias2d)


def convert_params(weight_nk, bias):
    """One-time parameter conversion (amortized over all forward calls):
    transpose PyTorch's [N, K] weight to [K, N] and cast to bf16."""
    w_kn_bf16 = weight_nk.T.astype(jnp.bfloat16)
    b2d = bias.reshape(1, -1).astype(jnp.float32)
    return w_kn_bf16, b2d


def forward(x, w_kn_bf16, bias2d):
    # x: [1, 7, 7, 4096] f32 ; w_kn_bf16: [4096, 1024] bf16 ; bias2d: [1, 1024]
    B, H, W, K = x.shape
    N = w_kn_bf16.shape[1]
    x2d = x.reshape(B * H * W, K)
    y2d = linear_pallas(x2d, w_kn_bf16, bias2d)
    return y2d.reshape(B, H, W, N)


if __name__ == "__main__":
    key = jax.random.PRNGKey(0)
    kx, kw, kb = jax.random.split(key, 3)

    in_features, out_features = 4096, 1024
    x = jax.random.normal(kx, (1, 7, 7, in_features), dtype=jnp.float32)
    # Deterministic init mimicking nn.Linear's uniform(-1/sqrt(in), 1/sqrt(in)).
    bound = 1.0 / (in_features ** 0.5)
    weight = jax.random.uniform(
        kw, (out_features, in_features), minval=-bound, maxval=bound,
        dtype=jnp.float32)
    bias = jax.random.uniform(
        kb, (out_features,), minval=-bound, maxval=bound, dtype=jnp.float32)

    # One-time parameter conversion (bf16 + [K, N] layout), then the kernel.
    w_kn_bf16, bias2d = convert_params(weight, bias)
    y = forward(x, w_kn_bf16, bias2d)
    jax.block_until_ready(y)
    assert y.shape == (1, 7, 7, out_features)
    assert y.dtype == jnp.float32

    # Tight check against a reference using the *same* bf16 operands
    # (validates the kernel itself; only accumulation order differs).
    y_ref_bf16 = jnp.einsum(
        "bhwk,nk->bhwn",
        x.astype(jnp.bfloat16),
        weight.astype(jnp.bfloat16),
        preferred_element_type=jnp.float32,
    ) + bias
    assert jnp.allclose(y, y_ref_bf16, atol=1e-2, rtol=1e-2)

    # Looser sanity check against the full-f32 module semantics
    # (bf16 weight/activation streaming is the review-approved tradeoff).
    y_ref_f32 = jnp.einsum("bhwk,nk->bhwn", x, weight) + bias
    assert jnp.allclose(y, y_ref_f32, atol=3e-2, rtol=3e-2)

    print("KERNEL_OK")
</pallas_src>

<mosaic_0001>
module attributes {stable_mosaic.version = 11 : i64} {
  func.func @linear_kernel(%arg0: i32, %arg1: memref<49x4096xf32, #tpu.memory_space<vmem>>, %arg2: memref<4096x512xbf16, #tpu.memory_space<vmem>>, %arg3: memref<1x512xf32, #tpu.memory_space<vmem>>, %arg4: memref<49x512xf32, #tpu.memory_space<vmem>>) attributes {dimension_semantics = [#tpu.dimension_semantics<parallel>], iteration_bounds = array<i64: 2>, scalar_prefetch = 0 : i64, scratch_operands = 0 : i64, tpu.core_type = #tpu.core_type<tc>, window_params = [{pipeline_mode = #tpu.pipeline_mode<synchronous>, transform_indices = @transform_0, window_bounds = array<i64: 49, 4096>}, {transform_indices = @transform_1, window_bounds = array<i64: 4096, 512>}, {transform_indices = @transform_2, window_bounds = array<i64: 1, 512>}, {transform_indices = @transform_3, window_bounds = array<i64: 49, 512>}]} {
    %c0 = arith.constant 0 : index
    %c0_0 = arith.constant 0 : index
    %0 = vector.load %arg1[%c0, %c0_0] : memref<49x4096xf32, #tpu.memory_space<vmem>>, vector<49x4096xf32>
    %1 = arith.truncf %0 : vector<49x4096xf32> to vector<49x4096xbf16>
    %c0_1 = arith.constant 0 : index
    %c0_2 = arith.constant 0 : index
    %2 = vector.load %arg2[%c0_1, %c0_2] : memref<4096x512xbf16, #tpu.memory_space<vmem>>, vector<4096x512xbf16>
    %cst = arith.constant dense<0.000000e+00> : vector<49x512xf32>
    %3 = tpu.matmul %1, %2, %cst {dimension_numbers = #tpu.dot_dimension_numbers<[1], [0], [0], [1], [0, 0, 1, 1], [], []>} : vector<49x4096xbf16>, vector<4096x512xbf16>, vector<49x512xf32> -> vector<49x512xf32>
    %c0_3 = arith.constant 0 : index
    %c0_4 = arith.constant 0 : index
    %4 = vector.load %arg3[%c0_3, %c0_4] : memref<1x512xf32, #tpu.memory_space<vmem>>, vector<1x512xf32>
    %5 = vector.broadcast %4 : vector<1x512xf32> to vector<49x512xf32>
    %6 = arith.addf %3, %5 : vector<49x512xf32>
    %c0_5 = arith.constant 0 : index
    %c0_6 = arith.constant 0 : index
    %7 = vector.load %arg4[%c0_5, %c0_6] : memref<49x512xf32, #tpu.memory_space<vmem>>, vector<49x512xf32>
    tpu.vector_store %arg4[%c0_5, %c0_6], %6 {strides = array<i32>} : memref<49x512xf32, #tpu.memory_space<vmem>>, vector<49x512xf32>,
    return
  }
  func.func @transform_0(%arg0: i32) -> (i32, i32) {
    %c0_i32 = arith.constant 0 : i32
    %c0_i32_0 = arith.constant 0 : i32
    %c0_i32_1 = arith.constant 0 : i32
    return %c0_i32, %c0_i32_0 : i32, i32
  }
  func.func @transform_1(%arg0: i32) -> (i32, i32) {
    %c0_i32 = arith.constant 0 : i32
    %c0_i32_0 = arith.constant 0 : i32
    return %c0_i32, %arg0 : i32, i32
  }
  func.func @transform_2(%arg0: i32) -> (i32, i32) {
    %c0_i32 = arith.constant 0 : i32
    %c0_i32_0 = arith.constant 0 : i32
    return %c0_i32, %arg0 : i32, i32
  }
  func.func @transform_3(%arg0: i32) -> (i32, i32) {
    %c0_i32 = arith.constant 0 : i32
    %c0_i32_0 = arith.constant 0 : i32
    return %c0_i32, %arg0 : i32, i32
  }
}

</mosaic_0001>

<bundles_post_ra>
// kernel: tpu_custom_call.1
= control target key start
LH: loop header
LB: loop body
LE: loop exit
PB: predicated region body
PF: predicated region fallthrough
CT: control target
= control target key end

     0   :  { %8 = vsyncpa [#allocation3], 0  ;;  %s13868_s0 = inlined_call_operand.hbm [shape: f32[49,4096], index: 0, kind: input, shape index: {}]   ;;  %s13869_s1 = inlined_call_operand.hbm [shape: bf16[4096,1024], index: 1, kind: input, shape index: {}]   ;;  %s13870_s2 = inlined_call_operand.hbm [shape: f32[1,1024], index: 2, kind: input, shape index: {}]   ;;  %s13871_s3 = inlined_call_operand.hbm [shape: f32[49,1024], index: 3, kind: output, shape index: {}]  }
   0x1   :  { %9 = vsyncpa [#allocation6], 0 }
   0x2   :  { %11 = vsyncpa [#allocation6 + $0x1], 0 }
   0x3   :  { %12 = vsyncpa [#allocation4], 0 }
   0x4   :  { %14 = vsyncpa [#allocation4 + $0x1], 0  ;;  %s12529_s12 = smov 0   ;;  %s12531_s13 = smov 0  }
   0x5   :  { %s12533_s14 = smov 0   ;;  %s12535_s15 = smov 0  }
   0x6 LB: > { %s12550_s16 = sadd.s32 1, %s12496_s15   ;;  %s48_s17 = sadd.s32 1, %s12492_s14  ;;  %s12496_s15 = sphi %s12535_s15, %s13900_s15   ;;  %s12492_s14 = sphi %s12533_s14, %s13899_s14   ;;  %s12488_s13 = sphi %s12531_s13, %s13898_s13   ;;  %s12484_s12 = sphi %s12529_s12, %s13897_s12  }
   0x7   : > { %s45_s18 = ssub.s32 %s12496_s15, %s12550_s16  ;;  %p55_p0 = scmp.ne.s32.totalorder %s12492_s14, %s12488_s13 }
   0x8   : > { %p46_p1 = scmp.eq.s32.totalorder %s45_s18, 0  ;;  %p56_p2 = scmp.eq.s32.totalorder %s12496_s15, 0 }
   0x9   : > { %p10759_p5 = scmp.lt.s32.totalorder %s12496_s15, 2  ;;  %s150_s20 = sand.u32 1, %s12496_s15  }
   0xa   : > { %s12560_s19 = scalar_select %p46_p1, %s12492_s14, %s48_s17  }
   0xb   : > { %p57_p4 = por %p56_p2, %p55_p0  ;;  %s152_s21 = sand.u32 1, %s12492_s14  }
   0xc   : > { %s9183_s22 = sshll.u32 %s152_s21, 13  ;;  %s10221_s23 = sshll.u32 %s12496_s15, 8 }
   0xd   : > { %s12574_s26 = scalar_lea.hbm %s13869_s1, %s10221_s23  ;;  %s154_s27 = scalar_lea.vmem [#allocation5], %s9183_s22 }
   0xe   : > { %s161_s28 = sshll.u32 %s154_s27, 4  ;;  %p12578_p6 = pnand %p10759_p5, %p57_p4  ;;  %s12576_s28 = int_to_ptr.vmem [resolvable:$true] %s161_s28 }
   0xf   : > { %s12582_s30 = scalar_lea.sflag [#allocation6], %s150_s20  ;;  %s12338_s4 = scalar_lea.hbm %s12574_s26, 131072 }
  0x10   : > { %s13880_s29 = scalar_select %p12578_p6, 1, 0 }
  0x11   : > { %p12339_p7 = scmp.ne.s32.totalorder %s12574_s26, %s12338_s4  ;;  %p13874_p8 = pneg %p12578_p6 }
  0x12   : > { %s12343_s7 = scalar_lea.hbm %s13869_s1, 262144  ;;  %p12344_p11 = scmp.lt.u32.totalorder %s12574_s26, %s13869_s1 }
  0x13   : > { %p12341_p9 = pnand %p13874_p8, %p12339_p7  ;;  %p12345_p12 = scmp.lt.u32.totalorder %s12343_s7, %s12338_s4 }
  0x14   : > { %p12347_p1 = scmp.lt.u32.totalorder %s12338_s4, %s12574_s26 }
  0x15   : > { %p12342_p10 = pneg %p12341_p9  ;;  %p12346_p13 = por %p12345_p12, %p12344_p11 }
  0x17   : > { %p12348_p2 = por %p12347_p1, %p12346_p13 }
  0x19   : > { %p12349_p4 = pnand %p12348_p2, %p12342_p10 }
  0x1b   : > { %12352 = shalt.err (!%p12349_p4)
}
  0x1c   : > { %s12353_s10 = scalar_lea.vmem %s12576_s28, 131072  ;;  %s12498_s11 = smov [#allocation5]  }
  0x1d   : > { %p12354_p5 = scmp.ne.s32.totalorder %s12576_s28, %s12353_s10  ;;  %s12358_s17 = sshll.u32 %s12498_s11, 4  ;;  %s12359_s17 = int_to_ptr.vmem [resolvable:$false] %s12358_s17 }
  0x1e   : > { %s12360_s18 = scalar_lea.vmem %s12359_s17, 262144  ;;  %p12361_p3 = scmp.lt.s32.totalorder %s12576_s28, %s12359_s17 }
  0x1f   : > { %p12356_p7 = pnand %p12354_p5, %p13874_p8  ;;  %p12362_p11 = scmp.lt.s32.totalorder %s12360_s18, %s12353_s10 }
  0x21   : > { %p12357_p9 = pneg %p12356_p7  ;;  %p12363_p12 = por %p12362_p11, %p12361_p3 }
  0x23   : > { %p12364_p13 = pnand %p12363_p12, %p12357_p9 }
  0x25   : > { %12367 = shalt.err (!%p12364_p13)
}
  0x26   : > { %s12499_s20 = smov 512   ;;  %s13872_s22 = smov 256  }
  0x27   : > { %s12501_s23 = smov 16   ;;  %s12612_s24 = sadd.s32 4294967295, %s12496_s15  }
  0x28   : > { %10750 = dma.hbm_to_vmem [thread:$0]  (!%p12578_p6), %s12574_s26, 131072, %s12576_s28, %s12582_s30, %s12499_s20, %s13872_s22, %s12501_s23  }
  0x29   : > { %s9179_s25 = sadd.s32 4294967294, %s12496_s15   ;;  %p61_p3 = scmp.ne.s32.totalorder %s12488_s13, %s12484_s12 }
  0x2a   : > { %p13873_p10 = scmp.eq.s32.totalorder %s12612_s24, 0  ;;  %p111_p1 = scmp.eq.s32.totalorder %s12612_s24, 1 }
  0x2b   : > { %p117_p2 = scmp.eq.s32.totalorder %s9179_s25, 1  ;;  %p9180_p4 = scmp.ge.s32.totalorder %s12496_s15, 1 }
  0x2c   : > { %p12622_p5 = por %p13873_p10, %p61_p3  ;;  %p12629_p7 = por %p111_p1, %p55_p0 }
  0x2d   : > { %p12633_p9 = por %p117_p2, %p61_p3  ;;  %p124_p11 = scmp.lt.s32.totalorder %s12496_s15, 3 }
  0x2e   : > { %s13881_s27 = scalar_select %p12622_p5, 1, 0 }
  0x2f   : > { %s13882_s26 = scalar_select %p12629_p7, 1, 0 }
  0x30   : > { %s13883_s28 = scalar_select %p12633_p9, 1, 0 }
  0x31   : > { %p12638_p12 = pnand %p9180_p4, %p124_p11  ;;  %s12502_s5 = smov [#allocation2]  }
  0x32   : > { %s136_s6 = sshll.u32 %s12502_s5, 4  ;;  %s9186_s7 = sshll.u32 %s152_s21, 2  ;;  %s12642_s6 = int_to_ptr.vmem [resolvable:$true] %s136_s6 }
  0x33   : > { %s13884_s4 = scalar_select %p12638_p12, 1, 0 }
  0x34   : > { %p10743_p13 = pneg %p12638_p12  ;;  %s10222_s8 = sshll.u32 %s12496_s15, 6 }
  0x35   : > { %s12658_s17 = scalar_lea.hbm %s13870_s2, %s10222_s8  ;;  %s175_s18 = scalar_lea.vmem [#allocation7], %s9186_s7 }
  0x36   : > { %p12651_p0 = pnand %p10743_p13, %p13873_p10  ;;  %s183_s20 = sshll.u32 %s175_s18, 4  ;;  %s12660_s20 = int_to_ptr.vmem [resolvable:$true] %s183_s20 }
  0x37   : > { %s12368_s21 = scalar_lea.hbm %s13868_s0, 28672 }
  0x38   : > { %p12369_p3 = scmp.ne.s32.totalorder %s13868_s0, %s12368_s21  ;;  %p12370_p1 = pneg %p12651_p0 }
  0x39   : > { %p12375_p11 = scmp.lt.u32.totalorder %s12368_s21, %s13868_s0 }
  0x3a   : > { %p12371_p2 = pnand %p12370_p1, %p12369_p3 }
  0x3c   : > { %p12372_p4 = pneg %p12371_p2 }
  0x3e   : > { %p12377_p13 = pnand %p12375_p11, %p12372_p4 }
  0x40   : > { %12380 = shalt.err (!%p12377_p13)
}
  0x41   : > { %s12381_s7 = scalar_lea.vmem %s12642_s6, 28672  ;;  %p12389_p7 = scmp.lt.s32.totalorder %s12642_s6, %s12642_s6 }
  0x42   : > { %p12382_p10 = scmp.ne.s32.totalorder %s12642_s6, %s12381_s7  ;;  %p12390_p5 = scmp.lt.s32.totalorder %s12381_s7, %s12381_s7 }
  0x44   : > { %p12384_p8 = pnand %p12382_p10, %p12370_p1  ;;  %p12391_p12 = por %p12390_p5, %p12389_p7 }
  0x46   : > { %p12385_p9 = pneg %p12384_p8 }
  0x48   : > { %p12392_p6 = pnand %p12391_p12, %p12385_p9 }
  0x4a   : > { %12395 = shalt.err (!%p12392_p6)
}
  0x4b   : > { %s12503_s22 = smov 4096   ;;  %s13886_s8 = smov 256  }
  0x4c   : > { %10746 = dma.hbm_to_vmem [thread:$0]  (!%p12651_p0), %s13868_s0, 28672, %s12642_s6, [#allocation3], %s12503_s22, %s12503_s22, %s13886_s8  }
  0x4d   : > { %s12396_s25 = scalar_lea.hbm %s12658_s17, 64  ;;  %p13887_p10 = scmp.ne.s32.totalorder %s13880_s29, 0 }
  0x4e   : > { %p12397_p8 = scmp.ne.s32.totalorder %s12658_s17, %s12396_s25  ;;  %s12401_s9 = scalar_lea.hbm %s13870_s2, 128 }
  0x4f   : > { %p13888_p5 = pneg %p13887_p10  ;;  %p12402_p9 = scmp.lt.u32.totalorder %s12658_s17, %s13870_s2 }
  0x50   : > { %p12403_p12 = scmp.lt.u32.totalorder %s12401_s9, %s12396_s25  ;;  %p12405_p1 = scmp.lt.u32.totalorder %s12396_s25, %s12658_s17 }
  0x51   : > { %p12399_p7 = pnand %p12397_p8, %p13888_p5 }
  0x52   : > { %p12404_p3 = por %p12403_p12, %p12402_p9 }
  0x53   : > { %p12400_p6 = pneg %p12399_p7 }
  0x54   : > { %p12406_p2 = por %p12405_p1, %p12404_p3 }
  0x56   : > { %p12407_p4 = pnand %p12406_p2, %p12400_p6 }
  0x58   : > { %12410 = shalt.err (!%p12407_p4)
}
  0x59   : > { %s12411_s6 = scalar_lea.vmem %s12660_s20, 64  ;;  %p13889_p11 = pmov %p13888_p5 }
  0x5a   : > { %p12412_p0 = scmp.ne.s32.totalorder %s12660_s20, %s12411_s6  ;;  %s12504_s7 = smov [#allocation7]  }
  0x5b   : > { %s12416_s22 = sshll.u32 %s12504_s7, 4  ;;  %s12417_s22 = int_to_ptr.vmem [resolvable:$false] %s12416_s22 }
  0x5c   : > { %p12414_p13 = pnand %p12412_p0, %p13889_p11  ;;  %s12418_s8 = scalar_lea.vmem %s12417_s22, 128 }
  0x5d   : > { %p12419_p5 = scmp.lt.s32.totalorder %s12660_s20, %s12417_s22  ;;  %p12420_p7 = scmp.lt.s32.totalorder %s12418_s8, %s12411_s6 }
  0x5e   : > { %p12415_p8 = pneg %p12414_p13 }
  0x5f   : > { %p12421_p9 = por %p12420_p7, %p12419_p5 }
  0x61   : > { %p12422_p12 = pnand %p12421_p9, %p12415_p8 }
  0x63   : > { %12425 = shalt.err (!%p12422_p12)
}
  0x64   : > { %10753 = dma.hbm_to_vmem [thread:$0]  (!%p13887_p10), %s12658_s17, 64, %s12660_s20, %s12582_s30  }
  0x65   : > { %p13890_p6 = scmp.ne.s32.totalorder %s13884_s4, 0 }
  0x66   : > { %p13891_p3 = scmp.eq.s32.totalorder (!%p13890_p6), %s12612_s24, 0 }
  0x67   : > { %192 = sbr.rel (%p13890_p6) target bundleno = 1396 (0x574), region = 32 }
  0x6e   : > { %12471 = dma.done.wait (%p13891_p3), [#allocation3], 28672   ;;  %p13892_p1 = pmov %p13891_p3 }
  0x6f   : > { %s198_s18 = sand.u32 1, %s12612_s24   ;;  %s12716_s23 = sand.u32 1, %s12488_s13  }
  0x70   : > { %12473 = vsyncadd (%p13892_p1), [#allocation3], 4294938624  ;;  %s9191_s29 = sshll.u32 %s12716_s23, 13  ;;  %s199_s25 = scalar_lea.sflag [#allocation6], %s198_s18 }
  0x71   : > { %s12719_s21 = scalar_lea.vmem [#allocation5], %s9191_s29  ;;  %p13893_p10 = scmp.ne.s32.totalorder %s13881_s27, 0 }
  0x73   : > { %12475 = dma.done.wait (%p13893_p10), %s199_s25, 131136  }
  0x74   : > { %12477 = vsyncadd (%p13893_p10), %s199_s25, 4294836160  ;;  %v10802_v0 = vld [vmem:[%s12719_s21 + $0x4] ss:$16 sps:$4 sm:$0xff]   ;;  %v10804_v1 = vld [vmem:[%s12719_s21 + $0xc] ss:$16 sps:$4 sm:$0xff]   ;;  %s9192_s30 = sshll.u32 %s12716_s23, 2 }
  0x75   : > { %6760 = vmatprep.subr.bf16.mxu0 %v10802_v0  ;;  %v10806_v2 = vld [vmem:[%s12719_s21] ss:$16 sps:$4 sm:$0xff]   ;;  %v10807_v3 = vld [vmem:[%s12719_s21 + $0x8] ss:$16 sps:$4 sm:$0xff]   ;;  %7896 = vmatprep.subr.bf16.mxu1 %v10804_v1  ;;  %v10808_v4 = vld [vmem:[%s12719_s21 + $0x24] ss:$16 sps:$4 sm:$0xff]  }
  0x76   : > { %6761 = vmatpush1.bf16.msra.mxu0 %v10806_v2  ;;  %7897 = vmatpush1.bf16.msra.mxu1 %v10807_v3  ;;  %v10810_v5 = vld [vmem:[%s12719_s21 + $0x2c] ss:$16 sps:$4 sm:$0xff]   ;;  %v10812_v6 = vld [vmem:[%s12719_s21 + $0x20] ss:$16 sps:$4 sm:$0xff]   ;;  %v10813_v7 = vld [vmem:[%s12719_s21 + $0x28] ss:$16 sps:$4 sm:$0xff]  }
  0x77   : > { %6762 = vmatprep.subr.bf16.mxu0 %v10808_v4  ;;  %7898 = vmatprep.subr.bf16.mxu1 %v10810_v5  ;;  %v10814_v8 = vld [vmem:[%s12719_s21 + $0x44] ss:$16 sps:$4 sm:$0xff]   ;;  %v10816_v9 = vld [vmem:[%s12719_s21 + $0x4c] ss:$16 sps:$4 sm:$0xff]   ;;  %v10818_v10 = vld [vmem:[%s12719_s21 + $0x40] ss:$16 sps:$4 sm:$0xff]  }
  0x78   : > { %v10819_v11 = vld [vmem:[%s12719_s21 + $0x48] ss:$16 sps:$4 sm:$0xff]   ;;  %v10820_v12 = vld [vmem:[%s12719_s21 + $0x64] ss:$16 sps:$4 sm:$0xff]   ;;  %v10822_v13 = vld [vmem:[%s12719_s21 + $0x6c] ss:$16 sps:$4 sm:$0xff]  }
  0x79   : > { %v10824_v14 = vld [vmem:[%s12719_s21 + $0x60] ss:$16 sps:$4 sm:$0xff]   ;;  %v10825_v15 = vld [vmem:[%s12719_s21 + $0x68] ss:$16 sps:$4 sm:$0xff]   ;;  %v10826_v16 = vld [vmem:[%s12719_s21 + $0x84] ss:$16 sps:$4 sm:$0xff]  }
  0x7a   : > { %6763 = vmatpush1.bf16.msra.mxu0 %v10812_v6  ;;  %7899 = vmatpush1.bf16.msra.mxu1 %v10813_v7  ;;  %v10828_v17 = vld [vmem:[%s12719_s21 + $0x8c] ss:$16 sps:$4 sm:$0xff]   ;;  %v10830_v18 = vld [vmem:[%s12719_s21 + $0x80] ss:$16 sps:$4 sm:$0xff]   ;;  %v10831_v19 = vld [vmem:[%s12719_s21 + $0x88] ss:$16 sps:$4 sm:$0xff]  }
  0x7b   : > { %6764 = vmatprep.subr.bf16.mxu0 %v10814_v8  ;;  %7900 = vmatprep.subr.bf16.mxu1 %v10816_v9  ;;  %v10832_v20 = vld [vmem:[%s12719_s21 + $0xa4] ss:$16 sps:$4 sm:$0xff]   ;;  %v10834_v21 = vld [vmem:[%s12719_s21 + $0xac] ss:$16 sps:$4 sm:$0xff]   ;;  %v10836_v22 = vld [vmem:[%s12719_s21 + $0xa0] ss:$16 sps:$4 sm:$0xff]  }
  0x7c   : > { %v10837_v23 = vld [vmem:[%s12719_s21 + $0xa8] ss:$16 sps:$4 sm:$0xff]   ;;  %v10838_v24 = vld [vmem:[%s12719_s21 + $0xc4] ss:$16 sps:$4 sm:$0xff]   ;;  %v10840_v25 = vld [vmem:[%s12719_s21 + $0xcc] ss:$16 sps:$4 sm:$0xff]  }
  0x7d   : > { %v10842_v26 = vld [vmem:[%s12719_s21 + $0xc0] ss:$16 sps:$4 sm:$0xff]   ;;  %v10843_v27 = vld [vmem:[%s12719_s21 + $0xc8] ss:$16 sps:$4 sm:$0xff]   ;;  %v10844_v28 = vld [vmem:[%s12719_s21 + $0xe4] ss:$16 sps:$4 sm:$0xff]  }
  0x7e   : > { %6765 = vmatpush1.bf16.msra.mxu0 %v10818_v10  ;;  %7901 = vmatpush1.bf16.msra.mxu1 %v10819_v11  ;;  %v10846_v29 = vld [vmem:[%s12719_s21 + $0xec] ss:$16 sps:$4 sm:$0xff]   ;;  %v10848_v30 = vld [vmem:[%s12719_s21 + $0xe0] ss:$16 sps:$4 sm:$0xff]   ;;  %v10849_v31 = vld [vmem:[%s12719_s21 + $0xe8] ss:$16 sps:$4 sm:$0xff]  }
  0x7f   : > { %6766 = vmatprep.subr.bf16.mxu0 %v10820_v12  ;;  %7902 = vmatprep.subr.bf16.mxu1 %v10822_v13  ;;  %v10850_v32 = vld [vmem:[%s12719_s21 + $0x104] ss:$16 sps:$4 sm:$0xff]   ;;  %v10852_v33 = vld [vmem:[%s12719_s21 + $0x10c] ss:$16 sps:$4 sm:$0xff]   ;;  %v10854_v34 = vld [vmem:[%s12719_s21 + $0x100] ss:$16 sps:$4 sm:$0xff]  }
  0x80   : > { %v10855_v35 = vld [vmem:[%s12719_s21 + $0x108] ss:$16 sps:$4 sm:$0xff]   ;;  %v10856_v36 = vld [vmem:[%s12719_s21 + $0x124] ss:$16 sps:$4 sm:$0xff]   ;;  %v10858_v37 = vld [vmem:[%s12719_s21 + $0x12c] ss:$16 sps:$4 sm:$0xff]  }
  0x81   : > { %v10860_v38 = vld [vmem:[%s12719_s21 + $0x120] ss:$16 sps:$4 sm:$0xff]   ;;  %v10861_v39 = vld [vmem:[%s12719_s21 + $0x128] ss:$16 sps:$4 sm:$0xff]   ;;  %v10862_v40 = vld [vmem:[%s12719_s21 + $0x144] ss:$16 sps:$4 sm:$0xff]  }
  0x82   : > { %6767 = vmatpush1.bf16.msra.mxu0 %v10824_v14  ;;  %7903 = vmatpush1.bf16.msra.mxu1 %v10825_v15  ;;  %v10864_v41 = vld [vmem:[%s12719_s21 + $0x14c] ss:$16 sps:$4 sm:$0xff]   ;;  %v10866_v42 = vld [vmem:[%s12719_s21 + $0x140] ss:$16 sps:$4 sm:$0xff]   ;;  %v10867_v43 = vld [vmem:[%s12719_s21 + $0x148] ss:$16 sps:$4 sm:$0xff]  }
  0x83   : > { %6768 = vmatprep.subr.bf16.mxu0 %v10826_v16  ;;  %7904 = vmatprep.subr.bf16.mxu1 %v10828_v17  ;;  %v10868_v44 = vld [vmem:[%s12719_s21 + $0x164] ss:$16 sps:$4 sm:$0xff]   ;;  %v10870_v45 = vld [vmem:[%s12719_s21 + $0x16c] ss:$16 sps:$4 sm:$0xff]   ;;  %v10872_v48 = vld [vmem:[%s12719_s21 + $0x160] ss:$16 sps:$4 sm:$0xff]  }
  0x84   : > { %v243_v46 = vld [vmem:[#allocation2 + $0x8] sm:$0xff]  ;;  %v10874_v51 = vld [vmem:[%s12719_s21 + $0x184] ss:$16 sps:$4 sm:$0xff]   ;;  %v10878_v53 = vld [vmem:[%s12719_s21 + $0x180] ss:$16 sps:$4 sm:$0xff]   ;;  %s211_s27 = scalar_lea.vmem [#allocation7], %s9192_s30 }
  0x85   : > { %v275_v47 = vld [vmem:[#allocation2 + $0x108] sm:$0xff]  ;;  %v10880_v55 = vld [vmem:[%s12719_s21 + $0x1a4] ss:$16 sps:$4 sm:$0xff]   ;;  %v10884_v57 = vld [vmem:[%s12719_s21 + $0x1a0] ss:$16 sps:$4 sm:$0xff]   ;;  %s10732_s4 = smul.u32 224, %s12716_s23 }
  0x86   : > { %6769 = vmatpush1.bf16.msra.mxu0 %v10830_v18  ;;  %7905 = vmatpush1.bf16.msra.mxu1 %v10831_v19  ;;  %v10873_v49 = vld [vmem:[%s12719_s21 + $0x168] ss:$16 sps:$4 sm:$0xff]   ;;  %v467_v50 = vpack.c.bf16 %v275_v47, %v243_v46  ;;  %v10876_v52 = vld [vmem:[%s12719_s21 + $0x18c] ss:$16 sps:$4 sm:$0xff]   ;;  %v10886_v59 = vld [vmem:[%s12719_s21 + $0x1c4] ss:$16 sps:$4 sm:$0xff]  }
  0x87   : > { %6770 = vmatprep.subr.bf16.mxu0 %v10832_v20  ;;  %7906 = vmatprep.subr.bf16.mxu1 %v10834_v21  ;;  %v10879_v54 = vld [vmem:[%s12719_s21 + $0x188] ss:$16 sps:$4 sm:$0xff]   ;;  %v10882_v56 = vld [vmem:[%s12719_s21 + $0x1ac] ss:$16 sps:$4 sm:$0xff]   ;;  %v10890_v61 = vld [vmem:[%s12719_s21 + $0x1c0] ss:$16 sps:$4 sm:$0xff]  }
  0x88   : > { %6792 = vmatprep.mubr.bf16.mxu0 %v467_v50  ;;  %7928 = vmatprep.mubr.bf16.mxu1 %v467_v50  ;;  %v10885_v58 = vld [vmem:[%s12719_s21 + $0x1a8] ss:$16 sps:$4 sm:$0xff]   ;;  %v10888_v60 = vld [vmem:[%s12719_s21 + $0x1cc] ss:$16 sps:$4 sm:$0xff]   ;;  %v10892_v63 = vld [vmem:[%s12719_s21 + $0x1e4] ss:$16 sps:$4 sm:$0xff]  }
  0x89   : > { %v10891_v62 = vld [vmem:[%s12719_s21 + $0x1c8] ss:$16 sps:$4 sm:$0xff]   ;;  %v10894_v0 = vld [vmem:[%s12719_s21 + $0x1ec] ss:$16 sps:$4 sm:$0xff]   ;;  %v10896_v1 = vld [vmem:[%s12719_s21 + $0x1e0] ss:$16 sps:$4 sm:$0xff]  }
  0x8a   : > { %6771 = vmatpush1.bf16.msra.mxu0 %v10836_v22  ;;  %7907 = vmatpush1.bf16.msra.mxu1 %v10837_v23  ;;  %v10897_v2 = vld [vmem:[%s12719_s21 + $0x1e8] ss:$16 sps:$4 sm:$0xff]   ;;  %v10900_v3 = vld [vmem:[%s12719_s21 + $0x204] ss:$16 sps:$4 sm:$0xff]   ;;  %v10903_v6 = vld [vmem:[%s12719_s21 + $0x20c] ss:$16 sps:$4 sm:$0xff]  }
  0x8b   : > { %6772 = vmatprep.subr.bf16.mxu0 %v10838_v24  ;;  %7908 = vmatprep.subr.bf16.mxu1 %v10840_v25  ;;  %v242_v4 = vld [vmem:[#allocation2] sm:$0xff]  ;;  %v10901_v8 = vld [vmem:[%s12719_s21 + $0x208] ss:$16 sps:$4 sm:$0xff]   ;;  %v10909_v11 = vld [vmem:[%s12719_s21 + $0x22c] ss:$16 sps:$4 sm:$0xff]   ;;  %s13763_s17 = scalar_lea.vmem [#allocation8], %s10732_s4 }
  0x8c   : > { %v274_v5 = vld [vmem:[#allocation2 + $0x100] sm:$0xff]  ;;  %v10907_v13 = vld [vmem:[%s12719_s21 + $0x228] ss:$16 sps:$4 sm:$0xff]   ;;  %v10915_v15 = vld [vmem:[%s12719_s21 + $0x24c] ss:$16 sps:$4 sm:$0xff]   ;;  %s10223_s20 = sshll.u32 %s12612_s24, 9 }
  0x8d   : > { %v10898_v7 = vld [vmem:[%s12719_s21 + $0x200] ss:$16 sps:$4 sm:$0xff]   ;;  %v466_v9 = vpack.c.bf16 %v274_v5, %v242_v4  ;;  %v10906_v10 = vld [vmem:[%s12719_s21 + $0x224] ss:$16 sps:$4 sm:$0xff]   ;;  %v307_v16 = vld [vmem:[#allocation2 + $0x208] sm:$0xff]  ;;  %s9074_s5 = sshll.u32 %s13763_s17, 4  ;;  %s13814_s11 = scalar_lea.hbm %s13871_s3, %s10223_s20  ;;  %s13818_s5 = int_to_ptr.vmem [resolvable:$true] %s9074_s5 }
  0x8e   : > { %6773 = vmatpush1.bf16.msra.mxu0 %v10842_v26  ;;  %7909 = vmatpush1.bf16.msra.mxu1 %v10843_v27  ;;  %v10904_v12 = vld [vmem:[%s12719_s21 + $0x220] ss:$16 sps:$4 sm:$0xff]   ;;  %v10912_v14 = vld [vmem:[%s12719_s21 + $0x244] ss:$16 sps:$4 sm:$0xff]   ;;  %v339_v17 = vld [vmem:[#allocation2 + $0x308] sm:$0xff]  ;;  %s9061_s24 = scalar_lea.sflag [#allocation4], %s12716_s23 }
  0x8f   : > { %6774 = vmatprep.subr.bf16.mxu0 %v10844_v28  ;;  %7910 = vmatprep.subr.bf16.mxu1 %v10846_v29  ;;  %v10910_v18 = vld [vmem:[%s12719_s21 + $0x240] ss:$16 sps:$4 sm:$0xff]   ;;  %v10913_v19 = vld [vmem:[%s12719_s21 + $0x248] ss:$16 sps:$4 sm:$0xff]   ;;  %v499_v20 = vpack.c.bf16 %v339_v17, %v307_v16  ;;  %v10918_v21 = vld [vmem:[%s12719_s21 + $0x264] ss:$16 sps:$4 sm:$0xff]  }
  0x90   : > { %v10921_v22 = vld [vmem:[%s12719_s21 + $0x26c] ss:$16 sps:$4 sm:$0xff]   ;;  %v306_v23 = vld [vmem:[#allocation2 + $0x200] sm:$0xff]  ;;  %v10919_v26 = vld [vmem:[%s12719_s21 + $0x268] ss:$16 sps:$4 sm:$0xff]   ;;  %s12426_s6 = scalar_lea.vmem %s13818_s5, 3584 }
  0x91   : > { %v338_v24 = vld [vmem:[#allocation2 + $0x300] sm:$0xff]  ;;  %v10927_v29 = vld [vmem:[%s12719_s21 + $0x28c] ss:$16 sps:$4 sm:$0xff]   ;;  %v10961_v4 = vld [vmem:[%s12719_s21 + $0x348] ss:$16 sps:$4 sm:$0xff]   ;;  %p12427_p2 = scmp.ne.s32.totalorder %s13818_s5, %s12426_s6  ;;  %p13894_p4 = scmp.ne.s32.totalorder %s13882_s26, 0 }
  0x92   : > { %6775 = vmatpush1.bf16.msra.mxu0 %v10848_v30  ;;  %7911 = vmatpush1.bf16.msra.mxu1 %v10849_v31  ;;  %v10916_v25 = vld [vmem:[%s12719_s21 + $0x260] ss:$16 sps:$4 sm:$0xff]   ;;  %v498_v27 = vpack.c.bf16 %v338_v24, %v306_v23  ;;  %v10924_v28 = vld [vmem:[%s12719_s21 + $0x284] ss:$16 sps:$4 sm:$0xff]   ;;  %v371_v30 = vld [vmem:[#allocation2 + $0x408] sm:$0xff]  ;;  %s12505_s7 = smov [#allocation8]  }
  0x93   : > { %6776 = vmatprep.subr.bf16.mxu0 %v10850_v32  ;;  %7912 = vmatprep.subr.bf16.mxu1 %v10852_v33  ;;  %v403_v31 = vld [vmem:[#allocation2 + $0x508] sm:$0xff]  ;;  %v10922_v32 = vld [vmem:[%s12719_s21 + $0x280] ss:$16 sps:$4 sm:$0xff]   ;;  %v10966_v5 = vld [vmem:[%s12719_s21 + $0x364] ss:$16 sps:$4 sm:$0xff]   ;;  %p12428_p0 = pnand %p12427_p2, %p13894_p4  ;;  %s12430_s22 = sshll.u32 %s12505_s7, 4  ;;  %s12431_s22 = int_to_ptr.vmem [resolvable:$false] %s12430_s22 }
  0x94   : > { %v531_v33 = vpack.c.bf16 %v403_v31, %v371_v30  ;;  %v434_v46 = vld [vmem:[#allocation2 + $0x600] sm:$0x1]  ;;  %v10945_v50 = vld [vmem:[%s12719_s21 + $0x2ec] ss:$16 sps:$4 sm:$0xff]   ;;  %v10979_v16 = vld [vmem:[%s12719_s21 + $0x3a8] ss:$16 sps:$4 sm:$0xff]   ;;  %p12433_p13 = scmp.lt.s32.totalorder %s13818_s5, %s12431_s22 }
  0x95   : > { %v10934_v47 = vld [vmem:[%s12719_s21 + $0x2c0] ss:$16 sps:$4 sm:$0xff]   ;;  %v10984_v17 = vld [vmem:[%s12719_s21 + $0x3c4] ss:$16 sps:$4 sm:$0xff]   ;;  %v10991_v24 = vld [vmem:[%s12719_s21 + $0x3e8] ss:$16 sps:$4 sm:$0xff]   ;;  %p12429_p11 = pneg %p12428_p0 }
  0x96   : > { %6777 = vmatpush1.bf16.msra.mxu0 %v10854_v34  ;;  %7913 = vmatpush1.bf16.msra.mxu1 %v10855_v35  ;;  %v10925_v34 = vld [vmem:[%s12719_s21 + $0x288] ss:$16 sps:$4 sm:$0xff]   ;;  %v10930_v35 = vld [vmem:[%s12719_s21 + $0x2a4] ss:$16 sps:$4 sm:$0xff]   ;;  %v10988_v23 = vld [vmem:[%s12719_s21 + $0x3e0] ss:$16 sps:$4 sm:$0xff]  }
  0x97   : > { %6778 = vmatprep.subr.bf16.mxu0 %v10856_v36  ;;  %7914 = vmatprep.subr.bf16.mxu1 %v10858_v37  ;;  %v10933_v36 = vld [vmem:[%s12719_s21 + $0x2ac] ss:$16 sps:$4 sm:$0xff]   ;;  %v370_v37 = vld [vmem:[#allocation2 + $0x400] sm:$0xff]  ;;  %s12432_s8 = scalar_lea.vmem %s12431_s22, 7168 }
  0x98   : > { %v309_v30 = vld [vmem:[#allocation2 + $0x218] sm:$0xff]  ;;  %p12434_p8 = scmp.lt.s32.totalorder %s12432_s8, %s12426_s6 }
  0x99   : > { %v341_v31 = vld [vmem:[#allocation2 + $0x318] sm:$0xff] }
  0x9a   : > { %6779 = vmatpush1.bf16.msra.mxu0 %v10860_v38  ;;  %7915 = vmatpush1.bf16.msra.mxu1 %v10861_v39  ;;  %v402_v38 = vld [vmem:[#allocation2 + $0x500] sm:$0xff]  ;;  %p12435_p5 = por %p12434_p8, %p12433_p13 }
  0x9b   : > { %6780 = vmatprep.subr.bf16.mxu0 %v10862_v40  ;;  %7916 = vmatprep.subr.bf16.mxu1 %v10864_v41  ;;  %v530_v39 = vpack.c.bf16 %v402_v38, %v370_v37  ;;  %v10928_v40 = vld [vmem:[%s12719_s21 + $0x2a0] ss:$16 sps:$4 sm:$0xff]   ;;  %v10931_v41 = vld [vmem:[%s12719_s21 + $0x2a8] ss:$16 sps:$4 sm:$0xff]   ;;  %v501_v37 = vpack.c.bf16 %v341_v31, %v309_v30  ;;  %v11068_v31 = vld [vmem:[%s12719_s21 + $0x584] ss:$16 sps:$4 sm:$0xff]  }
  0x9c   : > { %v11003_v38 = vld [vmem:[%s12719_s21 + $0x428] ss:$16 sps:$4 sm:$0xff]   ;;  %p12436_p7 = pnand %p12435_p5, %p12429_p11 }
  0x9d   : > { %v11063_v30 = vld [vmem:[%s12719_s21 + $0x568] ss:$16 sps:$4 sm:$0xff]  }
  0x9e   : > { %6781 = vmatpush1.bf16.msra.mxu0 %v10866_v42  ;;  %7917 = vmatpush1.bf16.msra.mxu1 %v10867_v43  ;;  %v435_v42 = vld [vmem:[#allocation2 + $0x608] sm:$0x1]  ;;  %v10936_v43 = vld [vmem:[%s12719_s21 + $0x2c4] ss:$16 sps:$4 sm:$0xff]  }
  0x9f   : > { %6782 = vmatprep.subr.bf16.mxu0 %v10868_v44  ;;  %7918 = vmatprep.subr.bf16.mxu1 %v10870_v45  ;;  %v10939_v44 = vld [vmem:[%s12719_s21 + $0x2cc] ss:$16 sps:$4 sm:$0xff]   ;;  %v563_v45 = vpack.c.bf16 %v435_v42, %v435_v42 }
  0xa0   : > { %v11011_v42 = vld [vmem:[%s12719_s21 + $0x44c] ss:$16 sps:$4 sm:$0xff]  }
  0xa2   : > { %6783 = vmatpush1.bf16.msra.mxu0 %v10872_v48  ;;  %7919 = vmatpush1.bf16.msra.mxu1 %v10873_v49  ;;  %v10937_v48 = vld [vmem:[%s12719_s21 + $0x2c8] ss:$16 sps:$4 sm:$0xff]   ;;  %v10942_v49 = vld [vmem:[%s12719_s21 + $0x2e4] ss:$16 sps:$4 sm:$0xff]  }
  0xa3   : > { %6784 = vmatprep.subr.bf16.mxu0 %v10874_v51  ;;  %7920 = vmatprep.subr.bf16.mxu1 %v10876_v52  ;;  %v562_v51 = vpack.c.bf16 %v434_v46, %v434_v46  ;;  %v245_v52 = vld [vmem:[#allocation2 + $0x18] sm:$0xff] }
  0xa4   : > { %v405_v46 = vld [vmem:[#allocation2 + $0x518] sm:$0xff] }
  0xa6   : > { %6785 = vmatpush1.bf16.msra.mxu0 %v10878_v53  ;;  %7921 = vmatpush1.bf16.msra.mxu1 %v10879_v54  ;;  %v277_v53 = vld [vmem:[#allocation2 + $0x118] sm:$0xff]  ;;  %v10940_v54 = vld [vmem:[%s12719_s21 + $0x2e0] ss:$16 sps:$4 sm:$0xff]  }
  0xa7   : > { %6786 = vmatprep.subr.bf16.mxu0 %v10880_v55  ;;  %7922 = vmatprep.subr.bf16.mxu1 %v10882_v56  ;;  %v469_v55 = vpack.c.bf16 %v277_v53, %v245_v52  ;;  %v10943_v56 = vld [vmem:[%s12719_s21 + $0x2e8] ss:$16 sps:$4 sm:$0xff]   ;;  %v11020_v53 = vld [vmem:[%s12719_s21 + $0x484] ss:$16 sps:$4 sm:$0xff]  }
  0xa8   : > { %v11015_v52 = vld [vmem:[%s12719_s21 + $0x468] ss:$16 sps:$4 sm:$0xff]  }
  0xaa   : > { %6787 = vmatpush1.bf16.msra.mxu0 %v10884_v57  ;;  %7923 = vmatpush1.bf16.msra.mxu1 %v10885_v58  ;;  %v10948_v57 = vld [vmem:[%s12719_s21 + $0x304] ss:$16 sps:$4 sm:$0xff]   ;;  %v10951_v58 = vld [vmem:[%s12719_s21 + $0x30c] ss:$16 sps:$4 sm:$0xff]  }
  0xab   : > { %6788 = vmatprep.subr.bf16.mxu0 %v10886_v59  ;;  %7924 = vmatprep.subr.bf16.mxu1 %v10888_v60  ;;  %v10946_v59 = vld [vmem:[%s12719_s21 + $0x300] ss:$16 sps:$4 sm:$0xff]   ;;  %v10949_v60 = vld [vmem:[%s12719_s21 + $0x308] ss:$16 sps:$4 sm:$0xff]  }
  0xae   : > { %6789 = vmatpush1.bf16.msra.mxu0 %v10890_v61  ;;  %7925 = vmatpush1.bf16.msra.mxu1 %v10891_v62  ;;  %v10954_v61 = vld [vmem:[%s12719_s21 + $0x324] ss:$16 sps:$4 sm:$0xff]   ;;  %v10957_v62 = vld [vmem:[%s12719_s21 + $0x32c] ss:$16 sps:$4 sm:$0xff]  }
  0xaf   : > { %6790 = vmatprep.subr.bf16.mxu0 %v10892_v63  ;;  %7926 = vmatprep.subr.bf16.mxu1 %v10894_v0  ;;  %v10952_v63 = vld [vmem:[%s12719_s21 + $0x320] ss:$16 sps:$4 sm:$0xff]   ;;  %v10955_v0 = vld [vmem:[%s12719_s21 + $0x328] ss:$16 sps:$4 sm:$0xff]  }
  0xb2   : > { %6791 = vmatpush1.bf16.msra.mxu0 %v10896_v1  ;;  %7927 = vmatpush1.bf16.msra.mxu1 %v10897_v2  ;;  %v10960_v1 = vld [vmem:[%s12719_s21 + $0x344] ss:$16 sps:$4 sm:$0xff]   ;;  %v10963_v2 = vld [vmem:[%s12719_s21 + $0x34c] ss:$16 sps:$4 sm:$0xff]  }
  0xb3   : > { %6831 = vmatprep.subr.bf16.mxu0 %v10900_v3  ;;  %7967 = vmatprep.subr.bf16.mxu1 %v10903_v6  ;;  %v10958_v3 = vld [vmem:[%s12719_s21 + $0x340] ss:$16 sps:$4 sm:$0xff]   ;;  %v10969_v6 = vld [vmem:[%s12719_s21 + $0x36c] ss:$16 sps:$4 sm:$0xff]  }
  0xb5   : > { %6793 = vmatmul.mubr.bf16.vlgmr.msra.gmra.mrb[0].mxu0 %v466_v9  ;;  %7929 = vmatmul.mubr.bf16.vlgmr.msra.gmra.mrb[0].mxu1 %v466_v9  ;;  %v10972_v9 = vld [vmem:[%s12719_s21 + $0x384] ss:$16 sps:$4 sm:$0xff]  }
  0xb6   : > { %6832 = vmatpush1.bf16.msra.mxu0 %v10898_v7  ;;  %7968 = vmatpush1.bf16.msra.mxu1 %v10901_v8  ;;  %v10964_v7 = vld [vmem:[%s12719_s21 + $0x360] ss:$16 sps:$4 sm:$0xff]   ;;  %v10967_v8 = vld [vmem:[%s12719_s21 + $0x368] ss:$16 sps:$4 sm:$0xff]  }
  0xb7   : > { %6833 = vmatprep.subr.bf16.mxu0 %v10906_v10  ;;  %7969 = vmatprep.subr.bf16.mxu1 %v10909_v11  ;;  %v10975_v10 = vld [vmem:[%s12719_s21 + $0x38c] ss:$16 sps:$4 sm:$0xff]   ;;  %v10970_v11 = vld [vmem:[%s12719_s21 + $0x380] ss:$16 sps:$4 sm:$0xff]  }
  0xb8   : > { %6802 = vmatprep.mubr.bf16.mxu0 %v499_v20  ;;  %7938 = vmatprep.mubr.bf16.mxu1 %v499_v20  ;;  %v10985_v20 = vld [vmem:[%s12719_s21 + $0x3c8] ss:$16 sps:$4 sm:$0xff]  }
  0xba   : > { %6834 = vmatpush1.bf16.msra.mxu0 %v10904_v12  ;;  %7970 = vmatpush1.bf16.msra.mxu1 %v10907_v13  ;;  %v10973_v12 = vld [vmem:[%s12719_s21 + $0x388] ss:$16 sps:$4 sm:$0xff]   ;;  %v10978_v13 = vld [vmem:[%s12719_s21 + $0x3a4] ss:$16 sps:$4 sm:$0xff]  }
  0xbb   : > { %6835 = vmatprep.subr.bf16.mxu0 %v10912_v14  ;;  %7971 = vmatprep.subr.bf16.mxu1 %v10915_v15  ;;  %v10981_v14 = vld [vmem:[%s12719_s21 + $0x3ac] ss:$16 sps:$4 sm:$0xff]   ;;  %v10976_v15 = vld [vmem:[%s12719_s21 + $0x3a0] ss:$16 sps:$4 sm:$0xff]  }
  0xbd   : > { %6803 = vmatmul.mubr.bf16.gmra.mrb[4].mxu0 %v498_v27  ;;  %7939 = vmatmul.mubr.bf16.gmra.mrb[4].mxu1 %v498_v27  ;;  %v276_v27 = vld [vmem:[#allocation2 + $0x110] sm:$0xff] }
  0xbe   : > { %6836 = vmatpush1.bf16.msra.mxu0 %v10910_v18  ;;  %7972 = vmatpush1.bf16.msra.mxu1 %v10913_v19  ;;  %v10987_v18 = vld [vmem:[%s12719_s21 + $0x3cc] ss:$16 sps:$4 sm:$0xff]   ;;  %v10982_v19 = vld [vmem:[%s12719_s21 + $0x3c0] ss:$16 sps:$4 sm:$0xff]  }
  0xbf   : > { %6837 = vmatprep.subr.bf16.mxu0 %v10918_v21  ;;  %7973 = vmatprep.subr.bf16.mxu1 %v10921_v22  ;;  %v10990_v21 = vld [vmem:[%s12719_s21 + $0x3e4] ss:$16 sps:$4 sm:$0xff]   ;;  %v10993_v22 = vld [vmem:[%s12719_s21 + $0x3ec] ss:$16 sps:$4 sm:$0xff]  }
  0xc0   : > { %6812 = vmatprep.mubr.bf16.mxu0 %v531_v33  ;;  %7948 = vmatprep.mubr.bf16.mxu1 %v531_v33  ;;  %v10997_v33 = vld [vmem:[%s12719_s21 + $0x408] ss:$16 sps:$4 sm:$0xff]  }
  0xc2   : > { %6838 = vmatpush1.bf16.msra.mxu0 %v10916_v25  ;;  %7974 = vmatpush1.bf16.msra.mxu1 %v10919_v26  ;;  %v10996_v25 = vld [vmem:[%s12719_s21 + $0x404] ss:$16 sps:$4 sm:$0xff]  }
  0xc3   : > { %6839 = vmatprep.subr.bf16.mxu0 %v10924_v28  ;;  %7975 = vmatprep.subr.bf16.mxu1 %v10927_v29  ;;  %v244_v26 = vld [vmem:[#allocation2 + $0x10] sm:$0xff]  ;;  %v10999_v28 = vld [vmem:[%s12719_s21 + $0x40c] ss:$16 sps:$4 sm:$0xff]  }
  0xc4   : > { %v468_v29 = vpack.c.bf16 %v276_v27, %v244_v26  ;;  %v11057_v26 = vld [vmem:[%s12719_s21 + $0x548] ss:$16 sps:$4 sm:$0xff]   ;;  %v11062_v27 = vld [vmem:[%s12719_s21 + $0x564] ss:$16 sps:$4 sm:$0xff]  }
  0xc5   : > { %6813 = vmatmul.mubr.bf16.gmra.mrb[8].mxu0 %v530_v39  ;;  %7949 = vmatmul.mubr.bf16.gmra.mrb[8].mxu1 %v530_v39  ;;  %v11008_v39 = vld [vmem:[%s12719_s21 + $0x444] ss:$16 sps:$4 sm:$0xff]  }
  0xc6   : > { %6840 = vmatpush1.bf16.msra.mxu0 %v10922_v32  ;;  %7976 = vmatpush1.bf16.msra.mxu1 %v10925_v34  ;;  %v10994_v32 = vld [vmem:[%s12719_s21 + $0x400] ss:$16 sps:$4 sm:$0xff]   ;;  %v11002_v34 = vld [vmem:[%s12719_s21 + $0x424] ss:$16 sps:$4 sm:$0xff]  }
  0xc7   : > { %6841 = vmatprep.subr.bf16.mxu0 %v10930_v35  ;;  %7977 = vmatprep.subr.bf16.mxu1 %v10933_v36  ;;  %v11005_v35 = vld [vmem:[%s12719_s21 + $0x42c] ss:$16 sps:$4 sm:$0xff]   ;;  %v11000_v36 = vld [vmem:[%s12719_s21 + $0x420] ss:$16 sps:$4 sm:$0xff]  }
  0xc8   : > { %6822 = vmatprep.mubr.bf16.mxu0 %v563_v45  ;;  %7958 = vmatprep.mubr.bf16.mxu1 %v563_v45  ;;  %v373_v45 = vld [vmem:[#allocation2 + $0x418] sm:$0xff] }
  0xca   : > { %6842 = vmatpush1.bf16.msra.mxu0 %v10928_v40  ;;  %7978 = vmatpush1.bf16.msra.mxu1 %v10931_v41  ;;  %v308_v40 = vld [vmem:[#allocation2 + $0x210] sm:$0xff] }
  0xcb   : > { %6843 = vmatprep.subr.bf16.mxu0 %v10936_v43  ;;  %7979 = vmatprep.subr.bf16.mxu1 %v10939_v44  ;;  %v340_v41 = vld [vmem:[#allocation2 + $0x310] sm:$0xff] }
  0xcc   : > { %v11006_v43 = vld [vmem:[%s12719_s21 + $0x440] ss:$16 sps:$4 sm:$0xff]   ;;  %v500_v44 = vpack.c.bf16 %v340_v41, %v308_v40  ;;  %v11083_v40 = vld [vmem:[%s12719_s21 + $0x5cc] ss:$16 sps:$4 sm:$0xff]  }
  0xcd   : > { %6823 = vmatmul.mubr.bf16.gmra.mrb[12].mxu0 %v562_v51  ;;  %7959 = vmatmul.mubr.bf16.gmra.mrb[12].mxu1 %v562_v51  ;;  %v533_v51 = vpack.c.bf16 %v405_v46, %v373_v45  ;;  %v11078_v41 = vld [vmem:[%s12719_s21 + $0x5c0] ss:$16 sps:$4 sm:$0xff]   ;;  %v11087_v46 = vld [vmem:[%s12719_s21 + $0x5e8] ss:$16 sps:$4 sm:$0xff]  }
  0xce   : > { %6844 = vmatpush1.bf16.msra.mxu0 %v10934_v47  ;;  %7980 = vmatpush1.bf16.msra.mxu1 %v10937_v48  ;;  %v11009_v47 = vld [vmem:[%s12719_s21 + $0x448] ss:$16 sps:$4 sm:$0xff]   ;;  %v11014_v48 = vld [vmem:[%s12719_s21 + $0x464] ss:$16 sps:$4 sm:$0xff]   ;;  %v11084_v45 = vld [vmem:[%s12719_s21 + $0x5e0] ss:$16 sps:$4 sm:$0xff]  }
  0xcf   : > { %6845 = vmatprep.subr.bf16.mxu0 %v10942_v49  ;;  %7981 = vmatprep.subr.bf16.mxu1 %v10945_v50  ;;  %v11017_v49 = vld [vmem:[%s12719_s21 + $0x46c] ss:$16 sps:$4 sm:$0xff]   ;;  %v11012_v50 = vld [vmem:[%s12719_s21 + $0x460] ss:$16 sps:$4 sm:$0xff]  }
  0xd0   : > { %6863 = vmatprep.mubr.bf16.mxu0 %v469_v55  ;;  %7999 = vmatprep.mubr.bf16.mxu1 %v469_v55  ;;  %v404_v55 = vld [vmem:[#allocation2 + $0x510] sm:$0xff] }
  0xd2   : > { %6846 = vmatpush1.bf16.msra.mxu0 %v10940_v54  ;;  %7982 = vmatpush1.bf16.msra.mxu1 %v10943_v56  ;;  %v372_v54 = vld [vmem:[#allocation2 + $0x410] sm:$0xff]  ;;  %v11023_v56 = vld [vmem:[%s12719_s21 + $0x48c] ss:$16 sps:$4 sm:$0xff]  }
  0xd3   : > { %6847 = vmatprep.subr.bf16.mxu0 %v10948_v57  ;;  %7983 = vmatprep.subr.bf16.mxu1 %v10951_v58  ;;  %v11018_v57 = vld [vmem:[%s12719_s21 + $0x480] ss:$16 sps:$4 sm:$0xff]   ;;  %v11021_v58 = vld [vmem:[%s12719_s21 + $0x488] ss:$16 sps:$4 sm:$0xff]  }
  0xd6   : > { %6848 = vmatpush1.bf16.msra.mxu0 %v10946_v59  ;;  %7984 = vmatpush1.bf16.msra.mxu1 %v10949_v60  ;;  %v532_v59 = vpack.c.bf16 %v404_v55, %v372_v54  ;;  %v437_v60 = vld [vmem:[#allocation2 + $0x618] sm:$0x1]  ;;  %v11090_v54 = vld [vmem:[%s12719_s21 + $0x600] ss:$16 sps:$4 sm:$0xff]  }
  0xd7   : > { %6849 = vmatprep.subr.bf16.mxu0 %v10954_v61  ;;  %7985 = vmatprep.subr.bf16.mxu1 %v10957_v62  ;;  %v11026_v61 = vld [vmem:[%s12719_s21 + $0x4a4] ss:$16 sps:$4 sm:$0xff]   ;;  %v11029_v62 = vld [vmem:[%s12719_s21 + $0x4ac] ss:$16 sps:$4 sm:$0xff]   ;;  %v11093_v55 = vld [vmem:[%s12719_s21 + $0x608] ss:$16 sps:$4 sm:$0xff]  }
  0xda   : > { %6850 = vmatpush1.bf16.msra.mxu0 %v10952_v63  ;;  %7986 = vmatpush1.bf16.msra.mxu1 %v10955_v0  ;;  %v11024_v63 = vld [vmem:[%s12719_s21 + $0x4a0] ss:$16 sps:$4 sm:$0xff]   ;;  %v565_v0 = vpack.c.bf16 %v437_v60, %v437_v60  ;;  %v11099_v60 = vld [vmem:[%s12719_s21 + $0x628] ss:$16 sps:$4 sm:$0xff]  }
  0xdb   : > { %6851 = vmatprep.subr.bf16.mxu0 %v10960_v1  ;;  %7987 = vmatprep.subr.bf16.mxu1 %v10963_v2  ;;  %v11027_v1 = vld [vmem:[%s12719_s21 + $0x4a8] ss:$16 sps:$4 sm:$0xff]   ;;  %v11032_v2 = vld [vmem:[%s12719_s21 + $0x4c4] ss:$16 sps:$4 sm:$0xff]  }
  0xde   : > { %6852 = vmatpush1.bf16.msra.mxu0 %v10958_v3  ;;  %7988 = vmatpush1.bf16.msra.mxu1 %v10961_v4  ;;  %v436_v3 = vld [vmem:[#allocation2 + $0x610] sm:$0x1]  ;;  %v11035_v4 = vld [vmem:[%s12719_s21 + $0x4cc] ss:$16 sps:$4 sm:$0xff]  }
  0xdf   : > { %6853 = vmatprep.subr.bf16.mxu0 %v10966_v5  ;;  %7989 = vmatprep.subr.bf16.mxu1 %v10969_v6  ;;  %v11030_v5 = vld [vmem:[%s12719_s21 + $0x4c0] ss:$16 sps:$4 sm:$0xff]   ;;  %v11033_v6 = vld [vmem:[%s12719_s21 + $0x4c8] ss:$16 sps:$4 sm:$0xff]  }
  0xe2   : > { %6854 = vmatpush1.bf16.msra.mxu0 %v10964_v7  ;;  %7990 = vmatpush1.bf16.msra.mxu1 %v10967_v8  ;;  %v564_v7 = vpack.c.bf16 %v436_v3, %v436_v3  ;;  %v247_v8 = vld [vmem:[#allocation2 + $0x28] sm:$0xff] }
  0xe3   : > { %6855 = vmatprep.subr.bf16.mxu0 %v10972_v9  ;;  %7991 = vmatprep.subr.bf16.mxu1 %v10975_v10  ;;  %v279_v9 = vld [vmem:[#allocation2 + $0x128] sm:$0xff]  ;;  %v11038_v10 = vld [vmem:[%s12719_s21 + $0x4e4] ss:$16 sps:$4 sm:$0xff]  }
  0xe4   : > { %v407_v3 = vld [vmem:[#allocation2 + $0x528] sm:$0xff] }
  0xe6   : > { %6856 = vmatpush1.bf16.msra.mxu0 %v10970_v11  ;;  %7992 = vmatpush1.bf16.msra.mxu1 %v10973_v12  ;;  %v11041_v11 = vld [vmem:[%s12719_s21 + $0x4ec] ss:$16 sps:$4 sm:$0xff]   ;;  %v471_v12 = vpack.c.bf16 %v279_v9, %v247_v8  ;;  %v11108_v8 = vld [vmem:[%s12719_s21 + $0x660] ss:$16 sps:$4 sm:$0xff]  }
  0xe7   : > { %6857 = vmatprep.subr.bf16.mxu0 %v10978_v13  ;;  %7993 = vmatprep.subr.bf16.mxu1 %v10981_v14  ;;  %v11036_v13 = vld [vmem:[%s12719_s21 + $0x4e0] ss:$16 sps:$4 sm:$0xff]   ;;  %v11039_v14 = vld [vmem:[%s12719_s21 + $0x4e8] ss:$16 sps:$4 sm:$0xff]  }
  0xea   : > { %6858 = vmatpush1.bf16.msra.mxu0 %v10976_v15  ;;  %7994 = vmatpush1.bf16.msra.mxu1 %v10979_v16  ;;  %v11044_v15 = vld [vmem:[%s12719_s21 + $0x504] ss:$16 sps:$4 sm:$0xff]   ;;  %v11047_v16 = vld [vmem:[%s12719_s21 + $0x50c] ss:$16 sps:$4 sm:$0xff]  }
  0xeb   : > { %6859 = vmatprep.subr.bf16.mxu0 %v10984_v17  ;;  %7995 = vmatprep.subr.bf16.mxu1 %v10987_v18  ;;  %v11042_v17 = vld [vmem:[%s12719_s21 + $0x500] ss:$16 sps:$4 sm:$0xff]   ;;  %v11045_v18 = vld [vmem:[%s12719_s21 + $0x508] ss:$16 sps:$4 sm:$0xff]  }
  0xee   : > { %6860 = vmatpush1.bf16.msra.mxu0 %v10982_v19  ;;  %7996 = vmatpush1.bf16.msra.mxu1 %v10985_v20  ;;  %v11050_v19 = vld [vmem:[%s12719_s21 + $0x524] ss:$16 sps:$4 sm:$0xff]   ;;  %v11053_v20 = vld [vmem:[%s12719_s21 + $0x52c] ss:$16 sps:$4 sm:$0xff]  }
  0xef   : > { %6861 = vmatprep.subr.bf16.mxu0 %v10990_v21  ;;  %7997 = vmatprep.subr.bf16.mxu1 %v10993_v22  ;;  %v11048_v21 = vld [vmem:[%s12719_s21 + $0x520] ss:$16 sps:$4 sm:$0xff]   ;;  %v11051_v22 = vld [vmem:[%s12719_s21 + $0x528] ss:$16 sps:$4 sm:$0xff]  }
  0xf2   : > { %6862 = vmatpush1.bf16.msra.mxu0 %v10988_v23  ;;  %7998 = vmatpush1.bf16.msra.mxu1 %v10991_v24  ;;  %v11056_v23 = vld [vmem:[%s12719_s21 + $0x544] ss:$16 sps:$4 sm:$0xff]   ;;  %v11059_v24 = vld [vmem:[%s12719_s21 + $0x54c] ss:$16 sps:$4 sm:$0xff]  }
  0xf3   : > { %6902 = vmatprep.subr.bf16.mxu0 %v10996_v25  ;;  %8038 = vmatprep.subr.bf16.mxu1 %v10999_v28  ;;  %v11054_v25 = vld [vmem:[%s12719_s21 + $0x540] ss:$16 sps:$4 sm:$0xff]   ;;  %v11065_v28 = vld [vmem:[%s12719_s21 + $0x56c] ss:$16 sps:$4 sm:$0xff]  }
  0xf5   : > { %6864 = vmatmul.mubr.bf16.vlgmr.msra.gmra.mrb[0].mxu0 %v468_v29  ;;  %8000 = vmatmul.mubr.bf16.vlgmr.msra.gmra.mrb[0].mxu1 %v468_v29  ;;  %v11060_v29 = vld [vmem:[%s12719_s21 + $0x560] ss:$16 sps:$4 sm:$0xff]  }
  0xf6   : > { %6903 = vmatpush1.bf16.msra.mxu0 %v10994_v32  ;;  %8039 = vmatpush1.bf16.msra.mxu1 %v10997_v33  ;;  %v11071_v32 = vld [vmem:[%s12719_s21 + $0x58c] ss:$16 sps:$4 sm:$0xff]   ;;  %v11066_v33 = vld [vmem:[%s12719_s21 + $0x580] ss:$16 sps:$4 sm:$0xff]  }
  0xf7   : > { %6904 = vmatprep.subr.bf16.mxu0 %v11002_v34  ;;  %8040 = vmatprep.subr.bf16.mxu1 %v11005_v35  ;;  %v11069_v34 = vld [vmem:[%s12719_s21 + $0x588] ss:$16 sps:$4 sm:$0xff]   ;;  %v11074_v35 = vld [vmem:[%s12719_s21 + $0x5a4] ss:$16 sps:$4 sm:$0xff]  }
  0xf8   : > { %6873 = vmatprep.mubr.bf16.mxu0 %v501_v37  ;;  %8009 = vmatprep.mubr.bf16.mxu1 %v501_v37  ;;  %v11072_v37 = vld [vmem:[%s12719_s21 + $0x5a0] ss:$16 sps:$4 sm:$0xff]  }
  0xfa   : > { %6905 = vmatpush1.bf16.msra.mxu0 %v11000_v36  ;;  %8041 = vmatpush1.bf16.msra.mxu1 %v11003_v38  ;;  %v11077_v36 = vld [vmem:[%s12719_s21 + $0x5ac] ss:$16 sps:$4 sm:$0xff]   ;;  %v11075_v38 = vld [vmem:[%s12719_s21 + $0x5a8] ss:$16 sps:$4 sm:$0xff]  }
  0xfb   : > { %6906 = vmatprep.subr.bf16.mxu0 %v11008_v39  ;;  %8042 = vmatprep.subr.bf16.mxu1 %v11011_v42  ;;  %v11080_v39 = vld [vmem:[%s12719_s21 + $0x5c4] ss:$16 sps:$4 sm:$0xff]   ;;  %v11081_v42 = vld [vmem:[%s12719_s21 + $0x5c8] ss:$16 sps:$4 sm:$0xff]  }
  0xfd   : > { %6874 = vmatmul.mubr.bf16.gmra.mrb[4].mxu0 %v500_v44  ;;  %8010 = vmatmul.mubr.bf16.gmra.mrb[4].mxu1 %v500_v44  ;;  %v11089_v44 = vld [vmem:[%s12719_s21 + $0x5ec] ss:$16 sps:$4 sm:$0xff]  }
  0xfe   : > { %6907 = vmatpush1.bf16.msra.mxu0 %v11006_v43  ;;  %8043 = vmatpush1.bf16.msra.mxu1 %v11009_v47  ;;  %v11086_v43 = vld [vmem:[%s12719_s21 + $0x5e4] ss:$16 sps:$4 sm:$0xff]  }
  0xff   : > { %6908 = vmatprep.subr.bf16.mxu0 %v11014_v48  ;;  %8044 = vmatprep.subr.bf16.mxu1 %v11017_v49  ;;  %v246_v47 = vld [vmem:[#allocation2 + $0x20] sm:$0xff] }
 0x100   : > { %6883 = vmatprep.mubr.bf16.mxu0 %v533_v51  ;;  %8019 = vmatprep.mubr.bf16.mxu1 %v533_v51  ;;  %v278_v48 = vld [vmem:[#allocation2 + $0x120] sm:$0xff]  ;;  %v311_v51 = vld [vmem:[#allocation2 + $0x228] sm:$0xff] }
 0x101   : > { %v11092_v49 = vld [vmem:[%s12719_s21 + $0x604] ss:$16 sps:$4 sm:$0xff]  }
 0x102   : > { %6909 = vmatpush1.bf16.msra.mxu0 %v11012_v50  ;;  %8045 = vmatpush1.bf16.msra.mxu1 %v11015_v52  ;;  %v11095_v50 = vld [vmem:[%s12719_s21 + $0x60c] ss:$16 sps:$4 sm:$0xff]   ;;  %v470_v52 = vpack.c.bf16 %v278_v48, %v246_v47  ;;  %v11150_v47 = vld [vmem:[%s12719_s21 + $0x740] ss:$16 sps:$4 sm:$0xff]   ;;  %v11153_v48 = vld [vmem:[%s12719_s21 + $0x748] ss:$16 sps:$4 sm:$0xff]  }
 0x103   : > { %6910 = vmatprep.subr.bf16.mxu0 %v11020_v53  ;;  %8046 = vmatprep.subr.bf16.mxu1 %v11023_v56  ;;  %v343_v53 = vld [vmem:[#allocation2 + $0x328] sm:$0xff]  ;;  %v11098_v56 = vld [vmem:[%s12719_s21 + $0x624] ss:$16 sps:$4 sm:$0xff]  }
 0x105   : > { %6884 = vmatmul.mubr.bf16.gmra.mrb[8].mxu0 %v532_v59  ;;  %8020 = vmatmul.mubr.bf16.gmra.mrb[8].mxu1 %v532_v59  ;;  %v503_v59 = vpack.c.bf16 %v343_v53, %v311_v51  ;;  %v11156_v51 = vld [vmem:[%s12719_s21 + $0x760] ss:$16 sps:$4 sm:$0xff]   ;;  %v11164_v53 = vld [vmem:[%s12719_s21 + $0x784] ss:$16 sps:$4 sm:$0xff]  }
 0x106   : > { %6911 = vmatpush1.bf16.msra.mxu0 %v11018_v57  ;;  %8047 = vmatpush1.bf16.msra.mxu1 %v11021_v58  ;;  %v11101_v57 = vld [vmem:[%s12719_s21 + $0x62c] ss:$16 sps:$4 sm:$0xff]   ;;  %v11096_v58 = vld [vmem:[%s12719_s21 + $0x620] ss:$16 sps:$4 sm:$0xff]  }
 0x107   : > { %6912 = vmatprep.subr.bf16.mxu0 %v11026_v61  ;;  %8048 = vmatprep.subr.bf16.mxu1 %v11029_v62  ;;  %v310_v61 = vld [vmem:[#allocation2 + $0x220] sm:$0xff] }
 0x108   : > { %6893 = vmatprep.mubr.bf16.mxu0 %v565_v0  ;;  %8029 = vmatprep.mubr.bf16.mxu1 %v565_v0  ;;  %v342_v62 = vld [vmem:[#allocation2 + $0x320] sm:$0xff]  ;;  %v11107_v0 = vld [vmem:[%s12719_s21 + $0x64c] ss:$16 sps:$4 sm:$0xff]  }
 0x10a   : > { %6913 = vmatpush1.bf16.msra.mxu0 %v11024_v63  ;;  %8049 = vmatpush1.bf16.msra.mxu1 %v11027_v1  ;;  %v11104_v63 = vld [vmem:[%s12719_s21 + $0x644] ss:$16 sps:$4 sm:$0xff]   ;;  %v375_v1 = vld [vmem:[#allocation2 + $0x428] sm:$0xff] }
 0x10b   : > { %6914 = vmatprep.subr.bf16.mxu0 %v11032_v2  ;;  %8050 = vmatprep.subr.bf16.mxu1 %v11035_v4  ;;  %v502_v2 = vpack.c.bf16 %v342_v62, %v310_v61  ;;  %v11102_v4 = vld [vmem:[%s12719_s21 + $0x640] ss:$16 sps:$4 sm:$0xff]   ;;  %v535_v9 = vpack.c.bf16 %v407_v3, %v375_v1  ;;  %v11176_v61 = vld [vmem:[%s12719_s21 + $0x7c4] ss:$16 sps:$4 sm:$0xff]   ;;  %v11179_v62 = vld [vmem:[%s12719_s21 + $0x7cc] ss:$16 sps:$4 sm:$0xff]  }
 0x10c   : > { %v11182_v1 = vld [vmem:[%s12719_s21 + $0x7e4] ss:$16 sps:$4 sm:$0xff]   ;;  %v11180_v3 = vld [vmem:[%s12719_s21 + $0x7e0] ss:$16 sps:$4 sm:$0xff]  }
 0x10d   : > { %6894 = vmatmul.mubr.bf16.gmra.mrb[12].mxu0 %v564_v7  ;;  %8030 = vmatmul.mubr.bf16.gmra.mrb[12].mxu1 %v564_v7  ;;  %v11113_v7 = vld [vmem:[%s12719_s21 + $0x66c] ss:$16 sps:$4 sm:$0xff]  }
 0x10e   : > { %6915 = vmatpush1.bf16.msra.mxu0 %v11030_v5  ;;  %8051 = vmatpush1.bf16.msra.mxu1 %v11033_v6  ;;  %v11105_v5 = vld [vmem:[%s12719_s21 + $0x648] ss:$16 sps:$4 sm:$0xff]   ;;  %v11110_v6 = vld [vmem:[%s12719_s21 + $0x664] ss:$16 sps:$4 sm:$0xff]  }
 0x10f   : > { %6916 = vmatprep.subr.bf16.mxu0 %v11038_v10  ;;  %8052 = vmatprep.subr.bf16.mxu1 %v11041_v11  ;;  %v11111_v10 = vld [vmem:[%s12719_s21 + $0x668] ss:$16 sps:$4 sm:$0xff]   ;;  %v374_v11 = vld [vmem:[#allocation2 + $0x420] sm:$0xff] }
 0x110   : > { %6934 = vmatprep.mubr.bf16.mxu0 %v471_v12  ;;  %8070 = vmatprep.mubr.bf16.mxu1 %v471_v12  ;;  %v406_v12 = vld [vmem:[#allocation2 + $0x520] sm:$0xff] }
 0x112   : > { %6917 = vmatpush1.bf16.msra.mxu0 %v11036_v13  ;;  %8053 = vmatpush1.bf16.msra.mxu1 %v11039_v14  ;;  %v11116_v13 = vld [vmem:[%s12719_s21 + $0x684] ss:$16 sps:$4 sm:$0xff]   ;;  %v11119_v14 = vld [vmem:[%s12719_s21 + $0x68c] ss:$16 sps:$4 sm:$0xff]  }
 0x113   : > { %6918 = vmatprep.subr.bf16.mxu0 %v11044_v15  ;;  %8054 = vmatprep.subr.bf16.mxu1 %v11047_v16  ;;  %v534_v15 = vpack.c.bf16 %v406_v12, %v374_v11  ;;  %v439_v16 = vld [vmem:[#allocation2 + $0x628] sm:$0x1]  ;;  %v313_v12 = vld [vmem:[#allocation2 + $0x238] sm:$0xff] }
 0x116   : > { %6919 = vmatpush1.bf16.msra.mxu0 %v11042_v17  ;;  %8055 = vmatpush1.bf16.msra.mxu1 %v11045_v18  ;;  %v11114_v17 = vld [vmem:[%s12719_s21 + $0x680] ss:$16 sps:$4 sm:$0xff]   ;;  %v11117_v18 = vld [vmem:[%s12719_s21 + $0x688] ss:$16 sps:$4 sm:$0xff]  }
 0x117   : > { %6920 = vmatprep.subr.bf16.mxu0 %v11050_v19  ;;  %8056 = vmatprep.subr.bf16.mxu1 %v11053_v20  ;;  %v11122_v19 = vld [vmem:[%s12719_s21 + $0x6a4] ss:$16 sps:$4 sm:$0xff]   ;;  %v11125_v20 = vld [vmem:[%s12719_s21 + $0x6ac] ss:$16 sps:$4 sm:$0xff]  }
 0x11a   : > { %6921 = vmatpush1.bf16.msra.mxu0 %v11048_v21  ;;  %8057 = vmatpush1.bf16.msra.mxu1 %v11051_v22  ;;  %v567_v21 = vpack.c.bf16 %v439_v16, %v439_v16  ;;  %v11120_v22 = vld [vmem:[%s12719_s21 + $0x6a0] ss:$16 sps:$4 sm:$0xff]  }
 0x11b   : > { %6922 = vmatprep.subr.bf16.mxu0 %v11056_v23  ;;  %8058 = vmatprep.subr.bf16.mxu1 %v11059_v24  ;;  %v11123_v23 = vld [vmem:[%s12719_s21 + $0x6a8] ss:$16 sps:$4 sm:$0xff]   ;;  %v11128_v24 = vld [vmem:[%s12719_s21 + $0x6c4] ss:$16 sps:$4 sm:$0xff]  }
 0x11e   : > { %6923 = vmatpush1.bf16.msra.mxu0 %v11054_v25  ;;  %8059 = vmatpush1.bf16.msra.mxu1 %v11057_v26  ;;  %v438_v25 = vld [vmem:[#allocation2 + $0x620] sm:$0x1]  ;;  %v11131_v26 = vld [vmem:[%s12719_s21 + $0x6cc] ss:$16 sps:$4 sm:$0xff]  }
 0x11f   : > { %6924 = vmatprep.subr.bf16.mxu0 %v11062_v27  ;;  %8060 = vmatprep.subr.bf16.mxu1 %v11065_v28  ;;  %v566_v27 = vpack.c.bf16 %v438_v25, %v438_v25  ;;  %v249_v28 = vld [vmem:[#allocation2 + $0x38] sm:$0xff] }
 0x122   : > { %6925 = vmatpush1.bf16.msra.mxu0 %v11060_v29  ;;  %8061 = vmatpush1.bf16.msra.mxu1 %v11063_v30  ;;  %v281_v29 = vld [vmem:[#allocation2 + $0x138] sm:$0xff]  ;;  %v11126_v30 = vld [vmem:[%s12719_s21 + $0x6c0] ss:$16 sps:$4 sm:$0xff]  }
 0x123   : > { %6926 = vmatprep.subr.bf16.mxu0 %v11068_v31  ;;  %8062 = vmatprep.subr.bf16.mxu1 %v11071_v32  ;;  %v11129_v31 = vld [vmem:[%s12719_s21 + $0x6c8] ss:$16 sps:$4 sm:$0xff]   ;;  %v11134_v32 = vld [vmem:[%s12719_s21 + $0x6e4] ss:$16 sps:$4 sm:$0xff]  }
 0x126   : > { %6927 = vmatpush1.bf16.msra.mxu0 %v11066_v33  ;;  %8063 = vmatpush1.bf16.msra.mxu1 %v11069_v34  ;;  %v11137_v33 = vld [vmem:[%s12719_s21 + $0x6ec] ss:$16 sps:$4 sm:$0xff]   ;;  %v473_v34 = vpack.c.bf16 %v281_v29, %v249_v28  ;;  %v11206_v28 = vld [vmem:[%s12719_s21 + $0x864] ss:$16 sps:$4 sm:$0xff]  }
 0x127   : > { %6928 = vmatprep.subr.bf16.mxu0 %v11074_v35  ;;  %8064 = vmatprep.subr.bf16.mxu1 %v11077_v36  ;;  %v11132_v35 = vld [vmem:[%s12719_s21 + $0x6e0] ss:$16 sps:$4 sm:$0xff]   ;;  %v11135_v36 = vld [vmem:[%s12719_s21 + $0x6e8] ss:$16 sps:$4 sm:$0xff]   ;;  %v11209_v29 = vld [vmem:[%s12719_s21 + $0x86c] ss:$16 sps:$4 sm:$0xff]  }
 0x12a   : > { %6929 = vmatpush1.bf16.msra.mxu0 %v11072_v37  ;;  %8065 = vmatpush1.bf16.msra.mxu1 %v11075_v38  ;;  %v11140_v37 = vld [vmem:[%s12719_s21 + $0x704] ss:$16 sps:$4 sm:$0xff]   ;;  %v11143_v38 = vld [vmem:[%s12719_s21 + $0x70c] ss:$16 sps:$4 sm:$0xff]  }
 0x12b   : > { %6930 = vmatprep.subr.bf16.mxu0 %v11080_v39  ;;  %8066 = vmatprep.subr.bf16.mxu1 %v11083_v40  ;;  %v11138_v39 = vld [vmem:[%s12719_s21 + $0x700] ss:$16 sps:$4 sm:$0xff]   ;;  %v11141_v40 = vld [vmem:[%s12719_s21 + $0x708] ss:$16 sps:$4 sm:$0xff]  }
 0x12e   : > { %6931 = vmatpush1.bf16.msra.mxu0 %v11078_v41  ;;  %8067 = vmatpush1.bf16.msra.mxu1 %v11081_v42  ;;  %v11146_v41 = vld [vmem:[%s12719_s21 + $0x724] ss:$16 sps:$4 sm:$0xff]   ;;  %v11149_v42 = vld [vmem:[%s12719_s21 + $0x72c] ss:$16 sps:$4 sm:$0xff]  }
 0x12f   : > { %6932 = vmatprep.subr.bf16.mxu0 %v11086_v43  ;;  %8068 = vmatprep.subr.bf16.mxu1 %v11089_v44  ;;  %v11144_v43 = vld [vmem:[%s12719_s21 + $0x720] ss:$16 sps:$4 sm:$0xff]   ;;  %v11147_v44 = vld [vmem:[%s12719_s21 + $0x728] ss:$16 sps:$4 sm:$0xff]  }
 0x132   : > { %6933 = vmatpush1.bf16.msra.mxu0 %v11084_v45  ;;  %8069 = vmatpush1.bf16.msra.mxu1 %v11087_v46  ;;  %v11152_v45 = vld [vmem:[%s12719_s21 + $0x744] ss:$16 sps:$4 sm:$0xff]   ;;  %v11155_v46 = vld [vmem:[%s12719_s21 + $0x74c] ss:$16 sps:$4 sm:$0xff]  }
 0x133   : > { %6973 = vmatprep.subr.bf16.mxu0 %v11092_v49  ;;  %8109 = vmatprep.subr.bf16.mxu1 %v11095_v50  ;;  %v11158_v49 = vld [vmem:[%s12719_s21 + $0x764] ss:$16 sps:$4 sm:$0xff]   ;;  %v11161_v50 = vld [vmem:[%s12719_s21 + $0x76c] ss:$16 sps:$4 sm:$0xff]  }
 0x135   : > { %6935 = vmatmul.mubr.bf16.vlgmr.msra.gmra.mrb[0].mxu0 %v470_v52  ;;  %8071 = vmatmul.mubr.bf16.vlgmr.msra.gmra.mrb[0].mxu1 %v470_v52  ;;  %v11159_v52 = vld [vmem:[%s12719_s21 + $0x768] ss:$16 sps:$4 sm:$0xff]  }
 0x136   : > { %6974 = vmatpush1.bf16.msra.mxu0 %v11090_v54  ;;  %8110 = vmatpush1.bf16.msra.mxu1 %v11093_v55  ;;  %v11167_v54 = vld [vmem:[%s12719_s21 + $0x78c] ss:$16 sps:$4 sm:$0xff]   ;;  %v11162_v55 = vld [vmem:[%s12719_s21 + $0x780] ss:$16 sps:$4 sm:$0xff]  }
 0x137   : > { %6975 = vmatprep.subr.bf16.mxu0 %v11098_v56  ;;  %8111 = vmatprep.subr.bf16.mxu1 %v11101_v57  ;;  %v11165_v56 = vld [vmem:[%s12719_s21 + $0x788] ss:$16 sps:$4 sm:$0xff]   ;;  %v11170_v57 = vld [vmem:[%s12719_s21 + $0x7a4] ss:$16 sps:$4 sm:$0xff]  }
 0x138   : > { %6944 = vmatprep.mubr.bf16.mxu0 %v503_v59  ;;  %8080 = vmatprep.mubr.bf16.mxu1 %v503_v59  ;;  %v11168_v59 = vld [vmem:[%s12719_s21 + $0x7a0] ss:$16 sps:$4 sm:$0xff]  }
 0x13a   : > { %6976 = vmatpush1.bf16.msra.mxu0 %v11096_v58  ;;  %8112 = vmatpush1.bf16.msra.mxu1 %v11099_v60  ;;  %v11173_v58 = vld [vmem:[%s12719_s21 + $0x7ac] ss:$16 sps:$4 sm:$0xff]   ;;  %v11171_v60 = vld [vmem:[%s12719_s21 + $0x7a8] ss:$16 sps:$4 sm:$0xff]  }
 0x13b   : > { %6977 = vmatprep.subr.bf16.mxu0 %v11104_v63  ;;  %8113 = vmatprep.subr.bf16.mxu1 %v11107_v0  ;;  %v11174_v63 = vld [vmem:[%s12719_s21 + $0x7c0] ss:$16 sps:$4 sm:$0xff]   ;;  %v11177_v0 = vld [vmem:[%s12719_s21 + $0x7c8] ss:$16 sps:$4 sm:$0xff]  }
 0x13d   : > { %6945 = vmatmul.mubr.bf16.gmra.mrb[4].mxu0 %v502_v2  ;;  %8081 = vmatmul.mubr.bf16.gmra.mrb[4].mxu1 %v502_v2  ;;  %v11185_v2 = vld [vmem:[%s12719_s21 + $0x7ec] ss:$16 sps:$4 sm:$0xff]  }
 0x13e   : > { %6978 = vmatpush1.bf16.msra.mxu0 %v11102_v4  ;;  %8114 = vmatpush1.bf16.msra.mxu1 %v11105_v5  ;;  %v11183_v4 = vld [vmem:[%s12719_s21 + $0x7e8] ss:$16 sps:$4 sm:$0xff]   ;;  %v11188_v5 = vld [vmem:[%s12719_s21 + $0x804] ss:$16 sps:$4 sm:$0xff]  }
 0x13f   : > { %6979 = vmatprep.subr.bf16.mxu0 %v11110_v6  ;;  %8115 = vmatprep.subr.bf16.mxu1 %v11113_v7  ;;  %v248_v6 = vld [vmem:[#allocation2 + $0x30] sm:$0xff] }
 0x140   : > { %6954 = vmatprep.mubr.bf16.mxu0 %v535_v9  ;;  %8090 = vmatprep.mubr.bf16.mxu1 %v535_v9  ;;  %v280_v7 = vld [vmem:[#allocation2 + $0x130] sm:$0xff] }
 0x141   : > { %v11186_v9 = vld [vmem:[%s12719_s21 + $0x800] ss:$16 sps:$4 sm:$0xff]   ;;  %v472_v11 = vpack.c.bf16 %v280_v7, %v248_v6  ;;  %v11249_v6 = vld [vmem:[%s12719_s21 + $0x948] ss:$16 sps:$4 sm:$0xff]   ;;  %v11254_v7 = vld [vmem:[%s12719_s21 + $0x964] ss:$16 sps:$4 sm:$0xff]  }
 0x142   : > { %6980 = vmatpush1.bf16.msra.mxu0 %v11108_v8  ;;  %8116 = vmatpush1.bf16.msra.mxu1 %v11111_v10  ;;  %v11191_v8 = vld [vmem:[%s12719_s21 + $0x80c] ss:$16 sps:$4 sm:$0xff]   ;;  %v11189_v10 = vld [vmem:[%s12719_s21 + $0x808] ss:$16 sps:$4 sm:$0xff]  }
 0x143   : > { %6981 = vmatprep.subr.bf16.mxu0 %v11116_v13  ;;  %8117 = vmatprep.subr.bf16.mxu1 %v11119_v14  ;;  %v345_v13 = vld [vmem:[#allocation2 + $0x338] sm:$0xff]  ;;  %v11194_v14 = vld [vmem:[%s12719_s21 + $0x824] ss:$16 sps:$4 sm:$0xff]  }
 0x144   : > { %v505_v16 = vpack.c.bf16 %v345_v13, %v313_v12  ;;  %v11263_v12 = vld [vmem:[%s12719_s21 + $0x98c] ss:$16 sps:$4 sm:$0xff]   ;;  %v11258_v13 = vld [vmem:[%s12719_s21 + $0x980] ss:$16 sps:$4 sm:$0xff]  }
 0x145   : > { %6955 = vmatmul.mubr.bf16.gmra.mrb[8].mxu0 %v534_v15  ;;  %8091 = vmatmul.mubr.bf16.gmra.mrb[8].mxu1 %v534_v15  ;;  %v11197_v15 = vld [vmem:[%s12719_s21 + $0x82c] ss:$16 sps:$4 sm:$0xff]  }
 0x146   : > { %6982 = vmatpush1.bf16.msra.mxu0 %v11114_v17  ;;  %8118 = vmatpush1.bf16.msra.mxu1 %v11117_v18  ;;  %v11192_v17 = vld [vmem:[%s12719_s21 + $0x820] ss:$16 sps:$4 sm:$0xff]   ;;  %v11195_v18 = vld [vmem:[%s12719_s21 + $0x828] ss:$16 sps:$4 sm:$0xff]  }
 0x147   : > { %6983 = vmatprep.subr.bf16.mxu0 %v11122_v19  ;;  %8119 = vmatprep.subr.bf16.mxu1 %v11125_v20  ;;  %v312_v19 = vld [vmem:[#allocation2 + $0x230] sm:$0xff] }
 0x148   : > { %6964 = vmatprep.mubr.bf16.mxu0 %v567_v21  ;;  %8100 = vmatprep.mubr.bf16.mxu1 %v567_v21  ;;  %v344_v20 = vld [vmem:[#allocation2 + $0x330] sm:$0xff] }
 0x149   : > { %v11200_v21 = vld [vmem:[%s12719_s21 + $0x844] ss:$16 sps:$4 sm:$0xff]   ;;  %v504_v25 = vpack.c.bf16 %v344_v20, %v312_v19  ;;  %v11275_v20 = vld [vmem:[%s12719_s21 + $0x9cc] ss:$16 sps:$4 sm:$0xff]  }
 0x14a   : > { %6984 = vmatpush1.bf16.msra.mxu0 %v11120_v22  ;;  %8120 = vmatpush1.bf16.msra.mxu1 %v11123_v23  ;;  %v11203_v22 = vld [vmem:[%s12719_s21 + $0x84c] ss:$16 sps:$4 sm:$0xff]   ;;  %v11198_v23 = vld [vmem:[%s12719_s21 + $0x840] ss:$16 sps:$4 sm:$0xff]   ;;  %v11272_v19 = vld [vmem:[%s12719_s21 + $0x9c4] ss:$16 sps:$4 sm:$0xff]  }
 0x14b   : > { %6985 = vmatprep.subr.bf16.mxu0 %v11128_v24  ;;  %8121 = vmatprep.subr.bf16.mxu1 %v11131_v26  ;;  %v11201_v24 = vld [vmem:[%s12719_s21 + $0x848] ss:$16 sps:$4 sm:$0xff]  }
 0x14c   : > { %v377_v26 = vld [vmem:[#allocation2 + $0x438] sm:$0xff] }
 0x14d   : > { %6965 = vmatmul.mubr.bf16.gmra.mrb[12].mxu0 %v566_v27  ;;  %8101 = vmatmul.mubr.bf16.gmra.mrb[12].mxu1 %v566_v27  ;;  %v409_v27 = vld [vmem:[#allocation2 + $0x538] sm:$0xff] }
 0x14e   : > { %6986 = vmatpush1.bf16.msra.mxu0 %v11126_v30  ;;  %8122 = vmatpush1.bf16.msra.mxu1 %v11129_v31  ;;  %v11204_v30 = vld [vmem:[%s12719_s21 + $0x860] ss:$16 sps:$4 sm:$0xff]   ;;  %v537_v31 = vpack.c.bf16 %v409_v27, %v377_v26  ;;  %v11279_v26 = vld [vmem:[%s12719_s21 + $0x9e8] ss:$16 sps:$4 sm:$0xff]  }
 0x14f   : > { %6987 = vmatprep.subr.bf16.mxu0 %v11134_v32  ;;  %8123 = vmatprep.subr.bf16.mxu1 %v11137_v33  ;;  %v11207_v32 = vld [vmem:[%s12719_s21 + $0x868] ss:$16 sps:$4 sm:$0xff]   ;;  %v376_v33 = vld [vmem:[#allocation2 + $0x430] sm:$0xff]  ;;  %v250_v27 = vld [vmem:[#allocation2 + $0x40] sm:$0xff] }
 0x150   : > { %7005 = vmatprep.mubr.bf16.mxu0 %v473_v34  ;;  %8141 = vmatprep.mubr.bf16.mxu1 %v473_v34  ;;  %v408_v34 = vld [vmem:[#allocation2 + $0x530] sm:$0xff] }
 0x152   : > { %6988 = vmatpush1.bf16.msra.mxu0 %v11132_v35  ;;  %8124 = vmatpush1.bf16.msra.mxu1 %v11135_v36  ;;  %v11212_v35 = vld [vmem:[%s12719_s21 + $0x884] ss:$16 sps:$4 sm:$0xff]   ;;  %v11215_v36 = vld [vmem:[%s12719_s21 + $0x88c] ss:$16 sps:$4 sm:$0xff]  }
 0x153   : > { %6989 = vmatprep.subr.bf16.mxu0 %v11140_v37  ;;  %8125 = vmatprep.subr.bf16.mxu1 %v11143_v38  ;;  %v11210_v37 = vld [vmem:[%s12719_s21 + $0x880] ss:$16 sps:$4 sm:$0xff]   ;;  %v536_v38 = vpack.c.bf16 %v408_v34, %v376_v33  ;;  %v347_v33 = vld [vmem:[#allocation2 + $0x348] sm:$0xff] }
 0x154   : > { %v11282_v34 = vld [vmem:[%s12719_s21 + $0xa00] ss:$16 sps:$4 sm:$0xff]  }
 0x156   : > { %6990 = vmatpush1.bf16.msra.mxu0 %v11138_v39  ;;  %8126 = vmatpush1.bf16.msra.mxu1 %v11141_v40  ;;  %v441_v39 = vld [vmem:[#allocation2 + $0x638] sm:$0x1] }
 0x157   : > { %6991 = vmatprep.subr.bf16.mxu0 %v11146_v41  ;;  %8127 = vmatprep.subr.bf16.mxu1 %v11149_v42  ;;  %v11213_v40 = vld [vmem:[%s12719_s21 + $0x888] ss:$16 sps:$4 sm:$0xff]   ;;  %v11218_v41 = vld [vmem:[%s12719_s21 + $0x8a4] ss:$16 sps:$4 sm:$0xff]   ;;  %v11221_v42 = vld [vmem:[%s12719_s21 + $0x8ac] ss:$16 sps:$4 sm:$0xff]  }
 0x15a   : > { %6992 = vmatpush1.bf16.msra.mxu0 %v11144_v43  ;;  %8128 = vmatpush1.bf16.msra.mxu1 %v11147_v44  ;;  %v569_v43 = vpack.c.bf16 %v441_v39, %v441_v39  ;;  %v11216_v44 = vld [vmem:[%s12719_s21 + $0x8a0] ss:$16 sps:$4 sm:$0xff]  }
 0x15b   : > { %6993 = vmatprep.subr.bf16.mxu0 %v11152_v45  ;;  %8129 = vmatprep.subr.bf16.mxu1 %v11155_v46  ;;  %v11219_v45 = vld [vmem:[%s12719_s21 + $0x8a8] ss:$16 sps:$4 sm:$0xff]   ;;  %v440_v46 = vld [vmem:[#allocation2 + $0x630] sm:$0x1] }
 0x15e   : > { %6994 = vmatpush1.bf16.msra.mxu0 %v11150_v47  ;;  %8130 = vmatpush1.bf16.msra.mxu1 %v11153_v48  ;;  %v11224_v47 = vld [vmem:[%s12719_s21 + $0x8c4] ss:$16 sps:$4 sm:$0xff]   ;;  %v11227_v48 = vld [vmem:[%s12719_s21 + $0x8cc] ss:$16 sps:$4 sm:$0xff]  }
 0x15f   : > { %6995 = vmatprep.subr.bf16.mxu0 %v11158_v49  ;;  %8131 = vmatprep.subr.bf16.mxu1 %v11161_v50  ;;  %v11222_v49 = vld [vmem:[%s12719_s21 + $0x8c0] ss:$16 sps:$4 sm:$0xff]   ;;  %v11225_v50 = vld [vmem:[%s12719_s21 + $0x8c8] ss:$16 sps:$4 sm:$0xff]  }
 0x162   : > { %6996 = vmatpush1.bf16.msra.mxu0 %v11156_v51  ;;  %8132 = vmatpush1.bf16.msra.mxu1 %v11159_v52  ;;  %v568_v51 = vpack.c.bf16 %v440_v46, %v440_v46  ;;  %v251_v52 = vld [vmem:[#allocation2 + $0x48] sm:$0xff] }
 0x163   : > { %6997 = vmatprep.subr.bf16.mxu0 %v11164_v53  ;;  %8133 = vmatprep.subr.bf16.mxu1 %v11167_v54  ;;  %v283_v53 = vld [vmem:[#allocation2 + $0x148] sm:$0xff]  ;;  %v11230_v54 = vld [vmem:[%s12719_s21 + $0x8e4] ss:$16 sps:$4 sm:$0xff]  }
 0x166   : > { %6998 = vmatpush1.bf16.msra.mxu0 %v11162_v55  ;;  %8134 = vmatpush1.bf16.msra.mxu1 %v11165_v56  ;;  %v11233_v55 = vld [vmem:[%s12719_s21 + $0x8ec] ss:$16 sps:$4 sm:$0xff]   ;;  %v475_v56 = vpack.c.bf16 %v283_v53, %v251_v52  ;;  %v11300_v52 = vld [vmem:[%s12719_s21 + $0xa60] ss:$16 sps:$4 sm:$0xff]   ;;  %v11303_v53 = vld [vmem:[%s12719_s21 + $0xa68] ss:$16 sps:$4 sm:$0xff]  }
 0x167   : > { %6999 = vmatprep.subr.bf16.mxu0 %v11170_v57  ;;  %8135 = vmatprep.subr.bf16.mxu1 %v11173_v58  ;;  %v11228_v57 = vld [vmem:[%s12719_s21 + $0x8e0] ss:$16 sps:$4 sm:$0xff]   ;;  %v11231_v58 = vld [vmem:[%s12719_s21 + $0x8e8] ss:$16 sps:$4 sm:$0xff]  }
 0x16a   : > { %7000 = vmatpush1.bf16.msra.mxu0 %v11168_v59  ;;  %8136 = vmatpush1.bf16.msra.mxu1 %v11171_v60  ;;  %v11236_v59 = vld [vmem:[%s12719_s21 + $0x904] ss:$16 sps:$4 sm:$0xff]   ;;  %v11239_v60 = vld [vmem:[%s12719_s21 + $0x90c] ss:$16 sps:$4 sm:$0xff]  }
 0x16b   : > { %7001 = vmatprep.subr.bf16.mxu0 %v11176_v61  ;;  %8137 = vmatprep.subr.bf16.mxu1 %v11179_v62  ;;  %v11234_v61 = vld [vmem:[%s12719_s21 + $0x900] ss:$16 sps:$4 sm:$0xff]   ;;  %v11237_v62 = vld [vmem:[%s12719_s21 + $0x908] ss:$16 sps:$4 sm:$0xff]  }
 0x16e   : > { %7002 = vmatpush1.bf16.msra.mxu0 %v11174_v63  ;;  %8138 = vmatpush1.bf16.msra.mxu1 %v11177_v0  ;;  %v11242_v63 = vld [vmem:[%s12719_s21 + $0x924] ss:$16 sps:$4 sm:$0xff]   ;;  %v11245_v0 = vld [vmem:[%s12719_s21 + $0x92c] ss:$16 sps:$4 sm:$0xff]  }
 0x16f   : > { %7003 = vmatprep.subr.bf16.mxu0 %v11182_v1  ;;  %8139 = vmatprep.subr.bf16.mxu1 %v11185_v2  ;;  %v11240_v1 = vld [vmem:[%s12719_s21 + $0x920] ss:$16 sps:$4 sm:$0xff]   ;;  %v11243_v2 = vld [vmem:[%s12719_s21 + $0x928] ss:$16 sps:$4 sm:$0xff]  }
 0x172   : > { %7004 = vmatpush1.bf16.msra.mxu0 %v11180_v3  ;;  %8140 = vmatpush1.bf16.msra.mxu1 %v11183_v4  ;;  %v11248_v3 = vld [vmem:[%s12719_s21 + $0x944] ss:$16 sps:$4 sm:$0xff]   ;;  %v11251_v4 = vld [vmem:[%s12719_s21 + $0x94c] ss:$16 sps:$4 sm:$0xff]  }
 0x173   : > { %7044 = vmatprep.subr.bf16.mxu0 %v11188_v5  ;;  %8180 = vmatprep.subr.bf16.mxu1 %v11191_v8  ;;  %v11246_v5 = vld [vmem:[%s12719_s21 + $0x940] ss:$16 sps:$4 sm:$0xff]   ;;  %v11257_v8 = vld [vmem:[%s12719_s21 + $0x96c] ss:$16 sps:$4 sm:$0xff]  }
 0x175   : > { %7006 = vmatmul.mubr.bf16.vlgmr.msra.gmra.mrb[0].mxu0 %v472_v11  ;;  %8142 = vmatmul.mubr.bf16.vlgmr.msra.gmra.mrb[0].mxu1 %v472_v11  ;;  %v11260_v11 = vld [vmem:[%s12719_s21 + $0x984] ss:$16 sps:$4 sm:$0xff]  }
 0x176   : > { %7045 = vmatpush1.bf16.msra.mxu0 %v11186_v9  ;;  %8181 = vmatpush1.bf16.msra.mxu1 %v11189_v10  ;;  %v11252_v9 = vld [vmem:[%s12719_s21 + $0x960] ss:$16 sps:$4 sm:$0xff]   ;;  %v11255_v10 = vld [vmem:[%s12719_s21 + $0x968] ss:$16 sps:$4 sm:$0xff]  }
 0x177   : > { %7046 = vmatprep.subr.bf16.mxu0 %v11194_v14  ;;  %8182 = vmatprep.subr.bf16.mxu1 %v11197_v15  ;;  %v11261_v14 = vld [vmem:[%s12719_s21 + $0x988] ss:$16 sps:$4 sm:$0xff]   ;;  %v11266_v15 = vld [vmem:[%s12719_s21 + $0x9a4] ss:$16 sps:$4 sm:$0xff]  }
 0x178   : > { %7015 = vmatprep.mubr.bf16.mxu0 %v505_v16  ;;  %8151 = vmatprep.mubr.bf16.mxu1 %v505_v16  ;;  %v11269_v16 = vld [vmem:[%s12719_s21 + $0x9ac] ss:$16 sps:$4 sm:$0xff]  }
 0x17a   : > { %7047 = vmatpush1.bf16.msra.mxu0 %v11192_v17  ;;  %8183 = vmatpush1.bf16.msra.mxu1 %v11195_v18  ;;  %v11264_v17 = vld [vmem:[%s12719_s21 + $0x9a0] ss:$16 sps:$4 sm:$0xff]   ;;  %v11267_v18 = vld [vmem:[%s12719_s21 + $0x9a8] ss:$16 sps:$4 sm:$0xff]  }
 0x17b   : > { %7048 = vmatprep.subr.bf16.mxu0 %v11200_v21  ;;  %8184 = vmatprep.subr.bf16.mxu1 %v11203_v22  ;;  %v11270_v21 = vld [vmem:[%s12719_s21 + $0x9c0] ss:$16 sps:$4 sm:$0xff]   ;;  %v11273_v22 = vld [vmem:[%s12719_s21 + $0x9c8] ss:$16 sps:$4 sm:$0xff]  }
 0x17d   : > { %7016 = vmatmul.mubr.bf16.gmra.mrb[4].mxu0 %v504_v25  ;;  %8152 = vmatmul.mubr.bf16.gmra.mrb[4].mxu1 %v504_v25  ;;  %v11276_v25 = vld [vmem:[%s12719_s21 + $0x9e0] ss:$16 sps:$4 sm:$0xff]  }
 0x17e   : > { %7049 = vmatpush1.bf16.msra.mxu0 %v11198_v23  ;;  %8185 = vmatpush1.bf16.msra.mxu1 %v11201_v24  ;;  %v11278_v23 = vld [vmem:[%s12719_s21 + $0x9e4] ss:$16 sps:$4 sm:$0xff]   ;;  %v11281_v24 = vld [vmem:[%s12719_s21 + $0x9ec] ss:$16 sps:$4 sm:$0xff]  }
 0x17f   : > { %7050 = vmatprep.subr.bf16.mxu0 %v11206_v28  ;;  %8186 = vmatprep.subr.bf16.mxu1 %v11209_v29  ;;  %v282_v28 = vld [vmem:[#allocation2 + $0x140] sm:$0xff] }
 0x180   : > { %7025 = vmatprep.mubr.bf16.mxu0 %v537_v31  ;;  %8161 = vmatprep.mubr.bf16.mxu1 %v537_v31  ;;  %v11284_v29 = vld [vmem:[%s12719_s21 + $0xa04] ss:$16 sps:$4 sm:$0xff]   ;;  %v315_v31 = vld [vmem:[#allocation2 + $0x248] sm:$0xff] }
 0x181   : > { %v507_v39 = vpack.c.bf16 %v347_v33, %v315_v31  ;;  %v11348_v31 = vld [vmem:[%s12719_s21 + $0xb60] ss:$16 sps:$4 sm:$0xff]   ;;  %v11356_v33 = vld [vmem:[%s12719_s21 + $0xb84] ss:$16 sps:$4 sm:$0xff]  }
 0x182   : > { %7051 = vmatpush1.bf16.msra.mxu0 %v11204_v30  ;;  %8187 = vmatpush1.bf16.msra.mxu1 %v11207_v32  ;;  %v11287_v30 = vld [vmem:[%s12719_s21 + $0xa0c] ss:$16 sps:$4 sm:$0xff]   ;;  %v474_v32 = vpack.c.bf16 %v282_v28, %v250_v27  ;;  %v11342_v27 = vld [vmem:[%s12719_s21 + $0xb40] ss:$16 sps:$4 sm:$0xff]   ;;  %v11345_v28 = vld [vmem:[%s12719_s21 + $0xb48] ss:$16 sps:$4 sm:$0xff]  }
 0x183   : > { %7052 = vmatprep.subr.bf16.mxu0 %v11212_v35  ;;  %8188 = vmatprep.subr.bf16.mxu1 %v11215_v36  ;;  %v11285_v35 = vld [vmem:[%s12719_s21 + $0xa08] ss:$16 sps:$4 sm:$0xff]   ;;  %v11290_v36 = vld [vmem:[%s12719_s21 + $0xa24] ss:$16 sps:$4 sm:$0xff]  }
 0x185   : > { %7026 = vmatmul.mubr.bf16.gmra.mrb[8].mxu0 %v536_v38  ;;  %8162 = vmatmul.mubr.bf16.gmra.mrb[8].mxu1 %v536_v38  ;;  %v11288_v38 = vld [vmem:[%s12719_s21 + $0xa20] ss:$16 sps:$4 sm:$0xff]  }
 0x186   : > { %7053 = vmatpush1.bf16.msra.mxu0 %v11210_v37  ;;  %8189 = vmatpush1.bf16.msra.mxu1 %v11213_v40  ;;  %v11293_v37 = vld [vmem:[%s12719_s21 + $0xa2c] ss:$16 sps:$4 sm:$0xff]   ;;  %v11291_v40 = vld [vmem:[%s12719_s21 + $0xa28] ss:$16 sps:$4 sm:$0xff]  }
 0x187   : > { %7054 = vmatprep.subr.bf16.mxu0 %v11218_v41  ;;  %8190 = vmatprep.subr.bf16.mxu1 %v11221_v42  ;;  %v11296_v41 = vld [vmem:[%s12719_s21 + $0xa44] ss:$16 sps:$4 sm:$0xff]  }
 0x188   : > { %7035 = vmatprep.mubr.bf16.mxu0 %v569_v43  ;;  %8171 = vmatprep.mubr.bf16.mxu1 %v569_v43  ;;  %v314_v42 = vld [vmem:[#allocation2 + $0x240] sm:$0xff] }
 0x189   : > { %v346_v43 = vld [vmem:[#allocation2 + $0x340] sm:$0xff] }
 0x18a   : > { %7055 = vmatpush1.bf16.msra.mxu0 %v11216_v44  ;;  %8191 = vmatpush1.bf16.msra.mxu1 %v11219_v45  ;;  %v11299_v44 = vld [vmem:[%s12719_s21 + $0xa4c] ss:$16 sps:$4 sm:$0xff]   ;;  %v506_v46 = vpack.c.bf16 %v346_v43, %v314_v42  ;;  %v11366_v43 = vld [vmem:[%s12719_s21 + $0xbc0] ss:$16 sps:$4 sm:$0xff]  }
 0x18b   : > { %7056 = vmatprep.subr.bf16.mxu0 %v11224_v47  ;;  %8192 = vmatprep.subr.bf16.mxu1 %v11227_v48  ;;  %v379_v45 = vld [vmem:[#allocation2 + $0x448] sm:$0xff]  ;;  %v11294_v48 = vld [vmem:[%s12719_s21 + $0xa40] ss:$16 sps:$4 sm:$0xff]  }
 0x18c   : > { %v411_v47 = vld [vmem:[#allocation2 + $0x548] sm:$0xff] }
 0x18d   : > { %7036 = vmatmul.mubr.bf16.gmra.mrb[12].mxu0 %v568_v51  ;;  %8172 = vmatmul.mubr.bf16.gmra.mrb[12].mxu1 %v568_v51  ;;  %v11305_v51 = vld [vmem:[%s12719_s21 + $0xa6c] ss:$16 sps:$4 sm:$0xff]  }
 0x18e   : > { %7057 = vmatpush1.bf16.msra.mxu0 %v11222_v49  ;;  %8193 = vmatpush1.bf16.msra.mxu1 %v11225_v50  ;;  %v11297_v49 = vld [vmem:[%s12719_s21 + $0xa48] ss:$16 sps:$4 sm:$0xff]   ;;  %v11302_v50 = vld [vmem:[%s12719_s21 + $0xa64] ss:$16 sps:$4 sm:$0xff]   ;;  %v11371_v42 = vld [vmem:[%s12719_s21 + $0xbcc] ss:$16 sps:$4 sm:$0xff]  }
 0x18f   : > { %7058 = vmatprep.subr.bf16.mxu0 %v11230_v54  ;;  %8194 = vmatprep.subr.bf16.mxu1 %v11233_v55  ;;  %v539_v54 = vpack.c.bf16 %v411_v47, %v379_v45  ;;  %v11308_v55 = vld [vmem:[%s12719_s21 + $0xa84] ss:$16 sps:$4 sm:$0xff]   ;;  %v11372_v47 = vld [vmem:[%s12719_s21 + $0xbe0] ss:$16 sps:$4 sm:$0xff]  }
 0x190   : > { %7076 = vmatprep.mubr.bf16.mxu0 %v475_v56  ;;  %8212 = vmatprep.mubr.bf16.mxu1 %v475_v56  ;;  %v378_v56 = vld [vmem:[#allocation2 + $0x440] sm:$0xff] }
 0x191   : > { %v11374_v45 = vld [vmem:[%s12719_s21 + $0xbe4] ss:$16 sps:$4 sm:$0xff]  }
 0x192   : > { %7059 = vmatpush1.bf16.msra.mxu0 %v11228_v57  ;;  %8195 = vmatpush1.bf16.msra.mxu1 %v11231_v58  ;;  %v410_v57 = vld [vmem:[#allocation2 + $0x540] sm:$0xff]  ;;  %v11311_v58 = vld [vmem:[%s12719_s21 + $0xa8c] ss:$16 sps:$4 sm:$0xff]  }
 0x193   : > { %7060 = vmatprep.subr.bf16.mxu0 %v11236_v59  ;;  %8196 = vmatprep.subr.bf16.mxu1 %v11239_v60  ;;  %v11306_v59 = vld [vmem:[%s12719_s21 + $0xa80] ss:$16 sps:$4 sm:$0xff]   ;;  %v11309_v60 = vld [vmem:[%s12719_s21 + $0xa88] ss:$16 sps:$4 sm:$0xff]  }
 0x196   : > { %7061 = vmatpush1.bf16.msra.mxu0 %v11234_v61  ;;  %8197 = vmatpush1.bf16.msra.mxu1 %v11237_v62  ;;  %v538_v61 = vpack.c.bf16 %v410_v57, %v378_v56  ;;  %v443_v62 = vld [vmem:[#allocation2 + $0x648] sm:$0x1]  ;;  %v11378_v56 = vld [vmem:[%s12719_s21 + $0xc00] ss:$16 sps:$4 sm:$0xff]  }
 0x197   : > { %7062 = vmatprep.subr.bf16.mxu0 %v11242_v63  ;;  %8198 = vmatprep.subr.bf16.mxu1 %v11245_v0  ;;  %v11314_v63 = vld [vmem:[%s12719_s21 + $0xaa4] ss:$16 sps:$4 sm:$0xff]   ;;  %v11317_v0 = vld [vmem:[%s12719_s21 + $0xaac] ss:$16 sps:$4 sm:$0xff]   ;;  %v11381_v57 = vld [vmem:[%s12719_s21 + $0xc08] ss:$16 sps:$4 sm:$0xff]  }
 0x19a   : > { %7063 = vmatpush1.bf16.msra.mxu0 %v11240_v1  ;;  %8199 = vmatpush1.bf16.msra.mxu1 %v11243_v2  ;;  %v11312_v1 = vld [vmem:[%s12719_s21 + $0xaa0] ss:$16 sps:$4 sm:$0xff]   ;;  %v571_v2 = vpack.c.bf16 %v443_v62, %v443_v62 }
 0x19b   : > { %7064 = vmatprep.subr.bf16.mxu0 %v11248_v3  ;;  %8200 = vmatprep.subr.bf16.mxu1 %v11251_v4  ;;  %v11315_v3 = vld [vmem:[%s12719_s21 + $0xaa8] ss:$16 sps:$4 sm:$0xff]   ;;  %v11320_v4 = vld [vmem:[%s12719_s21 + $0xac4] ss:$16 sps:$4 sm:$0xff]  }
 0x19e   : > { %7065 = vmatpush1.bf16.msra.mxu0 %v11246_v5  ;;  %8201 = vmatpush1.bf16.msra.mxu1 %v11249_v6  ;;  %v442_v5 = vld [vmem:[#allocation2 + $0x640] sm:$0x1]  ;;  %v11323_v6 = vld [vmem:[%s12719_s21 + $0xacc] ss:$16 sps:$4 sm:$0xff]  }
 0x19f   : > { %7066 = vmatprep.subr.bf16.mxu0 %v11254_v7  ;;  %8202 = vmatprep.subr.bf16.mxu1 %v11257_v8  ;;  %v11318_v7 = vld [vmem:[%s12719_s21 + $0xac0] ss:$16 sps:$4 sm:$0xff]   ;;  %v11321_v8 = vld [vmem:[%s12719_s21 + $0xac8] ss:$16 sps:$4 sm:$0xff]  }
 0x1a2   : > { %7067 = vmatpush1.bf16.msra.mxu0 %v11252_v9  ;;  %8203 = vmatpush1.bf16.msra.mxu1 %v11255_v10  ;;  %v570_v9 = vpack.c.bf16 %v442_v5, %v442_v5  ;;  %v253_v10 = vld [vmem:[#allocation2 + $0x58] sm:$0xff] }
 0x1a3   : > { %7068 = vmatprep.subr.bf16.mxu0 %v11260_v11  ;;  %8204 = vmatprep.subr.bf16.mxu1 %v11263_v12  ;;  %v285_v11 = vld [vmem:[#allocation2 + $0x158] sm:$0xff]  ;;  %v11326_v12 = vld [vmem:[%s12719_s21 + $0xae4] ss:$16 sps:$4 sm:$0xff]  }
 0x1a6   : > { %7069 = vmatpush1.bf16.msra.mxu0 %v11258_v13  ;;  %8205 = vmatpush1.bf16.msra.mxu1 %v11261_v14  ;;  %v11329_v13 = vld [vmem:[%s12719_s21 + $0xaec] ss:$16 sps:$4 sm:$0xff]   ;;  %v477_v14 = vpack.c.bf16 %v285_v11, %v253_v10  ;;  %v11396_v10 = vld [vmem:[%s12719_s21 + $0xc60] ss:$16 sps:$4 sm:$0xff]   ;;  %v11399_v11 = vld [vmem:[%s12719_s21 + $0xc68] ss:$16 sps:$4 sm:$0xff]  }
 0x1a7   : > { %7070 = vmatprep.subr.bf16.mxu0 %v11266_v15  ;;  %8206 = vmatprep.subr.bf16.mxu1 %v11269_v16  ;;  %v11324_v15 = vld [vmem:[%s12719_s21 + $0xae0] ss:$16 sps:$4 sm:$0xff]   ;;  %v11327_v16 = vld [vmem:[%s12719_s21 + $0xae8] ss:$16 sps:$4 sm:$0xff]  }
 0x1aa   : > { %7071 = vmatpush1.bf16.msra.mxu0 %v11264_v17  ;;  %8207 = vmatpush1.bf16.msra.mxu1 %v11267_v18  ;;  %v11332_v17 = vld [vmem:[%s12719_s21 + $0xb04] ss:$16 sps:$4 sm:$0xff]   ;;  %v11335_v18 = vld [vmem:[%s12719_s21 + $0xb0c] ss:$16 sps:$4 sm:$0xff]  }
 0x1ab   : > { %7072 = vmatprep.subr.bf16.mxu0 %v11272_v19  ;;  %8208 = vmatprep.subr.bf16.mxu1 %v11275_v20  ;;  %v11330_v19 = vld [vmem:[%s12719_s21 + $0xb00] ss:$16 sps:$4 sm:$0xff]   ;;  %v11333_v20 = vld [vmem:[%s12719_s21 + $0xb08] ss:$16 sps:$4 sm:$0xff]  }
 0x1ae   : > { %7073 = vmatpush1.bf16.msra.mxu0 %v11270_v21  ;;  %8209 = vmatpush1.bf16.msra.mxu1 %v11273_v22  ;;  %v11338_v21 = vld [vmem:[%s12719_s21 + $0xb24] ss:$16 sps:$4 sm:$0xff]   ;;  %v11341_v22 = vld [vmem:[%s12719_s21 + $0xb2c] ss:$16 sps:$4 sm:$0xff]  }
 0x1af   : > { %7074 = vmatprep.subr.bf16.mxu0 %v11278_v23  ;;  %8210 = vmatprep.subr.bf16.mxu1 %v11281_v24  ;;  %v11336_v23 = vld [vmem:[%s12719_s21 + $0xb20] ss:$16 sps:$4 sm:$0xff]   ;;  %v11339_v24 = vld [vmem:[%s12719_s21 + $0xb28] ss:$16 sps:$4 sm:$0xff]  }
 0x1b2   : > { %7075 = vmatpush1.bf16.msra.mxu0 %v11276_v25  ;;  %8211 = vmatpush1.bf16.msra.mxu1 %v11279_v26  ;;  %v11344_v25 = vld [vmem:[%s12719_s21 + $0xb44] ss:$16 sps:$4 sm:$0xff]   ;;  %v11347_v26 = vld [vmem:[%s12719_s21 + $0xb4c] ss:$16 sps:$4 sm:$0xff]  }
 0x1b3   : > { %7115 = vmatprep.subr.bf16.mxu0 %v11284_v29  ;;  %8251 = vmatprep.subr.bf16.mxu1 %v11287_v30  ;;  %v11350_v29 = vld [vmem:[%s12719_s21 + $0xb64] ss:$16 sps:$4 sm:$0xff]   ;;  %v11353_v30 = vld [vmem:[%s12719_s21 + $0xb6c] ss:$16 sps:$4 sm:$0xff]  }
 0x1b5   : > { %7077 = vmatmul.mubr.bf16.vlgmr.msra.gmra.mrb[0].mxu0 %v474_v32  ;;  %8213 = vmatmul.mubr.bf16.vlgmr.msra.gmra.mrb[0].mxu1 %v474_v32  ;;  %v11351_v32 = vld [vmem:[%s12719_s21 + $0xb68] ss:$16 sps:$4 sm:$0xff]  }
 0x1b6   : > { %7116 = vmatpush1.bf16.msra.mxu0 %v11282_v34  ;;  %8252 = vmatpush1.bf16.msra.mxu1 %v11285_v35  ;;  %v11359_v34 = vld [vmem:[%s12719_s21 + $0xb8c] ss:$16 sps:$4 sm:$0xff]   ;;  %v11354_v35 = vld [vmem:[%s12719_s21 + $0xb80] ss:$16 sps:$4 sm:$0xff]  }
 0x1b7   : > { %7117 = vmatprep.subr.bf16.mxu0 %v11290_v36  ;;  %8253 = vmatprep.subr.bf16.mxu1 %v11293_v37  ;;  %v11357_v36 = vld [vmem:[%s12719_s21 + $0xb88] ss:$16 sps:$4 sm:$0xff]   ;;  %v11362_v37 = vld [vmem:[%s12719_s21 + $0xba4] ss:$16 sps:$4 sm:$0xff]  }
 0x1b8   : > { %7086 = vmatprep.mubr.bf16.mxu0 %v507_v39  ;;  %8222 = vmatprep.mubr.bf16.mxu1 %v507_v39  ;;  %v11360_v39 = vld [vmem:[%s12719_s21 + $0xba0] ss:$16 sps:$4 sm:$0xff]  }
 0x1ba   : > { %7118 = vmatpush1.bf16.msra.mxu0 %v11288_v38  ;;  %8254 = vmatpush1.bf16.msra.mxu1 %v11291_v40  ;;  %v11365_v38 = vld [vmem:[%s12719_s21 + $0xbac] ss:$16 sps:$4 sm:$0xff]   ;;  %v11363_v40 = vld [vmem:[%s12719_s21 + $0xba8] ss:$16 sps:$4 sm:$0xff]  }
 0x1bb   : > { %7119 = vmatprep.subr.bf16.mxu0 %v11296_v41  ;;  %8255 = vmatprep.subr.bf16.mxu1 %v11299_v44  ;;  %v11368_v41 = vld [vmem:[%s12719_s21 + $0xbc4] ss:$16 sps:$4 sm:$0xff]   ;;  %v11369_v44 = vld [vmem:[%s12719_s21 + $0xbc8] ss:$16 sps:$4 sm:$0xff]  }
 0x1bd   : > { %7087 = vmatmul.mubr.bf16.gmra.mrb[4].mxu0 %v506_v46  ;;  %8223 = vmatmul.mubr.bf16.gmra.mrb[4].mxu1 %v506_v46  ;;  %v11377_v46 = vld [vmem:[%s12719_s21 + $0xbec] ss:$16 sps:$4 sm:$0xff]  }
 0x1be   : > { %7120 = vmatpush1.bf16.msra.mxu0 %v11294_v48  ;;  %8256 = vmatpush1.bf16.msra.mxu1 %v11297_v49  ;;  %v11375_v48 = vld [vmem:[%s12719_s21 + $0xbe8] ss:$16 sps:$4 sm:$0xff]   ;;  %v11380_v49 = vld [vmem:[%s12719_s21 + $0xc04] ss:$16 sps:$4 sm:$0xff]  }
 0x1bf   : > { %7121 = vmatprep.subr.bf16.mxu0 %v11302_v50  ;;  %8257 = vmatprep.subr.bf16.mxu1 %v11305_v51  ;;  %v11383_v50 = vld [vmem:[%s12719_s21 + $0xc0c] ss:$16 sps:$4 sm:$0xff]   ;;  %v252_v51 = vld [vmem:[#allocation2 + $0x50] sm:$0xff] }
 0x1c0   : > { %7096 = vmatprep.mubr.bf16.mxu0 %v539_v54  ;;  %8232 = vmatprep.mubr.bf16.mxu1 %v539_v54  ;;  %v349_v54 = vld [vmem:[#allocation2 + $0x358] sm:$0xff] }
 0x1c2   : > { %7122 = vmatpush1.bf16.msra.mxu0 %v11300_v52  ;;  %8258 = vmatpush1.bf16.msra.mxu1 %v11303_v53  ;;  %v284_v52 = vld [vmem:[#allocation2 + $0x150] sm:$0xff]  ;;  %v317_v53 = vld [vmem:[#allocation2 + $0x258] sm:$0xff] }
 0x1c3   : > { %7123 = vmatprep.subr.bf16.mxu0 %v11308_v55  ;;  %8259 = vmatprep.subr.bf16.mxu1 %v11311_v58  ;;  %v476_v55 = vpack.c.bf16 %v284_v52, %v252_v51  ;;  %v11386_v58 = vld [vmem:[%s12719_s21 + $0xc24] ss:$16 sps:$4 sm:$0xff]   ;;  %v509_v62 = vpack.c.bf16 %v349_v54, %v317_v53  ;;  %v11449_v52 = vld [vmem:[%s12719_s21 + $0xd6c] ss:$16 sps:$4 sm:$0xff]   ;;  %v11444_v53 = vld [vmem:[%s12719_s21 + $0xd60] ss:$16 sps:$4 sm:$0xff]  }
 0x1c4   : > { %v11446_v51 = vld [vmem:[%s12719_s21 + $0xd64] ss:$16 sps:$4 sm:$0xff]   ;;  %v11447_v54 = vld [vmem:[%s12719_s21 + $0xd68] ss:$16 sps:$4 sm:$0xff]  }
 0x1c5   : > { %7097 = vmatmul.mubr.bf16.gmra.mrb[8].mxu0 %v538_v61  ;;  %8233 = vmatmul.mubr.bf16.gmra.mrb[8].mxu1 %v538_v61  ;;  %v11387_v61 = vld [vmem:[%s12719_s21 + $0xc28] ss:$16 sps:$4 sm:$0xff]  }
 0x1c6   : > { %7124 = vmatpush1.bf16.msra.mxu0 %v11306_v59  ;;  %8260 = vmatpush1.bf16.msra.mxu1 %v11309_v60  ;;  %v11389_v59 = vld [vmem:[%s12719_s21 + $0xc2c] ss:$16 sps:$4 sm:$0xff]   ;;  %v11384_v60 = vld [vmem:[%s12719_s21 + $0xc20] ss:$16 sps:$4 sm:$0xff]  }
 0x1c7   : > { %7125 = vmatprep.subr.bf16.mxu0 %v11314_v63  ;;  %8261 = vmatprep.subr.bf16.mxu1 %v11317_v0  ;;  %v11392_v63 = vld [vmem:[%s12719_s21 + $0xc44] ss:$16 sps:$4 sm:$0xff]   ;;  %v11395_v0 = vld [vmem:[%s12719_s21 + $0xc4c] ss:$16 sps:$4 sm:$0xff]  }
 0x1c8   : > { %7106 = vmatprep.mubr.bf16.mxu0 %v571_v2  ;;  %8242 = vmatprep.mubr.bf16.mxu1 %v571_v2  ;;  %v348_v2 = vld [vmem:[#allocation2 + $0x350] sm:$0xff] }
 0x1ca   : > { %7126 = vmatpush1.bf16.msra.mxu0 %v11312_v1  ;;  %8262 = vmatpush1.bf16.msra.mxu1 %v11315_v3  ;;  %v316_v1 = vld [vmem:[#allocation2 + $0x250] sm:$0xff]  ;;  %v381_v3 = vld [vmem:[#allocation2 + $0x458] sm:$0xff] }
 0x1cb   : > { %7127 = vmatprep.subr.bf16.mxu0 %v11320_v4  ;;  %8263 = vmatprep.subr.bf16.mxu1 %v11323_v6  ;;  %v413_v4 = vld [vmem:[#allocation2 + $0x558] sm:$0xff]  ;;  %v508_v5 = vpack.c.bf16 %v348_v2, %v316_v1  ;;  %v11390_v6 = vld [vmem:[%s12719_s21 + $0xc40] ss:$16 sps:$4 sm:$0xff]  }
 0x1cc   : > { %v11462_v1 = vld [vmem:[%s12719_s21 + $0xdc0] ss:$16 sps:$4 sm:$0xff]   ;;  %v11465_v2 = vld [vmem:[%s12719_s21 + $0xdc8] ss:$16 sps:$4 sm:$0xff]  }
 0x1cd   : > { %7107 = vmatmul.mubr.bf16.gmra.mrb[12].mxu0 %v570_v9  ;;  %8243 = vmatmul.mubr.bf16.gmra.mrb[12].mxu1 %v570_v9  ;;  %v11401_v9 = vld [vmem:[%s12719_s21 + $0xc6c] ss:$16 sps:$4 sm:$0xff]  }
 0x1ce   : > { %7128 = vmatpush1.bf16.msra.mxu0 %v11318_v7  ;;  %8264 = vmatpush1.bf16.msra.mxu1 %v11321_v8  ;;  %v11393_v7 = vld [vmem:[%s12719_s21 + $0xc48] ss:$16 sps:$4 sm:$0xff]   ;;  %v11398_v8 = vld [vmem:[%s12719_s21 + $0xc64] ss:$16 sps:$4 sm:$0xff]  }
 0x1cf   : > { %7129 = vmatprep.subr.bf16.mxu0 %v11326_v12  ;;  %8265 = vmatprep.subr.bf16.mxu1 %v11329_v13  ;;  %v541_v12 = vpack.c.bf16 %v413_v4, %v381_v3  ;;  %v11404_v13 = vld [vmem:[%s12719_s21 + $0xc84] ss:$16 sps:$4 sm:$0xff]   ;;  %v11473_v4 = vld [vmem:[%s12719_s21 + $0xdec] ss:$16 sps:$4 sm:$0xff]  }
 0x1d0   : > { %7147 = vmatprep.mubr.bf16.mxu0 %v477_v14  ;;  %8283 = vmatprep.mubr.bf16.mxu1 %v477_v14  ;;  %v380_v14 = vld [vmem:[#allocation2 + $0x450] sm:$0xff] }
 0x1d1   : > { %v11470_v3 = vld [vmem:[%s12719_s21 + $0xde4] ss:$16 sps:$4 sm:$0xff]  }
 0x1d2   : > { %7130 = vmatpush1.bf16.msra.mxu0 %v11324_v15  ;;  %8266 = vmatpush1.bf16.msra.mxu1 %v11327_v16  ;;  %v412_v15 = vld [vmem:[#allocation2 + $0x550] sm:$0xff]  ;;  %v11407_v16 = vld [vmem:[%s12719_s21 + $0xc8c] ss:$16 sps:$4 sm:$0xff]  }
 0x1d3   : > { %7131 = vmatprep.subr.bf16.mxu0 %v11332_v17  ;;  %8267 = vmatprep.subr.bf16.mxu1 %v11335_v18  ;;  %v445_v17 = vld [vmem:[#allocation2 + $0x658] sm:$0x1]  ;;  %v540_v18 = vpack.c.bf16 %v412_v15, %v380_v14  ;;  %v11474_v14 = vld [vmem:[%s12719_s21 + $0xe00] ss:$16 sps:$4 sm:$0xff]  }
 0x1d4   : > { %v11477_v15 = vld [vmem:[%s12719_s21 + $0xe08] ss:$16 sps:$4 sm:$0xff]  }
 0x1d6   : > { %7132 = vmatpush1.bf16.msra.mxu0 %v11330_v19  ;;  %8268 = vmatpush1.bf16.msra.mxu1 %v11333_v20  ;;  %v11402_v19 = vld [vmem:[%s12719_s21 + $0xc80] ss:$16 sps:$4 sm:$0xff]   ;;  %v11405_v20 = vld [vmem:[%s12719_s21 + $0xc88] ss:$16 sps:$4 sm:$0xff]  }
 0x1d7   : > { %7133 = vmatprep.subr.bf16.mxu0 %v11338_v21  ;;  %8269 = vmatprep.subr.bf16.mxu1 %v11341_v22  ;;  %v11410_v21 = vld [vmem:[%s12719_s21 + $0xca4] ss:$16 sps:$4 sm:$0xff]   ;;  %v11413_v22 = vld [vmem:[%s12719_s21 + $0xcac] ss:$16 sps:$4 sm:$0xff]  }
 0x1da   : > { %7134 = vmatpush1.bf16.msra.mxu0 %v11336_v23  ;;  %8270 = vmatpush1.bf16.msra.mxu1 %v11339_v24  ;;  %v11408_v23 = vld [vmem:[%s12719_s21 + $0xca0] ss:$16 sps:$4 sm:$0xff]   ;;  %v11411_v24 = vld [vmem:[%s12719_s21 + $0xca8] ss:$16 sps:$4 sm:$0xff]  }
 0x1db   : > { %7135 = vmatprep.subr.bf16.mxu0 %v11344_v25  ;;  %8271 = vmatprep.subr.bf16.mxu1 %v11347_v26  ;;  %v573_v25 = vpack.c.bf16 %v445_v17, %v445_v17  ;;  %v11416_v26 = vld [vmem:[%s12719_s21 + $0xcc4] ss:$16 sps:$4 sm:$0xff]   ;;  %v11485_v17 = vld [vmem:[%s12719_s21 + $0xe2c] ss:$16 sps:$4 sm:$0xff]  }
 0x1de   : > { %7136 = vmatpush1.bf16.msra.mxu0 %v11342_v27  ;;  %8272 = vmatpush1.bf16.msra.mxu1 %v11345_v28  ;;  %v11419_v27 = vld [vmem:[%s12719_s21 + $0xccc] ss:$16 sps:$4 sm:$0xff]   ;;  %v444_v28 = vld [vmem:[#allocation2 + $0x650] sm:$0x1] }
 0x1df   : > { %7137 = vmatprep.subr.bf16.mxu0 %v11350_v29  ;;  %8273 = vmatprep.subr.bf16.mxu1 %v11353_v30  ;;  %v255_v29 = vld [vmem:[#allocation2 + $0x68] sm:$0xff] }
 0x1e0   : > { %v287_v30 = vld [vmem:[#allocation2 + $0x168] sm:$0xff] }
 0x1e2   : > { %7138 = vmatpush1.bf16.msra.mxu0 %v11348_v31  ;;  %8274 = vmatpush1.bf16.msra.mxu1 %v11351_v32  ;;  %v572_v31 = vpack.c.bf16 %v444_v28, %v444_v28  ;;  %v11414_v32 = vld [vmem:[%s12719_s21 + $0xcc0] ss:$16 sps:$4 sm:$0xff]  }
 0x1e3   : > { %7139 = vmatprep.subr.bf16.mxu0 %v11356_v33  ;;  %8275 = vmatprep.subr.bf16.mxu1 %v11359_v34  ;;  %v11417_v33 = vld [vmem:[%s12719_s21 + $0xcc8] ss:$16 sps:$4 sm:$0xff]   ;;  %v11422_v34 = vld [vmem:[%s12719_s21 + $0xce4] ss:$16 sps:$4 sm:$0xff]   ;;  %v11486_v28 = vld [vmem:[%s12719_s21 + $0xe40] ss:$16 sps:$4 sm:$0xff]  }
 0x1e6   : > { %7140 = vmatpush1.bf16.msra.mxu0 %v11354_v35  ;;  %8276 = vmatpush1.bf16.msra.mxu1 %v11357_v36  ;;  %v11425_v35 = vld [vmem:[%s12719_s21 + $0xcec] ss:$16 sps:$4 sm:$0xff]   ;;  %v479_v36 = vpack.c.bf16 %v287_v30, %v255_v29  ;;  %v11489_v29 = vld [vmem:[%s12719_s21 + $0xe48] ss:$16 sps:$4 sm:$0xff]   ;;  %v11494_v30 = vld [vmem:[%s12719_s21 + $0xe64] ss:$16 sps:$4 sm:$0xff]  }
 0x1e7   : > { %7141 = vmatprep.subr.bf16.mxu0 %v11362_v37  ;;  %8277 = vmatprep.subr.bf16.mxu1 %v11365_v38  ;;  %v11420_v37 = vld [vmem:[%s12719_s21 + $0xce0] ss:$16 sps:$4 sm:$0xff]   ;;  %v11423_v38 = vld [vmem:[%s12719_s21 + $0xce8] ss:$16 sps:$4 sm:$0xff]  }
 0x1ea   : > { %7142 = vmatpush1.bf16.msra.mxu0 %v11360_v39  ;;  %8278 = vmatpush1.bf16.msra.mxu1 %v11363_v40  ;;  %v11428_v39 = vld [vmem:[%s12719_s21 + $0xd04] ss:$16 sps:$4 sm:$0xff]   ;;  %v11431_v40 = vld [vmem:[%s12719_s21 + $0xd0c] ss:$16 sps:$4 sm:$0xff]  }
 0x1eb   : > { %7143 = vmatprep.subr.bf16.mxu0 %v11368_v41  ;;  %8279 = vmatprep.subr.bf16.mxu1 %v11371_v42  ;;  %v11426_v41 = vld [vmem:[%s12719_s21 + $0xd00] ss:$16 sps:$4 sm:$0xff]   ;;  %v11429_v42 = vld [vmem:[%s12719_s21 + $0xd08] ss:$16 sps:$4 sm:$0xff]  }
 0x1ee   : > { %7144 = vmatpush1.bf16.msra.mxu0 %v11366_v43  ;;  %8280 = vmatpush1.bf16.msra.mxu1 %v11369_v44  ;;  %v11434_v43 = vld [vmem:[%s12719_s21 + $0xd24] ss:$16 sps:$4 sm:$0xff]   ;;  %v11437_v44 = vld [vmem:[%s12719_s21 + $0xd2c] ss:$16 sps:$4 sm:$0xff]  }
 0x1ef   : > { %7145 = vmatprep.subr.bf16.mxu0 %v11374_v45  ;;  %8281 = vmatprep.subr.bf16.mxu1 %v11377_v46  ;;  %v11432_v45 = vld [vmem:[%s12719_s21 + $0xd20] ss:$16 sps:$4 sm:$0xff]   ;;  %v11435_v46 = vld [vmem:[%s12719_s21 + $0xd28] ss:$16 sps:$4 sm:$0xff]  }
 0x1f2   : > { %7146 = vmatpush1.bf16.msra.mxu0 %v11372_v47  ;;  %8282 = vmatpush1.bf16.msra.mxu1 %v11375_v48  ;;  %v11440_v47 = vld [vmem:[%s12719_s21 + $0xd44] ss:$16 sps:$4 sm:$0xff]   ;;  %v11443_v48 = vld [vmem:[%s12719_s21 + $0xd4c] ss:$16 sps:$4 sm:$0xff]  }
 0x1f3   : > { %7186 = vmatprep.subr.bf16.mxu0 %v11380_v49  ;;  %8322 = vmatprep.subr.bf16.mxu1 %v11383_v50  ;;  %v11438_v49 = vld [vmem:[%s12719_s21 + $0xd40] ss:$16 sps:$4 sm:$0xff]   ;;  %v11441_v50 = vld [vmem:[%s12719_s21 + $0xd48] ss:$16 sps:$4 sm:$0xff]  }
 0x1f5   : > { %7148 = vmatmul.mubr.bf16.vlgmr.msra.gmra.mrb[0].mxu0 %v476_v55  ;;  %8284 = vmatmul.mubr.bf16.vlgmr.msra.gmra.mrb[0].mxu1 %v476_v55  ;;  %v11452_v55 = vld [vmem:[%s12719_s21 + $0xd84] ss:$16 sps:$4 sm:$0xff]  }
 0x1f6   : > { %7187 = vmatpush1.bf16.msra.mxu0 %v11378_v56  ;;  %8323 = vmatpush1.bf16.msra.mxu1 %v11381_v57  ;;  %v11455_v56 = vld [vmem:[%s12719_s21 + $0xd8c] ss:$16 sps:$4 sm:$0xff]   ;;  %v11450_v57 = vld [vmem:[%s12719_s21 + $0xd80] ss:$16 sps:$4 sm:$0xff]  }
 0x1f7   : > { %7188 = vmatprep.subr.bf16.mxu0 %v11386_v58  ;;  %8324 = vmatprep.subr.bf16.mxu1 %v11389_v59  ;;  %v11453_v58 = vld [vmem:[%s12719_s21 + $0xd88] ss:$16 sps:$4 sm:$0xff]   ;;  %v11458_v59 = vld [vmem:[%s12719_s21 + $0xda4] ss:$16 sps:$4 sm:$0xff]  }
 0x1f8   : > { %7157 = vmatprep.mubr.bf16.mxu0 %v509_v62  ;;  %8293 = vmatprep.mubr.bf16.mxu1 %v509_v62  ;;  %v11459_v62 = vld [vmem:[%s12719_s21 + $0xda8] ss:$16 sps:$4 sm:$0xff]  }
 0x1fa   : > { %7189 = vmatpush1.bf16.msra.mxu0 %v11384_v60  ;;  %8325 = vmatpush1.bf16.msra.mxu1 %v11387_v61  ;;  %v11461_v60 = vld [vmem:[%s12719_s21 + $0xdac] ss:$16 sps:$4 sm:$0xff]   ;;  %v11456_v61 = vld [vmem:[%s12719_s21 + $0xda0] ss:$16 sps:$4 sm:$0xff]  }
 0x1fb   : > { %7190 = vmatprep.subr.bf16.mxu0 %v11392_v63  ;;  %8326 = vmatprep.subr.bf16.mxu1 %v11395_v0  ;;  %v11464_v63 = vld [vmem:[%s12719_s21 + $0xdc4] ss:$16 sps:$4 sm:$0xff]   ;;  %v11467_v0 = vld [vmem:[%s12719_s21 + $0xdcc] ss:$16 sps:$4 sm:$0xff]  }
 0x1fd   : > { %7158 = vmatmul.mubr.bf16.gmra.mrb[4].mxu0 %v508_v5  ;;  %8294 = vmatmul.mubr.bf16.gmra.mrb[4].mxu1 %v508_v5  ;;  %v11468_v5 = vld [vmem:[%s12719_s21 + $0xde0] ss:$16 sps:$4 sm:$0xff]  }
 0x1fe   : > { %7191 = vmatpush1.bf16.msra.mxu0 %v11390_v6  ;;  %8327 = vmatpush1.bf16.msra.mxu1 %v11393_v7  ;;  %v11471_v6 = vld [vmem:[%s12719_s21 + $0xde8] ss:$16 sps:$4 sm:$0xff]   ;;  %v11476_v7 = vld [vmem:[%s12719_s21 + $0xe04] ss:$16 sps:$4 sm:$0xff]  }
 0x1ff   : > { %7192 = vmatprep.subr.bf16.mxu0 %v11398_v8  ;;  %8328 = vmatprep.subr.bf16.mxu1 %v11401_v9  ;;  %v11479_v8 = vld [vmem:[%s12719_s21 + $0xe0c] ss:$16 sps:$4 sm:$0xff]   ;;  %v254_v9 = vld [vmem:[#allocation2 + $0x60] sm:$0xff] }
 0x200   : > { %7167 = vmatprep.mubr.bf16.mxu0 %v541_v12  ;;  %8303 = vmatprep.mubr.bf16.mxu1 %v541_v12  ;;  %v351_v12 = vld [vmem:[#allocation2 + $0x368] sm:$0xff] }
 0x202   : > { %7193 = vmatpush1.bf16.msra.mxu0 %v11396_v10  ;;  %8329 = vmatpush1.bf16.msra.mxu1 %v11399_v11  ;;  %v286_v10 = vld [vmem:[#allocation2 + $0x160] sm:$0xff]  ;;  %v319_v11 = vld [vmem:[#allocation2 + $0x268] sm:$0xff] }
 0x203   : > { %7194 = vmatprep.subr.bf16.mxu0 %v11404_v13  ;;  %8330 = vmatprep.subr.bf16.mxu1 %v11407_v16  ;;  %v478_v13 = vpack.c.bf16 %v286_v10, %v254_v9  ;;  %v11482_v16 = vld [vmem:[%s12719_s21 + $0xe24] ss:$16 sps:$4 sm:$0xff]   ;;  %v11545_v10 = vld [vmem:[%s12719_s21 + $0xf6c] ss:$16 sps:$4 sm:$0xff]  }
 0x204   : > { %v11542_v9 = vld [vmem:[%s12719_s21 + $0xf64] ss:$16 sps:$4 sm:$0xff]  }
 0x205   : > { %7168 = vmatmul.mubr.bf16.gmra.mrb[8].mxu0 %v540_v18  ;;  %8304 = vmatmul.mubr.bf16.gmra.mrb[8].mxu1 %v540_v18  ;;  %v11480_v18 = vld [vmem:[%s12719_s21 + $0xe20] ss:$16 sps:$4 sm:$0xff]  }
 0x206   : > { %7195 = vmatpush1.bf16.msra.mxu0 %v11402_v19  ;;  %8331 = vmatpush1.bf16.msra.mxu1 %v11405_v20  ;;  %v11483_v19 = vld [vmem:[%s12719_s21 + $0xe28] ss:$16 sps:$4 sm:$0xff]   ;;  %v511_v20 = vpack.c.bf16 %v351_v12, %v319_v11  ;;  %v11540_v11 = vld [vmem:[%s12719_s21 + $0xf60] ss:$16 sps:$4 sm:$0xff]  }
 0x207   : > { %7196 = vmatprep.subr.bf16.mxu0 %v11410_v21  ;;  %8332 = vmatprep.subr.bf16.mxu1 %v11413_v22  ;;  %v11488_v21 = vld [vmem:[%s12719_s21 + $0xe44] ss:$16 sps:$4 sm:$0xff]   ;;  %v11491_v22 = vld [vmem:[%s12719_s21 + $0xe4c] ss:$16 sps:$4 sm:$0xff]   ;;  %v11543_v12 = vld [vmem:[%s12719_s21 + $0xf68] ss:$16 sps:$4 sm:$0xff]  }
 0x208   : > { %7177 = vmatprep.mubr.bf16.mxu0 %v573_v25  ;;  %8313 = vmatprep.mubr.bf16.mxu1 %v573_v25  ;;  %v383_v25 = vld [vmem:[#allocation2 + $0x468] sm:$0xff] }
 0x20a   : > { %7197 = vmatpush1.bf16.msra.mxu0 %v11408_v23  ;;  %8333 = vmatpush1.bf16.msra.mxu1 %v11411_v24  ;;  %v318_v23 = vld [vmem:[#allocation2 + $0x260] sm:$0xff] }
 0x20b   : > { %7198 = vmatprep.subr.bf16.mxu0 %v11416_v26  ;;  %8334 = vmatprep.subr.bf16.mxu1 %v11419_v27  ;;  %v350_v24 = vld [vmem:[#allocation2 + $0x360] sm:$0xff]  ;;  %v415_v26 = vld [vmem:[#allocation2 + $0x568] sm:$0xff] }
 0x20c   : > { %v510_v27 = vpack.c.bf16 %v350_v24, %v318_v23  ;;  %v11558_v23 = vld [vmem:[%s12719_s21 + $0xfc0] ss:$16 sps:$4 sm:$0xff]   ;;  %v11561_v24 = vld [vmem:[%s12719_s21 + $0xfc8] ss:$16 sps:$4 sm:$0xff]  }
 0x20d   : > { %7178 = vmatmul.mubr.bf16.gmra.mrb[12].mxu0 %v572_v31  ;;  %8314 = vmatmul.mubr.bf16.gmra.mrb[12].mxu1 %v572_v31  ;;  %v11497_v31 = vld [vmem:[%s12719_s21 + $0xe6c] ss:$16 sps:$4 sm:$0xff]  }
 0x20e   : > { %7199 = vmatpush1.bf16.msra.mxu0 %v11414_v32  ;;  %8335 = vmatpush1.bf16.msra.mxu1 %v11417_v33  ;;  %v11492_v32 = vld [vmem:[%s12719_s21 + $0xe60] ss:$16 sps:$4 sm:$0xff]   ;;  %v11495_v33 = vld [vmem:[%s12719_s21 + $0xe68] ss:$16 sps:$4 sm:$0xff]  }
 0x20f   : > { %7200 = vmatprep.subr.bf16.mxu0 %v11422_v34  ;;  %8336 = vmatprep.subr.bf16.mxu1 %v11425_v35  ;;  %v543_v34 = vpack.c.bf16 %v415_v26, %v383_v25  ;;  %v11500_v35 = vld [vmem:[%s12719_s21 + $0xe84] ss:$16 sps:$4 sm:$0xff]   ;;  %v11569_v26 = vld [vmem:[%s12719_s21 + $0xfec] ss:$16 sps:$4 sm:$0xff]  }
 0x210   : > { %7218 = vmatprep.mubr.bf16.mxu0 %v479_v36  ;;  %8354 = vmatprep.mubr.bf16.mxu1 %v479_v36  ;;  %v382_v36 = vld [vmem:[#allocation2 + $0x460] sm:$0xff] }
 0x211   : > { %v11566_v25 = vld [vmem:[%s12719_s21 + $0xfe4] ss:$16 sps:$4 sm:$0xff]  }
 0x212   : > { %7201 = vmatpush1.bf16.msra.mxu0 %v11420_v37  ;;  %8337 = vmatpush1.bf16.msra.mxu1 %v11423_v38  ;;  %v414_v37 = vld [vmem:[#allocation2 + $0x560] sm:$0xff]  ;;  %v11503_v38 = vld [vmem:[%s12719_s21 + $0xe8c] ss:$16 sps:$4 sm:$0xff]  }
 0x213   : > { %7202 = vmatprep.subr.bf16.mxu0 %v11428_v39  ;;  %8338 = vmatprep.subr.bf16.mxu1 %v11431_v40  ;;  %v447_v39 = vld [vmem:[#allocation2 + $0x668] sm:$0x1]  ;;  %v542_v40 = vpack.c.bf16 %v414_v37, %v382_v36  ;;  %v11570_v36 = vld [vmem:[%s12719_s21 + $0x1000] ss:$16 sps:$4 sm:$0xff]  }
 0x214   : > { %v11573_v37 = vld [vmem:[%s12719_s21 + $0x1008] ss:$16 sps:$4 sm:$0xff]  }
 0x216   : > { %7203 = vmatpush1.bf16.msra.mxu0 %v11426_v41  ;;  %8339 = vmatpush1.bf16.msra.mxu1 %v11429_v42  ;;  %v11498_v41 = vld [vmem:[%s12719_s21 + $0xe80] ss:$16 sps:$4 sm:$0xff]   ;;  %v11501_v42 = vld [vmem:[%s12719_s21 + $0xe88] ss:$16 sps:$4 sm:$0xff]  }
 0x217   : > { %7204 = vmatprep.subr.bf16.mxu0 %v11434_v43  ;;  %8340 = vmatprep.subr.bf16.mxu1 %v11437_v44  ;;  %v11506_v43 = vld [vmem:[%s12719_s21 + $0xea4] ss:$16 sps:$4 sm:$0xff]   ;;  %v11509_v44 = vld [vmem:[%s12719_s21 + $0xeac] ss:$16 sps:$4 sm:$0xff]  }
 0x21a   : > { %7205 = vmatpush1.bf16.msra.mxu0 %v11432_v45  ;;  %8341 = vmatpush1.bf16.msra.mxu1 %v11435_v46  ;;  %v11504_v45 = vld [vmem:[%s12719_s21 + $0xea0] ss:$16 sps:$4 sm:$0xff]   ;;  %v11507_v46 = vld [vmem:[%s12719_s21 + $0xea8] ss:$16 sps:$4 sm:$0xff]  }
 0x21b   : > { %7206 = vmatprep.subr.bf16.mxu0 %v11440_v47  ;;  %8342 = vmatprep.subr.bf16.mxu1 %v11443_v48  ;;  %v575_v47 = vpack.c.bf16 %v447_v39, %v447_v39  ;;  %v11512_v48 = vld [vmem:[%s12719_s21 + $0xec4] ss:$16 sps:$4 sm:$0xff]   ;;  %v11581_v39 = vld [vmem:[%s12719_s21 + $0x102c] ss:$16 sps:$4 sm:$0xff]  }
 0x21e   : > { %7207 = vmatpush1.bf16.msra.mxu0 %v11438_v49  ;;  %8343 = vmatpush1.bf16.msra.mxu1 %v11441_v50  ;;  %v11515_v49 = vld [vmem:[%s12719_s21 + $0xecc] ss:$16 sps:$4 sm:$0xff]   ;;  %v446_v50 = vld [vmem:[#allocation2 + $0x660] sm:$0x1] }
 0x21f   : > { %7208 = vmatprep.subr.bf16.mxu0 %v11446_v51  ;;  %8344 = vmatprep.subr.bf16.mxu1 %v11449_v52  ;;  %v257_v51 = vld [vmem:[#allocation2 + $0x78] sm:$0xff] }
 0x220   : > { %v289_v52 = vld [vmem:[#allocation2 + $0x178] sm:$0xff] }
 0x222   : > { %7209 = vmatpush1.bf16.msra.mxu0 %v11444_v53  ;;  %8345 = vmatpush1.bf16.msra.mxu1 %v11447_v54  ;;  %v574_v53 = vpack.c.bf16 %v446_v50, %v446_v50  ;;  %v11510_v54 = vld [vmem:[%s12719_s21 + $0xec0] ss:$16 sps:$4 sm:$0xff]  }
 0x223   : > { %7210 = vmatprep.subr.bf16.mxu0 %v11452_v55  ;;  %8346 = vmatprep.subr.bf16.mxu1 %v11455_v56  ;;  %v11513_v55 = vld [vmem:[%s12719_s21 + $0xec8] ss:$16 sps:$4 sm:$0xff]   ;;  %v11518_v56 = vld [vmem:[%s12719_s21 + $0xee4] ss:$16 sps:$4 sm:$0xff]   ;;  %v11582_v50 = vld [vmem:[%s12719_s21 + $0x1040] ss:$16 sps:$4 sm:$0xff]  }
 0x226   : > { %7211 = vmatpush1.bf16.msra.mxu0 %v11450_v57  ;;  %8347 = vmatpush1.bf16.msra.mxu1 %v11453_v58  ;;  %v11521_v57 = vld [vmem:[%s12719_s21 + $0xeec] ss:$16 sps:$4 sm:$0xff]   ;;  %v481_v58 = vpack.c.bf16 %v289_v52, %v257_v51  ;;  %v11585_v51 = vld [vmem:[%s12719_s21 + $0x1048] ss:$16 sps:$4 sm:$0xff]   ;;  %v11590_v52 = vld [vmem:[%s12719_s21 + $0x1064] ss:$16 sps:$4 sm:$0xff]  }
 0x227   : > { %7212 = vmatprep.subr.bf16.mxu0 %v11458_v59  ;;  %8348 = vmatprep.subr.bf16.mxu1 %v11461_v60  ;;  %v11516_v59 = vld [vmem:[%s12719_s21 + $0xee0] ss:$16 sps:$4 sm:$0xff]   ;;  %v11519_v60 = vld [vmem:[%s12719_s21 + $0xee8] ss:$16 sps:$4 sm:$0xff]  }
 0x22a   : > { %7213 = vmatpush1.bf16.msra.mxu0 %v11456_v61  ;;  %8349 = vmatpush1.bf16.msra.mxu1 %v11459_v62  ;;  %v11524_v61 = vld [vmem:[%s12719_s21 + $0xf04] ss:$16 sps:$4 sm:$0xff]   ;;  %v11527_v62 = vld [vmem:[%s12719_s21 + $0xf0c] ss:$16 sps:$4 sm:$0xff]  }
 0x22b   : > { %7214 = vmatprep.subr.bf16.mxu0 %v11464_v63  ;;  %8350 = vmatprep.subr.bf16.mxu1 %v11467_v0  ;;  %v11522_v63 = vld [vmem:[%s12719_s21 + $0xf00] ss:$16 sps:$4 sm:$0xff]   ;;  %v11525_v0 = vld [vmem:[%s12719_s21 + $0xf08] ss:$16 sps:$4 sm:$0xff]  }
 0x22e   : > { %7215 = vmatpush1.bf16.msra.mxu0 %v11462_v1  ;;  %8351 = vmatpush1.bf16.msra.mxu1 %v11465_v2  ;;  %v11530_v1 = vld [vmem:[%s12719_s21 + $0xf24] ss:$16 sps:$4 sm:$0xff]   ;;  %v11533_v2 = vld [vmem:[%s12719_s21 + $0xf2c] ss:$16 sps:$4 sm:$0xff]  }
 0x22f   : > { %7216 = vmatprep.subr.bf16.mxu0 %v11470_v3  ;;  %8352 = vmatprep.subr.bf16.mxu1 %v11473_v4  ;;  %v11528_v3 = vld [vmem:[%s12719_s21 + $0xf20] ss:$16 sps:$4 sm:$0xff]   ;;  %v11531_v4 = vld [vmem:[%s12719_s21 + $0xf28] ss:$16 sps:$4 sm:$0xff]  }
 0x232   : > { %7217 = vmatpush1.bf16.msra.mxu0 %v11468_v5  ;;  %8353 = vmatpush1.bf16.msra.mxu1 %v11471_v6  ;;  %v11536_v5 = vld [vmem:[%s12719_s21 + $0xf44] ss:$16 sps:$4 sm:$0xff]   ;;  %v11539_v6 = vld [vmem:[%s12719_s21 + $0xf4c] ss:$16 sps:$4 sm:$0xff]  }
 0x233   : > { %7257 = vmatprep.subr.bf16.mxu0 %v11476_v7  ;;  %8393 = vmatprep.subr.bf16.mxu1 %v11479_v8  ;;  %v11534_v7 = vld [vmem:[%s12719_s21 + $0xf40] ss:$16 sps:$4 sm:$0xff]   ;;  %v11537_v8 = vld [vmem:[%s12719_s21 + $0xf48] ss:$16 sps:$4 sm:$0xff]  }
 0x235   : > { %7219 = vmatmul.mubr.bf16.vlgmr.msra.gmra.mrb[0].mxu0 %v478_v13  ;;  %8355 = vmatmul.mubr.bf16.vlgmr.msra.gmra.mrb[0].mxu1 %v478_v13  ;;  %v11548_v13 = vld [vmem:[%s12719_s21 + $0xf84] ss:$16 sps:$4 sm:$0xff]  }
 0x236   : > { %7258 = vmatpush1.bf16.msra.mxu0 %v11474_v14  ;;  %8394 = vmatpush1.bf16.msra.mxu1 %v11477_v15  ;;  %v11551_v14 = vld [vmem:[%s12719_s21 + $0xf8c] ss:$16 sps:$4 sm:$0xff]   ;;  %v11546_v15 = vld [vmem:[%s12719_s21 + $0xf80] ss:$16 sps:$4 sm:$0xff]  }
 0x237   : > { %7259 = vmatprep.subr.bf16.mxu0 %v11482_v16  ;;  %8395 = vmatprep.subr.bf16.mxu1 %v11485_v17  ;;  %v11549_v16 = vld [vmem:[%s12719_s21 + $0xf88] ss:$16 sps:$4 sm:$0xff]   ;;  %v11554_v17 = vld [vmem:[%s12719_s21 + $0xfa4] ss:$16 sps:$4 sm:$0xff]  }
 0x238   : > { %7228 = vmatprep.mubr.bf16.mxu0 %v511_v20  ;;  %8364 = vmatprep.mubr.bf16.mxu1 %v511_v20  ;;  %v11555_v20 = vld [vmem:[%s12719_s21 + $0xfa8] ss:$16 sps:$4 sm:$0xff]  }
 0x23a   : > { %7260 = vmatpush1.bf16.msra.mxu0 %v11480_v18  ;;  %8396 = vmatpush1.bf16.msra.mxu1 %v11483_v19  ;;  %v11557_v18 = vld [vmem:[%s12719_s21 + $0xfac] ss:$16 sps:$4 sm:$0xff]   ;;  %v11552_v19 = vld [vmem:[%s12719_s21 + $0xfa0] ss:$16 sps:$4 sm:$0xff]  }
 0x23b   : > { %7261 = vmatprep.subr.bf16.mxu0 %v11488_v21  ;;  %8397 = vmatprep.subr.bf16.mxu1 %v11491_v22  ;;  %v11560_v21 = vld [vmem:[%s12719_s21 + $0xfc4] ss:$16 sps:$4 sm:$0xff]   ;;  %v11563_v22 = vld [vmem:[%s12719_s21 + $0xfcc] ss:$16 sps:$4 sm:$0xff]  }
 0x23d   : > { %7229 = vmatmul.mubr.bf16.gmra.mrb[4].mxu0 %v510_v27  ;;  %8365 = vmatmul.mubr.bf16.gmra.mrb[4].mxu1 %v510_v27  ;;  %v11564_v27 = vld [vmem:[%s12719_s21 + $0xfe0] ss:$16 sps:$4 sm:$0xff]  }
 0x23e   : > { %7262 = vmatpush1.bf16.msra.mxu0 %v11486_v28  ;;  %8398 = vmatpush1.bf16.msra.mxu1 %v11489_v29  ;;  %v11567_v28 = vld [vmem:[%s12719_s21 + $0xfe8] ss:$16 sps:$4 sm:$0xff]   ;;  %v11572_v29 = vld [vmem:[%s12719_s21 + $0x1004] ss:$16 sps:$4 sm:$0xff]  }
 0x23f   : > { %7263 = vmatprep.subr.bf16.mxu0 %v11494_v30  ;;  %8399 = vmatprep.subr.bf16.mxu1 %v11497_v31  ;;  %v11575_v30 = vld [vmem:[%s12719_s21 + $0x100c] ss:$16 sps:$4 sm:$0xff]   ;;  %v256_v31 = vld [vmem:[#allocation2 + $0x70] sm:$0xff] }
 0x240   : > { %7238 = vmatprep.mubr.bf16.mxu0 %v543_v34  ;;  %8374 = vmatprep.mubr.bf16.mxu1 %v543_v34  ;;  %v353_v34 = vld [vmem:[#allocation2 + $0x378] sm:$0xff] }
 0x242   : > { %7264 = vmatpush1.bf16.msra.mxu0 %v11492_v32  ;;  %8400 = vmatpush1.bf16.msra.mxu1 %v11495_v33  ;;  %v288_v32 = vld [vmem:[#allocation2 + $0x170] sm:$0xff]  ;;  %v321_v33 = vld [vmem:[#allocation2 + $0x278] sm:$0xff] }
 0x243   : > { %7265 = vmatprep.subr.bf16.mxu0 %v11500_v35  ;;  %8401 = vmatprep.subr.bf16.mxu1 %v11503_v38  ;;  %v480_v35 = vpack.c.bf16 %v288_v32, %v256_v31  ;;  %v11578_v38 = vld [vmem:[%s12719_s21 + $0x1024] ss:$16 sps:$4 sm:$0xff]   ;;  %v11641_v32 = vld [vmem:[%s12719_s21 + $0x116c] ss:$16 sps:$4 sm:$0xff]  }
 0x244   : > { %v11638_v31 = vld [vmem:[%s12719_s21 + $0x1164] ss:$16 sps:$4 sm:$0xff]  }
 0x245   : > { %7239 = vmatmul.mubr.bf16.gmra.mrb[8].mxu0 %v542_v40  ;;  %8375 = vmatmul.mubr.bf16.gmra.mrb[8].mxu1 %v542_v40  ;;  %v11576_v40 = vld [vmem:[%s12719_s21 + $0x1020] ss:$16 sps:$4 sm:$0xff]  }
 0x246   : > { %7266 = vmatpush1.bf16.msra.mxu0 %v11498_v41  ;;  %8402 = vmatpush1.bf16.msra.mxu1 %v11501_v42  ;;  %v11579_v41 = vld [vmem:[%s12719_s21 + $0x1028] ss:$16 sps:$4 sm:$0xff]   ;;  %v513_v42 = vpack.c.bf16 %v353_v34, %v321_v33  ;;  %v11636_v33 = vld [vmem:[%s12719_s21 + $0x1160] ss:$16 sps:$4 sm:$0xff]  }
 0x247   : > { %7267 = vmatprep.subr.bf16.mxu0 %v11506_v43  ;;  %8403 = vmatprep.subr.bf16.mxu1 %v11509_v44  ;;  %v11584_v43 = vld [vmem:[%s12719_s21 + $0x1044] ss:$16 sps:$4 sm:$0xff]   ;;  %v11587_v44 = vld [vmem:[%s12719_s21 + $0x104c] ss:$16 sps:$4 sm:$0xff]   ;;  %v11639_v34 = vld [vmem:[%s12719_s21 + $0x1168] ss:$16 sps:$4 sm:$0xff]  }
 0x248   : > { %7248 = vmatprep.mubr.bf16.mxu0 %v575_v47  ;;  %8384 = vmatprep.mubr.bf16.mxu1 %v575_v47  ;;  %v385_v47 = vld [vmem:[#allocation2 + $0x478] sm:$0xff] }
 0x24a   : > { %7268 = vmatpush1.bf16.msra.mxu0 %v11504_v45  ;;  %8404 = vmatpush1.bf16.msra.mxu1 %v11507_v46  ;;  %v320_v45 = vld [vmem:[#allocation2 + $0x270] sm:$0xff] }
 0x24b   : > { %7269 = vmatprep.subr.bf16.mxu0 %v11512_v48  ;;  %8405 = vmatprep.subr.bf16.mxu1 %v11515_v49  ;;  %v352_v46 = vld [vmem:[#allocation2 + $0x370] sm:$0xff]  ;;  %v417_v48 = vld [vmem:[#allocation2 + $0x578] sm:$0xff] }
 0x24c   : > { %v512_v49 = vpack.c.bf16 %v352_v46, %v320_v45  ;;  %v11654_v45 = vld [vmem:[%s12719_s21 + $0x11c0] ss:$16 sps:$4 sm:$0xff]   ;;  %v11657_v46 = vld [vmem:[%s12719_s21 + $0x11c8] ss:$16 sps:$4 sm:$0xff]  }
 0x24d   : > { %7249 = vmatmul.mubr.bf16.gmra.mrb[12].mxu0 %v574_v53  ;;  %8385 = vmatmul.mubr.bf16.gmra.mrb[12].mxu1 %v574_v53  ;;  %v11593_v53 = vld [vmem:[%s12719_s21 + $0x106c] ss:$16 sps:$4 sm:$0xff]  }
 0x24e   : > { %7270 = vmatpush1.bf16.msra.mxu0 %v11510_v54  ;;  %8406 = vmatpush1.bf16.msra.mxu1 %v11513_v55  ;;  %v11588_v54 = vld [vmem:[%s12719_s21 + $0x1060] ss:$16 sps:$4 sm:$0xff]   ;;  %v11591_v55 = vld [vmem:[%s12719_s21 + $0x1068] ss:$16 sps:$4 sm:$0xff]  }
 0x24f   : > { %7271 = vmatprep.subr.bf16.mxu0 %v11518_v56  ;;  %8407 = vmatprep.subr.bf16.mxu1 %v11521_v57  ;;  %v545_v56 = vpack.c.bf16 %v417_v48, %v385_v47  ;;  %v11596_v57 = vld [vmem:[%s12719_s21 + $0x1084] ss:$16 sps:$4 sm:$0xff]   ;;  %v11665_v48 = vld [vmem:[%s12719_s21 + $0x11ec] ss:$16 sps:$4 sm:$0xff]  }
 0x250   : > { %7289 = vmatprep.mubr.bf16.mxu0 %v481_v58  ;;  %8425 = vmatprep.mubr.bf16.mxu1 %v481_v58  ;;  %v384_v58 = vld [vmem:[#allocation2 + $0x470] sm:$0xff] }
 0x251   : > { %v11662_v47 = vld [vmem:[%s12719_s21 + $0x11e4] ss:$16 sps:$4 sm:$0xff]  }
 0x252   : > { %7272 = vmatpush1.bf16.msra.mxu0 %v11516_v59  ;;  %8408 = vmatpush1.bf16.msra.mxu1 %v11519_v60  ;;  %v416_v59 = vld [vmem:[#allocation2 + $0x570] sm:$0xff]  ;;  %v11599_v60 = vld [vmem:[%s12719_s21 + $0x108c] ss:$16 sps:$4 sm:$0xff]  }
 0x253   : > { %7273 = vmatprep.subr.bf16.mxu0 %v11524_v61  ;;  %8409 = vmatprep.subr.bf16.mxu1 %v11527_v62  ;;  %v449_v61 = vld [vmem:[#allocation2 + $0x678] sm:$0x1]  ;;  %v544_v62 = vpack.c.bf16 %v416_v59, %v384_v58  ;;  %v11666_v58 = vld [vmem:[%s12719_s21 + $0x1200] ss:$16 sps:$4 sm:$0xff]  }
 0x254   : > { %v11669_v59 = vld [vmem:[%s12719_s21 + $0x1208] ss:$16 sps:$4 sm:$0xff]  }
 0x256   : > { %7274 = vmatpush1.bf16.msra.mxu0 %v11522_v63  ;;  %8410 = vmatpush1.bf16.msra.mxu1 %v11525_v0  ;;  %v11594_v63 = vld [vmem:[%s12719_s21 + $0x1080] ss:$16 sps:$4 sm:$0xff]   ;;  %v11597_v0 = vld [vmem:[%s12719_s21 + $0x1088] ss:$16 sps:$4 sm:$0xff]  }
 0x257   : > { %7275 = vmatprep.subr.bf16.mxu0 %v11530_v1  ;;  %8411 = vmatprep.subr.bf16.mxu1 %v11533_v2  ;;  %v11602_v1 = vld [vmem:[%s12719_s21 + $0x10a4] ss:$16 sps:$4 sm:$0xff]   ;;  %v11605_v2 = vld [vmem:[%s12719_s21 + $0x10ac] ss:$16 sps:$4 sm:$0xff]  }
 0x25a   : > { %7276 = vmatpush1.bf16.msra.mxu0 %v11528_v3  ;;  %8412 = vmatpush1.bf16.msra.mxu1 %v11531_v4  ;;  %v11600_v3 = vld [vmem:[%s12719_s21 + $0x10a0] ss:$16 sps:$4 sm:$0xff]   ;;  %v11603_v4 = vld [vmem:[%s12719_s21 + $0x10a8] ss:$16 sps:$4 sm:$0xff]  }
 0x25b   : > { %7277 = vmatprep.subr.bf16.mxu0 %v11536_v5  ;;  %8413 = vmatprep.subr.bf16.mxu1 %v11539_v6  ;;  %v577_v5 = vpack.c.bf16 %v449_v61, %v449_v61  ;;  %v11608_v6 = vld [vmem:[%s12719_s21 + $0x10c4] ss:$16 sps:$4 sm:$0xff]   ;;  %v11677_v61 = vld [vmem:[%s12719_s21 + $0x122c] ss:$16 sps:$4 sm:$0xff]  }
 0x25e   : > { %7278 = vmatpush1.bf16.msra.mxu0 %v11534_v7  ;;  %8414 = vmatpush1.bf16.msra.mxu1 %v11537_v8  ;;  %v11611_v7 = vld [vmem:[%s12719_s21 + $0x10cc] ss:$16 sps:$4 sm:$0xff]   ;;  %v448_v8 = vld [vmem:[#allocation2 + $0x670] sm:$0x1] }
 0x25f   : > { %7279 = vmatprep.subr.bf16.mxu0 %v11542_v9  ;;  %8415 = vmatprep.subr.bf16.mxu1 %v11545_v10  ;;  %v259_v9 = vld [vmem:[#allocation2 + $0x88] sm:$0xff] }
 0x260   : > { %v291_v10 = vld [vmem:[#allocation2 + $0x188] sm:$0xff] }
 0x262   : > { %7280 = vmatpush1.bf16.msra.mxu0 %v11540_v11  ;;  %8416 = vmatpush1.bf16.msra.mxu1 %v11543_v12  ;;  %v576_v11 = vpack.c.bf16 %v448_v8, %v448_v8  ;;  %v11606_v12 = vld [vmem:[%s12719_s21 + $0x10c0] ss:$16 sps:$4 sm:$0xff]  }
 0x263   : > { %7281 = vmatprep.subr.bf16.mxu0 %v11548_v13  ;;  %8417 = vmatprep.subr.bf16.mxu1 %v11551_v14  ;;  %v11609_v13 = vld [vmem:[%s12719_s21 + $0x10c8] ss:$16 sps:$4 sm:$0xff]   ;;  %v11614_v14 = vld [vmem:[%s12719_s21 + $0x10e4] ss:$16 sps:$4 sm:$0xff]   ;;  %v11678_v8 = vld [vmem:[%s12719_s21 + $0x1240] ss:$16 sps:$4 sm:$0xff]  }
 0x266   : > { %7282 = vmatpush1.bf16.msra.mxu0 %v11546_v15  ;;  %8418 = vmatpush1.bf16.msra.mxu1 %v11549_v16  ;;  %v11617_v15 = vld [vmem:[%s12719_s21 + $0x10ec] ss:$16 sps:$4 sm:$0xff]   ;;  %v483_v16 = vpack.c.bf16 %v291_v10, %v259_v9  ;;  %v11681_v9 = vld [vmem:[%s12719_s21 + $0x1248] ss:$16 sps:$4 sm:$0xff]   ;;  %v11686_v10 = vld [vmem:[%s12719_s21 + $0x1264] ss:$16 sps:$4 sm:$0xff]  }
 0x267   : > { %7283 = vmatprep.subr.bf16.mxu0 %v11554_v17  ;;  %8419 = vmatprep.subr.bf16.mxu1 %v11557_v18  ;;  %v11612_v17 = vld [vmem:[%s12719_s21 + $0x10e0] ss:$16 sps:$4 sm:$0xff]   ;;  %v11615_v18 = vld [vmem:[%s12719_s21 + $0x10e8] ss:$16 sps:$4 sm:$0xff]  }
 0x26a   : > { %7284 = vmatpush1.bf16.msra.mxu0 %v11552_v19  ;;  %8420 = vmatpush1.bf16.msra.mxu1 %v11555_v20  ;;  %v11620_v19 = vld [vmem:[%s12719_s21 + $0x1104] ss:$16 sps:$4 sm:$0xff]   ;;  %v11623_v20 = vld [vmem:[%s12719_s21 + $0x110c] ss:$16 sps:$4 sm:$0xff]  }
 0x26b   : > { %7285 = vmatprep.subr.bf16.mxu0 %v11560_v21  ;;  %8421 = vmatprep.subr.bf16.mxu1 %v11563_v22  ;;  %v11618_v21 = vld [vmem:[%s12719_s21 + $0x1100] ss:$16 sps:$4 sm:$0xff]   ;;  %v11621_v22 = vld [vmem:[%s12719_s21 + $0x1108] ss:$16 sps:$4 sm:$0xff]  }
 0x26e   : > { %7286 = vmatpush1.bf16.msra.mxu0 %v11558_v23  ;;  %8422 = vmatpush1.bf16.msra.mxu1 %v11561_v24  ;;  %v11626_v23 = vld [vmem:[%s12719_s21 + $0x1124] ss:$16 sps:$4 sm:$0xff]   ;;  %v11629_v24 = vld [vmem:[%s12719_s21 + $0x112c] ss:$16 sps:$4 sm:$0xff]  }
 0x26f   : > { %7287 = vmatprep.subr.bf16.mxu0 %v11566_v25  ;;  %8423 = vmatprep.subr.bf16.mxu1 %v11569_v26  ;;  %v11624_v25 = vld [vmem:[%s12719_s21 + $0x1120] ss:$16 sps:$4 sm:$0xff]   ;;  %v11627_v26 = vld [vmem:[%s12719_s21 + $0x1128] ss:$16 sps:$4 sm:$0xff]  }
 0x272   : > { %7288 = vmatpush1.bf16.msra.mxu0 %v11564_v27  ;;  %8424 = vmatpush1.bf16.msra.mxu1 %v11567_v28  ;;  %v11632_v27 = vld [vmem:[%s12719_s21 + $0x1144] ss:$16 sps:$4 sm:$0xff]   ;;  %v11635_v28 = vld [vmem:[%s12719_s21 + $0x114c] ss:$16 sps:$4 sm:$0xff]  }
 0x273   : > { %7328 = vmatprep.subr.bf16.mxu0 %v11572_v29  ;;  %8464 = vmatprep.subr.bf16.mxu1 %v11575_v30  ;;  %v11630_v29 = vld [vmem:[%s12719_s21 + $0x1140] ss:$16 sps:$4 sm:$0xff]   ;;  %v11633_v30 = vld [vmem:[%s12719_s21 + $0x1148] ss:$16 sps:$4 sm:$0xff]  }
 0x275   : > { %7290 = vmatmul.mubr.bf16.vlgmr.msra.gmra.mrb[0].mxu0 %v480_v35  ;;  %8426 = vmatmul.mubr.bf16.vlgmr.msra.gmra.mrb[0].mxu1 %v480_v35  ;;  %v11644_v35 = vld [vmem:[%s12719_s21 + $0x1184] ss:$16 sps:$4 sm:$0xff]  }
 0x276   : > { %7329 = vmatpush1.bf16.msra.mxu0 %v11570_v36  ;;  %8465 = vmatpush1.bf16.msra.mxu1 %v11573_v37  ;;  %v11647_v36 = vld [vmem:[%s12719_s21 + $0x118c] ss:$16 sps:$4 sm:$0xff]   ;;  %v11642_v37 = vld [vmem:[%s12719_s21 + $0x1180] ss:$16 sps:$4 sm:$0xff]  }
 0x277   : > { %7330 = vmatprep.subr.bf16.mxu0 %v11578_v38  ;;  %8466 = vmatprep.subr.bf16.mxu1 %v11581_v39  ;;  %v11645_v38 = vld [vmem:[%s12719_s21 + $0x1188] ss:$16 sps:$4 sm:$0xff]   ;;  %v11650_v39 = vld [vmem:[%s12719_s21 + $0x11a4] ss:$16 sps:$4 sm:$0xff]  }
 0x278   : > { %7299 = vmatprep.mubr.bf16.mxu0 %v513_v42  ;;  %8435 = vmatprep.mubr.bf16.mxu1 %v513_v42  ;;  %v11651_v42 = vld [vmem:[%s12719_s21 + $0x11a8] ss:$16 sps:$4 sm:$0xff]  }
 0x27a   : > { %7331 = vmatpush1.bf16.msra.mxu0 %v11576_v40  ;;  %8467 = vmatpush1.bf16.msra.mxu1 %v11579_v41  ;;  %v11653_v40 = vld [vmem:[%s12719_s21 + $0x11ac] ss:$16 sps:$4 sm:$0xff]   ;;  %v11648_v41 = vld [vmem:[%s12719_s21 + $0x11a0] ss:$16 sps:$4 sm:$0xff]  }
 0x27b   : > { %7332 = vmatprep.subr.bf16.mxu0 %v11584_v43  ;;  %8468 = vmatprep.subr.bf16.mxu1 %v11587_v44  ;;  %v11656_v43 = vld [vmem:[%s12719_s21 + $0x11c4] ss:$16 sps:$4 sm:$0xff]   ;;  %v11659_v44 = vld [vmem:[%s12719_s21 + $0x11cc] ss:$16 sps:$4 sm:$0xff]  }
 0x27d   : > { %7300 = vmatmul.mubr.bf16.gmra.mrb[4].mxu0 %v512_v49  ;;  %8436 = vmatmul.mubr.bf16.gmra.mrb[4].mxu1 %v512_v49  ;;  %v11660_v49 = vld [vmem:[%s12719_s21 + $0x11e0] ss:$16 sps:$4 sm:$0xff]  }
 0x27e   : > { %7333 = vmatpush1.bf16.msra.mxu0 %v11582_v50  ;;  %8469 = vmatpush1.bf16.msra.mxu1 %v11585_v51  ;;  %v11663_v50 = vld [vmem:[%s12719_s21 + $0x11e8] ss:$16 sps:$4 sm:$0xff]   ;;  %v11668_v51 = vld [vmem:[%s12719_s21 + $0x1204] ss:$16 sps:$4 sm:$0xff]  }
 0x27f   : > { %7334 = vmatprep.subr.bf16.mxu0 %v11590_v52  ;;  %8470 = vmatprep.subr.bf16.mxu1 %v11593_v53  ;;  %v11671_v52 = vld [vmem:[%s12719_s21 + $0x120c] ss:$16 sps:$4 sm:$0xff]   ;;  %v258_v53 = vld [vmem:[#allocation2 + $0x80] sm:$0xff] }
 0x280   : > { %7309 = vmatprep.mubr.bf16.mxu0 %v545_v56  ;;  %8445 = vmatprep.mubr.bf16.mxu1 %v545_v56  ;;  %v355_v56 = vld [vmem:[#allocation2 + $0x388] sm:$0xff] }
 0x282   : > { %7335 = vmatpush1.bf16.msra.mxu0 %v11588_v54  ;;  %8471 = vmatpush1.bf16.msra.mxu1 %v11591_v55  ;;  %v290_v54 = vld [vmem:[#allocation2 + $0x180] sm:$0xff]  ;;  %v323_v55 = vld [vmem:[#allocation2 + $0x288] sm:$0xff] }
 0x283   : > { %7336 = vmatprep.subr.bf16.mxu0 %v11596_v57  ;;  %8472 = vmatprep.subr.bf16.mxu1 %v11599_v60  ;;  %v482_v57 = vpack.c.bf16 %v290_v54, %v258_v53  ;;  %v11674_v60 = vld [vmem:[%s12719_s21 + $0x1224] ss:$16 sps:$4 sm:$0xff]   ;;  %v11737_v54 = vld [vmem:[%s12719_s21 + $0x136c] ss:$16 sps:$4 sm:$0xff]  }
 0x284   : > { %v11734_v53 = vld [vmem:[%s12719_s21 + $0x1364] ss:$16 sps:$4 sm:$0xff]  }
 0x285   : > { %7310 = vmatmul.mubr.bf16.gmra.mrb[8].mxu0 %v544_v62  ;;  %8446 = vmatmul.mubr.bf16.gmra.mrb[8].mxu1 %v544_v62  ;;  %v11672_v62 = vld [vmem:[%s12719_s21 + $0x1220] ss:$16 sps:$4 sm:$0xff]  }
 0x286   : > { %7337 = vmatpush1.bf16.msra.mxu0 %v11594_v63  ;;  %8473 = vmatpush1.bf16.msra.mxu1 %v11597_v0  ;;  %v11675_v63 = vld [vmem:[%s12719_s21 + $0x1228] ss:$16 sps:$4 sm:$0xff]   ;;  %v515_v0 = vpack.c.bf16 %v355_v56, %v323_v55  ;;  %v11732_v55 = vld [vmem:[%s12719_s21 + $0x1360] ss:$16 sps:$4 sm:$0xff]  }
 0x287   : > { %7338 = vmatprep.subr.bf16.mxu0 %v11602_v1  ;;  %8474 = vmatprep.subr.bf16.mxu1 %v11605_v2  ;;  %v11680_v1 = vld [vmem:[%s12719_s21 + $0x1244] ss:$16 sps:$4 sm:$0xff]   ;;  %v11683_v2 = vld [vmem:[%s12719_s21 + $0x124c] ss:$16 sps:$4 sm:$0xff]   ;;  %v11735_v56 = vld [vmem:[%s12719_s21 + $0x1368] ss:$16 sps:$4 sm:$0xff]  }
 0x288   : > { %7319 = vmatprep.mubr.bf16.mxu0 %v577_v5  ;;  %8455 = vmatprep.mubr.bf16.mxu1 %v577_v5  ;;  %v387_v5 = vld [vmem:[#allocation2 + $0x488] sm:$0xff] }
 0x28a   : > { %7339 = vmatpush1.bf16.msra.mxu0 %v11600_v3  ;;  %8475 = vmatpush1.bf16.msra.mxu1 %v11603_v4  ;;  %v322_v3 = vld [vmem:[#allocation2 + $0x280] sm:$0xff] }
 0x28b   : > { %7340 = vmatprep.subr.bf16.mxu0 %v11608_v6  ;;  %8476 = vmatprep.subr.bf16.mxu1 %v11611_v7  ;;  %v354_v4 = vld [vmem:[#allocation2 + $0x380] sm:$0xff]  ;;  %v419_v6 = vld [vmem:[#allocation2 + $0x588] sm:$0xff] }
 0x28c   : > { %v514_v7 = vpack.c.bf16 %v354_v4, %v322_v3  ;;  %v11750_v3 = vld [vmem:[%s12719_s21 + $0x13c0] ss:$16 sps:$4 sm:$0xff]   ;;  %v11753_v4 = vld [vmem:[%s12719_s21 + $0x13c8] ss:$16 sps:$4 sm:$0xff]  }
 0x28d   : > { %7320 = vmatmul.mubr.bf16.gmra.mrb[12].mxu0 %v576_v11  ;;  %8456 = vmatmul.mubr.bf16.gmra.mrb[12].mxu1 %v576_v11  ;;  %v11689_v11 = vld [vmem:[%s12719_s21 + $0x126c] ss:$16 sps:$4 sm:$0xff]  }
 0x28e   : > { %7341 = vmatpush1.bf16.msra.mxu0 %v11606_v12  ;;  %8477 = vmatpush1.bf16.msra.mxu1 %v11609_v13  ;;  %v11684_v12 = vld [vmem:[%s12719_s21 + $0x1260] ss:$16 sps:$4 sm:$0xff]   ;;  %v11687_v13 = vld [vmem:[%s12719_s21 + $0x1268] ss:$16 sps:$4 sm:$0xff]  }
 0x28f   : > { %7342 = vmatprep.subr.bf16.mxu0 %v11614_v14  ;;  %8478 = vmatprep.subr.bf16.mxu1 %v11617_v15  ;;  %v547_v14 = vpack.c.bf16 %v419_v6, %v387_v5  ;;  %v11692_v15 = vld [vmem:[%s12719_s21 + $0x1284] ss:$16 sps:$4 sm:$0xff]   ;;  %v11761_v6 = vld [vmem:[%s12719_s21 + $0x13ec] ss:$16 sps:$4 sm:$0xff]  }
 0x290   : > { %7360 = vmatprep.mubr.bf16.mxu0 %v483_v16  ;;  %8496 = vmatprep.mubr.bf16.mxu1 %v483_v16  ;;  %v386_v16 = vld [vmem:[#allocation2 + $0x480] sm:$0xff] }
 0x291   : > { %v11758_v5 = vld [vmem:[%s12719_s21 + $0x13e4] ss:$16 sps:$4 sm:$0xff]  }
 0x292   : > { %7343 = vmatpush1.bf16.msra.mxu0 %v11612_v17  ;;  %8479 = vmatpush1.bf16.msra.mxu1 %v11615_v18  ;;  %v418_v17 = vld [vmem:[#allocation2 + $0x580] sm:$0xff]  ;;  %v11695_v18 = vld [vmem:[%s12719_s21 + $0x128c] ss:$16 sps:$4 sm:$0xff]  }
 0x293   : > { %7344 = vmatprep.subr.bf16.mxu0 %v11620_v19  ;;  %8480 = vmatprep.subr.bf16.mxu1 %v11623_v20  ;;  %v451_v19 = vld [vmem:[#allocation2 + $0x688] sm:$0x1]  ;;  %v546_v20 = vpack.c.bf16 %v418_v17, %v386_v16  ;;  %v11762_v16 = vld [vmem:[%s12719_s21 + $0x1400] ss:$16 sps:$4 sm:$0xff]  }
 0x294   : > { %v11765_v17 = vld [vmem:[%s12719_s21 + $0x1408] ss:$16 sps:$4 sm:$0xff]  }
 0x296   : > { %7345 = vmatpush1.bf16.msra.mxu0 %v11618_v21  ;;  %8481 = vmatpush1.bf16.msra.mxu1 %v11621_v22  ;;  %v11690_v21 = vld [vmem:[%s12719_s21 + $0x1280] ss:$16 sps:$4 sm:$0xff]   ;;  %v11693_v22 = vld [vmem:[%s12719_s21 + $0x1288] ss:$16 sps:$4 sm:$0xff]  }
 0x297   : > { %7346 = vmatprep.subr.bf16.mxu0 %v11626_v23  ;;  %8482 = vmatprep.subr.bf16.mxu1 %v11629_v24  ;;  %v11698_v23 = vld [vmem:[%s12719_s21 + $0x12a4] ss:$16 sps:$4 sm:$0xff]   ;;  %v11701_v24 = vld [vmem:[%s12719_s21 + $0x12ac] ss:$16 sps:$4 sm:$0xff]  }
 0x29a   : > { %7347 = vmatpush1.bf16.msra.mxu0 %v11624_v25  ;;  %8483 = vmatpush1.bf16.msra.mxu1 %v11627_v26  ;;  %v11696_v25 = vld [vmem:[%s12719_s21 + $0x12a0] ss:$16 sps:$4 sm:$0xff]   ;;  %v11699_v26 = vld [vmem:[%s12719_s21 + $0x12a8] ss:$16 sps:$4 sm:$0xff]  }
 0x29b   : > { %7348 = vmatprep.subr.bf16.mxu0 %v11632_v27  ;;  %8484 = vmatprep.subr.bf16.mxu1 %v11635_v28  ;;  %v579_v27 = vpack.c.bf16 %v451_v19, %v451_v19  ;;  %v11704_v28 = vld [vmem:[%s12719_s21 + $0x12c4] ss:$16 sps:$4 sm:$0xff]   ;;  %v11773_v19 = vld [vmem:[%s12719_s21 + $0x142c] ss:$16 sps:$4 sm:$0xff]  }
 0x29e   : > { %7349 = vmatpush1.bf16.msra.mxu0 %v11630_v29  ;;  %8485 = vmatpush1.bf16.msra.mxu1 %v11633_v30  ;;  %v11707_v29 = vld [vmem:[%s12719_s21 + $0x12cc] ss:$16 sps:$4 sm:$0xff]   ;;  %v450_v30 = vld [vmem:[#allocation2 + $0x680] sm:$0x1] }
 0x29f   : > { %7350 = vmatprep.subr.bf16.mxu0 %v11638_v31  ;;  %8486 = vmatprep.subr.bf16.mxu1 %v11641_v32  ;;  %v261_v31 = vld [vmem:[#allocation2 + $0x98] sm:$0xff] }
 0x2a0   : > { %v293_v32 = vld [vmem:[#allocation2 + $0x198] sm:$0xff] }
 0x2a2   : > { %7351 = vmatpush1.bf16.msra.mxu0 %v11636_v33  ;;  %8487 = vmatpush1.bf16.msra.mxu1 %v11639_v34  ;;  %v578_v33 = vpack.c.bf16 %v450_v30, %v450_v30  ;;  %v11702_v34 = vld [vmem:[%s12719_s21 + $0x12c0] ss:$16 sps:$4 sm:$0xff]  }
 0x2a3   : > { %7352 = vmatprep.subr.bf16.mxu0 %v11644_v35  ;;  %8488 = vmatprep.subr.bf16.mxu1 %v11647_v36  ;;  %v11705_v35 = vld [vmem:[%s12719_s21 + $0x12c8] ss:$16 sps:$4 sm:$0xff]   ;;  %v11710_v36 = vld [vmem:[%s12719_s21 + $0x12e4] ss:$16 sps:$4 sm:$0xff]   ;;  %v11774_v30 = vld [vmem:[%s12719_s21 + $0x1440] ss:$16 sps:$4 sm:$0xff]  }
 0x2a6   : > { %7353 = vmatpush1.bf16.msra.mxu0 %v11642_v37  ;;  %8489 = vmatpush1.bf16.msra.mxu1 %v11645_v38  ;;  %v11713_v37 = vld [vmem:[%s12719_s21 + $0x12ec] ss:$16 sps:$4 sm:$0xff]   ;;  %v485_v38 = vpack.c.bf16 %v293_v32, %v261_v31  ;;  %v11777_v31 = vld [vmem:[%s12719_s21 + $0x1448] ss:$16 sps:$4 sm:$0xff]   ;;  %v11782_v32 = vld [vmem:[%s12719_s21 + $0x1464] ss:$16 sps:$4 sm:$0xff]  }
 0x2a7   : > { %7354 = vmatprep.subr.bf16.mxu0 %v11650_v39  ;;  %8490 = vmatprep.subr.bf16.mxu1 %v11653_v40  ;;  %v11708_v39 = vld [vmem:[%s12719_s21 + $0x12e0] ss:$16 sps:$4 sm:$0xff]   ;;  %v11711_v40 = vld [vmem:[%s12719_s21 + $0x12e8] ss:$16 sps:$4 sm:$0xff]  }
 0x2aa   : > { %7355 = vmatpush1.bf16.msra.mxu0 %v11648_v41  ;;  %8491 = vmatpush1.bf16.msra.mxu1 %v11651_v42  ;;  %v11716_v41 = vld [vmem:[%s12719_s21 + $0x1304] ss:$16 sps:$4 sm:$0xff]   ;;  %v11719_v42 = vld [vmem:[%s12719_s21 + $0x130c] ss:$16 sps:$4 sm:$0xff]  }
 0x2ab   : > { %7356 = vmatprep.subr.bf16.mxu0 %v11656_v43  ;;  %8492 = vmatprep.subr.bf16.mxu1 %v11659_v44  ;;  %v11714_v43 = vld [vmem:[%s12719_s21 + $0x1300] ss:$16 sps:$4 sm:$0xff]   ;;  %v11717_v44 = vld [vmem:[%s12719_s21 + $0x1308] ss:$16 sps:$4 sm:$0xff]  }
 0x2ae   : > { %7357 = vmatpush1.bf16.msra.mxu0 %v11654_v45  ;;  %8493 = vmatpush1.bf16.msra.mxu1 %v11657_v46  ;;  %v11722_v45 = vld [vmem:[%s12719_s21 + $0x1324] ss:$16 sps:$4 sm:$0xff]   ;;  %v11725_v46 = vld [vmem:[%s12719_s21 + $0x132c] ss:$16 sps:$4 sm:$0xff]  }
 0x2af   : > { %7358 = vmatprep.subr.bf16.mxu0 %v11662_v47  ;;  %8494 = vmatprep.subr.bf16.mxu1 %v11665_v48  ;;  %v11720_v47 = vld [vmem:[%s12719_s21 + $0x1320] ss:$16 sps:$4 sm:$0xff]   ;;  %v11723_v48 = vld [vmem:[%s12719_s21 + $0x1328] ss:$16 sps:$4 sm:$0xff]  }
 0x2b2   : > { %7359 = vmatpush1.bf16.msra.mxu0 %v11660_v49  ;;  %8495 = vmatpush1.bf16.msra.mxu1 %v11663_v50  ;;  %v11728_v49 = vld [vmem:[%s12719_s21 + $0x1344] ss:$16 sps:$4 sm:$0xff]   ;;  %v11731_v50 = vld [vmem:[%s12719_s21 + $0x134c] ss:$16 sps:$4 sm:$0xff]  }
 0x2b3   : > { %7399 = vmatprep.subr.bf16.mxu0 %v11668_v51  ;;  %8535 = vmatprep.subr.bf16.mxu1 %v11671_v52  ;;  %v11726_v51 = vld [vmem:[%s12719_s21 + $0x1340] ss:$16 sps:$4 sm:$0xff]   ;;  %v11729_v52 = vld [vmem:[%s12719_s21 + $0x1348] ss:$16 sps:$4 sm:$0xff]  }
 0x2b5   : > { %7361 = vmatmul.mubr.bf16.vlgmr.msra.gmra.mrb[0].mxu0 %v482_v57  ;;  %8497 = vmatmul.mubr.bf16.vlgmr.msra.gmra.mrb[0].mxu1 %v482_v57  ;;  %v11740_v57 = vld [vmem:[%s12719_s21 + $0x1384] ss:$16 sps:$4 sm:$0xff]  }
 0x2b6   : > { %7400 = vmatpush1.bf16.msra.mxu0 %v11666_v58  ;;  %8536 = vmatpush1.bf16.msra.mxu1 %v11669_v59  ;;  %v11743_v58 = vld [vmem:[%s12719_s21 + $0x138c] ss:$16 sps:$4 sm:$0xff]   ;;  %v11738_v59 = vld [vmem:[%s12719_s21 + $0x1380] ss:$16 sps:$4 sm:$0xff]  }
 0x2b7   : > { %7401 = vmatprep.subr.bf16.mxu0 %v11674_v60  ;;  %8537 = vmatprep.subr.bf16.mxu1 %v11677_v61  ;;  %v11741_v60 = vld [vmem:[%s12719_s21 + $0x1388] ss:$16 sps:$4 sm:$0xff]   ;;  %v11746_v61 = vld [vmem:[%s12719_s21 + $0x13a4] ss:$16 sps:$4 sm:$0xff]  }
 0x2b8   : > { %7370 = vmatprep.mubr.bf16.mxu0 %v515_v0  ;;  %8506 = vmatprep.mubr.bf16.mxu1 %v515_v0  ;;  %v11747_v0 = vld [vmem:[%s12719_s21 + $0x13a8] ss:$16 sps:$4 sm:$0xff]  }
 0x2ba   : > { %7402 = vmatpush1.bf16.msra.mxu0 %v11672_v62  ;;  %8538 = vmatpush1.bf16.msra.mxu1 %v11675_v63  ;;  %v11749_v62 = vld [vmem:[%s12719_s21 + $0x13ac] ss:$16 sps:$4 sm:$0xff]   ;;  %v11744_v63 = vld [vmem:[%s12719_s21 + $0x13a0] ss:$16 sps:$4 sm:$0xff]  }
 0x2bb   : > { %7403 = vmatprep.subr.bf16.mxu0 %v11680_v1  ;;  %8539 = vmatprep.subr.bf16.mxu1 %v11683_v2  ;;  %v11752_v1 = vld [vmem:[%s12719_s21 + $0x13c4] ss:$16 sps:$4 sm:$0xff]   ;;  %v11755_v2 = vld [vmem:[%s12719_s21 + $0x13cc] ss:$16 sps:$4 sm:$0xff]  }
 0x2bd   : > { %7371 = vmatmul.mubr.bf16.gmra.mrb[4].mxu0 %v514_v7  ;;  %8507 = vmatmul.mubr.bf16.gmra.mrb[4].mxu1 %v514_v7  ;;  %v11756_v7 = vld [vmem:[%s12719_s21 + $0x13e0] ss:$16 sps:$4 sm:$0xff]  }
 0x2be   : > { %7404 = vmatpush1.bf16.msra.mxu0 %v11678_v8  ;;  %8540 = vmatpush1.bf16.msra.mxu1 %v11681_v9  ;;  %v11759_v8 = vld [vmem:[%s12719_s21 + $0x13e8] ss:$16 sps:$4 sm:$0xff]   ;;  %v11764_v9 = vld [vmem:[%s12719_s21 + $0x1404] ss:$16 sps:$4 sm:$0xff]  }
 0x2bf   : > { %7405 = vmatprep.subr.bf16.mxu0 %v11686_v10  ;;  %8541 = vmatprep.subr.bf16.mxu1 %v11689_v11  ;;  %v11767_v10 = vld [vmem:[%s12719_s21 + $0x140c] ss:$16 sps:$4 sm:$0xff]   ;;  %v260_v11 = vld [vmem:[#allocation2 + $0x90] sm:$0xff] }
 0x2c0   : > { %7380 = vmatprep.mubr.bf16.mxu0 %v547_v14  ;;  %8516 = vmatprep.mubr.bf16.mxu1 %v547_v14  ;;  %v357_v14 = vld [vmem:[#allocation2 + $0x398] sm:$0xff] }
 0x2c2   : > { %7406 = vmatpush1.bf16.msra.mxu0 %v11684_v12  ;;  %8542 = vmatpush1.bf16.msra.mxu1 %v11687_v13  ;;  %v292_v12 = vld [vmem:[#allocation2 + $0x190] sm:$0xff]  ;;  %v325_v13 = vld [vmem:[#allocation2 + $0x298] sm:$0xff] }
 0x2c3   : > { %7407 = vmatprep.subr.bf16.mxu0 %v11692_v15  ;;  %8543 = vmatprep.subr.bf16.mxu1 %v11695_v18  ;;  %v484_v15 = vpack.c.bf16 %v292_v12, %v260_v11  ;;  %v11770_v18 = vld [vmem:[%s12719_s21 + $0x1424] ss:$16 sps:$4 sm:$0xff]   ;;  %v11833_v12 = vld [vmem:[%s12719_s21 + $0x156c] ss:$16 sps:$4 sm:$0xff]  }
 0x2c4   : > { %v11830_v11 = vld [vmem:[%s12719_s21 + $0x1564] ss:$16 sps:$4 sm:$0xff]  }
 0x2c5   : > { %7381 = vmatmul.mubr.bf16.gmra.mrb[8].mxu0 %v546_v20  ;;  %8517 = vmatmul.mubr.bf16.gmra.mrb[8].mxu1 %v546_v20  ;;  %v11768_v20 = vld [vmem:[%s12719_s21 + $0x1420] ss:$16 sps:$4 sm:$0xff]  }
 0x2c6   : > { %7408 = vmatpush1.bf16.msra.mxu0 %v11690_v21  ;;  %8544 = vmatpush1.bf16.msra.mxu1 %v11693_v22  ;;  %v11771_v21 = vld [vmem:[%s12719_s21 + $0x1428] ss:$16 sps:$4 sm:$0xff]   ;;  %v517_v22 = vpack.c.bf16 %v357_v14, %v325_v13  ;;  %v11828_v13 = vld [vmem:[%s12719_s21 + $0x1560] ss:$16 sps:$4 sm:$0xff]  }
 0x2c7   : > { %7409 = vmatprep.subr.bf16.mxu0 %v11698_v23  ;;  %8545 = vmatprep.subr.bf16.mxu1 %v11701_v24  ;;  %v11776_v23 = vld [vmem:[%s12719_s21 + $0x1444] ss:$16 sps:$4 sm:$0xff]   ;;  %v11779_v24 = vld [vmem:[%s12719_s21 + $0x144c] ss:$16 sps:$4 sm:$0xff]   ;;  %v11831_v14 = vld [vmem:[%s12719_s21 + $0x1568] ss:$16 sps:$4 sm:$0xff]  }
 0x2c8   : > { %7390 = vmatprep.mubr.bf16.mxu0 %v579_v27  ;;  %8526 = vmatprep.mubr.bf16.mxu1 %v579_v27  ;;  %v389_v27 = vld [vmem:[#allocation2 + $0x498] sm:$0xff] }
 0x2ca   : > { %7410 = vmatpush1.bf16.msra.mxu0 %v11696_v25  ;;  %8546 = vmatpush1.bf16.msra.mxu1 %v11699_v26  ;;  %v324_v25 = vld [vmem:[#allocation2 + $0x290] sm:$0xff] }
 0x2cb   : > { %7411 = vmatprep.subr.bf16.mxu0 %v11704_v28  ;;  %8547 = vmatprep.subr.bf16.mxu1 %v11707_v29  ;;  %v356_v26 = vld [vmem:[#allocation2 + $0x390] sm:$0xff]  ;;  %v421_v28 = vld [vmem:[#allocation2 + $0x598] sm:$0xff] }
 0x2cc   : > { %v516_v29 = vpack.c.bf16 %v356_v26, %v324_v25  ;;  %v11846_v25 = vld [vmem:[%s12719_s21 + $0x15c0] ss:$16 sps:$4 sm:$0xff]   ;;  %v11849_v26 = vld [vmem:[%s12719_s21 + $0x15c8] ss:$16 sps:$4 sm:$0xff]  }
 0x2cd   : > { %7391 = vmatmul.mubr.bf16.gmra.mrb[12].mxu0 %v578_v33  ;;  %8527 = vmatmul.mubr.bf16.gmra.mrb[12].mxu1 %v578_v33  ;;  %v11785_v33 = vld [vmem:[%s12719_s21 + $0x146c] ss:$16 sps:$4 sm:$0xff]  }
 0x2ce   : > { %7412 = vmatpush1.bf16.msra.mxu0 %v11702_v34  ;;  %8548 = vmatpush1.bf16.msra.mxu1 %v11705_v35  ;;  %v11780_v34 = vld [vmem:[%s12719_s21 + $0x1460] ss:$16 sps:$4 sm:$0xff]   ;;  %v11783_v35 = vld [vmem:[%s12719_s21 + $0x1468] ss:$16 sps:$4 sm:$0xff]  }
 0x2cf   : > { %7413 = vmatprep.subr.bf16.mxu0 %v11710_v36  ;;  %8549 = vmatprep.subr.bf16.mxu1 %v11713_v37  ;;  %v549_v36 = vpack.c.bf16 %v421_v28, %v389_v27  ;;  %v388_v37 = vld [vmem:[#allocation2 + $0x490] sm:$0xff]  ;;  %v11857_v28 = vld [vmem:[%s12719_s21 + $0x15ec] ss:$16 sps:$4 sm:$0xff]  }
 0x2d0   : > { %7431 = vmatprep.mubr.bf16.mxu0 %v485_v38  ;;  %8567 = vmatprep.mubr.bf16.mxu1 %v485_v38  ;;  %v420_v38 = vld [vmem:[#allocation2 + $0x590] sm:$0xff] }
 0x2d1   : > { %v11854_v27 = vld [vmem:[%s12719_s21 + $0x15e4] ss:$16 sps:$4 sm:$0xff]  }
 0x2d2   : > { %7414 = vmatpush1.bf16.msra.mxu0 %v11708_v39  ;;  %8550 = vmatpush1.bf16.msra.mxu1 %v11711_v40  ;;  %v11788_v39 = vld [vmem:[%s12719_s21 + $0x1484] ss:$16 sps:$4 sm:$0xff]   ;;  %v11791_v40 = vld [vmem:[%s12719_s21 + $0x148c] ss:$16 sps:$4 sm:$0xff]  }
 0x2d3   : > { %7415 = vmatprep.subr.bf16.mxu0 %v11716_v41  ;;  %8551 = vmatprep.subr.bf16.mxu1 %v11719_v42  ;;  %v548_v41 = vpack.c.bf16 %v420_v38, %v388_v37  ;;  %v453_v42 = vld [vmem:[#allocation2 + $0x698] sm:$0x1]  ;;  %v359_v37 = vld [vmem:[#allocation2 + $0x3a8] sm:$0xff]  ;;  %v11858_v38 = vld [vmem:[%s12719_s21 + $0x1600] ss:$16 sps:$4 sm:$0xff]  }
 0x2d6   : > { %7416 = vmatpush1.bf16.msra.mxu0 %v11714_v43  ;;  %8552 = vmatpush1.bf16.msra.mxu1 %v11717_v44  ;;  %v11786_v43 = vld [vmem:[%s12719_s21 + $0x1480] ss:$16 sps:$4 sm:$0xff]   ;;  %v11789_v44 = vld [vmem:[%s12719_s21 + $0x1488] ss:$16 sps:$4 sm:$0xff]  }
 0x2d7   : > { %7417 = vmatprep.subr.bf16.mxu0 %v11722_v45  ;;  %8553 = vmatprep.subr.bf16.mxu1 %v11725_v46  ;;  %v11794_v45 = vld [vmem:[%s12719_s21 + $0x14a4] ss:$16 sps:$4 sm:$0xff]   ;;  %v11797_v46 = vld [vmem:[%s12719_s21 + $0x14ac] ss:$16 sps:$4 sm:$0xff]  }
 0x2da   : > { %7418 = vmatpush1.bf16.msra.mxu0 %v11720_v47  ;;  %8554 = vmatpush1.bf16.msra.mxu1 %v11723_v48  ;;  %v581_v47 = vpack.c.bf16 %v453_v42, %v453_v42  ;;  %v11792_v48 = vld [vmem:[%s12719_s21 + $0x14a0] ss:$16 sps:$4 sm:$0xff]  }
 0x2db   : > { %7419 = vmatprep.subr.bf16.mxu0 %v11728_v49  ;;  %8555 = vmatprep.subr.bf16.mxu1 %v11731_v50  ;;  %v11795_v49 = vld [vmem:[%s12719_s21 + $0x14a8] ss:$16 sps:$4 sm:$0xff]   ;;  %v452_v50 = vld [vmem:[#allocation2 + $0x690] sm:$0x1] }
 0x2de   : > { %7420 = vmatpush1.bf16.msra.mxu0 %v11726_v51  ;;  %8556 = vmatpush1.bf16.msra.mxu1 %v11729_v52  ;;  %v11800_v51 = vld [vmem:[%s12719_s21 + $0x14c4] ss:$16 sps:$4 sm:$0xff]   ;;  %v11803_v52 = vld [vmem:[%s12719_s21 + $0x14cc] ss:$16 sps:$4 sm:$0xff]  }
 0x2df   : > { %7421 = vmatprep.subr.bf16.mxu0 %v11734_v53  ;;  %8557 = vmatprep.subr.bf16.mxu1 %v11737_v54  ;;  %v580_v53 = vpack.c.bf16 %v452_v50, %v452_v50  ;;  %v263_v54 = vld [vmem:[#allocation2 + $0xa8] sm:$0xff] }
 0x2e0   : > { %v391_v50 = vld [vmem:[#allocation2 + $0x4a8] sm:$0xff] }
 0x2e2   : > { %7422 = vmatpush1.bf16.msra.mxu0 %v11732_v55  ;;  %8558 = vmatpush1.bf16.msra.mxu1 %v11735_v56  ;;  %v295_v55 = vld [vmem:[#allocation2 + $0x1a8] sm:$0xff]  ;;  %v11798_v56 = vld [vmem:[%s12719_s21 + $0x14c0] ss:$16 sps:$4 sm:$0xff]  }
 0x2e3   : > { %7423 = vmatprep.subr.bf16.mxu0 %v11740_v57  ;;  %8559 = vmatprep.subr.bf16.mxu1 %v11743_v58  ;;  %v11801_v57 = vld [vmem:[%s12719_s21 + $0x14c8] ss:$16 sps:$4 sm:$0xff]   ;;  %v11806_v58 = vld [vmem:[%s12719_s21 + $0x14e4] ss:$16 sps:$4 sm:$0xff]  }
 0x2e6   : > { %7424 = vmatpush1.bf16.msra.mxu0 %v11738_v59  ;;  %8560 = vmatpush1.bf16.msra.mxu1 %v11741_v60  ;;  %v11809_v59 = vld [vmem:[%s12719_s21 + $0x14ec] ss:$16 sps:$4 sm:$0xff]   ;;  %v487_v60 = vpack.c.bf16 %v295_v55, %v263_v54  ;;  %v11878_v54 = vld [vmem:[%s12719_s21 + $0x1664] ss:$16 sps:$4 sm:$0xff]  }
 0x2e7   : > { %7425 = vmatprep.subr.bf16.mxu0 %v11746_v61  ;;  %8561 = vmatprep.subr.bf16.mxu1 %v11749_v62  ;;  %v11804_v61 = vld [vmem:[%s12719_s21 + $0x14e0] ss:$16 sps:$4 sm:$0xff]   ;;  %v11807_v62 = vld [vmem:[%s12719_s21 + $0x14e8] ss:$16 sps:$4 sm:$0xff]   ;;  %v11881_v55 = vld [vmem:[%s12719_s21 + $0x166c] ss:$16 sps:$4 sm:$0xff]  }
 0x2ea   : > { %7426 = vmatpush1.bf16.msra.mxu0 %v11744_v63  ;;  %8562 = vmatpush1.bf16.msra.mxu1 %v11747_v0  ;;  %v11812_v63 = vld [vmem:[%s12719_s21 + $0x1504] ss:$16 sps:$4 sm:$0xff]   ;;  %v11815_v0 = vld [vmem:[%s12719_s21 + $0x150c] ss:$16 sps:$4 sm:$0xff]  }
 0x2eb   : > { %7427 = vmatprep.subr.bf16.mxu0 %v11752_v1  ;;  %8563 = vmatprep.subr.bf16.mxu1 %v11755_v2  ;;  %v11810_v1 = vld [vmem:[%s12719_s21 + $0x1500] ss:$16 sps:$4 sm:$0xff]   ;;  %v11813_v2 = vld [vmem:[%s12719_s21 + $0x1508] ss:$16 sps:$4 sm:$0xff]  }
 0x2ee   : > { %7428 = vmatpush1.bf16.msra.mxu0 %v11750_v3  ;;  %8564 = vmatpush1.bf16.msra.mxu1 %v11753_v4  ;;  %v11818_v3 = vld [vmem:[%s12719_s21 + $0x1524] ss:$16 sps:$4 sm:$0xff]   ;;  %v11821_v4 = vld [vmem:[%s12719_s21 + $0x152c] ss:$16 sps:$4 sm:$0xff]  }
 0x2ef   : > { %7429 = vmatprep.subr.bf16.mxu0 %v11758_v5  ;;  %8565 = vmatprep.subr.bf16.mxu1 %v11761_v6  ;;  %v11816_v5 = vld [vmem:[%s12719_s21 + $0x1520] ss:$16 sps:$4 sm:$0xff]   ;;  %v11819_v6 = vld [vmem:[%s12719_s21 + $0x1528] ss:$16 sps:$4 sm:$0xff]  }
 0x2f2   : > { %7430 = vmatpush1.bf16.msra.mxu0 %v11756_v7  ;;  %8566 = vmatpush1.bf16.msra.mxu1 %v11759_v8  ;;  %v11824_v7 = vld [vmem:[%s12719_s21 + $0x1544] ss:$16 sps:$4 sm:$0xff]   ;;  %v11827_v8 = vld [vmem:[%s12719_s21 + $0x154c] ss:$16 sps:$4 sm:$0xff]  }
 0x2f3   : > { %7470 = vmatprep.subr.bf16.mxu0 %v11764_v9  ;;  %8606 = vmatprep.subr.bf16.mxu1 %v11767_v10  ;;  %v11822_v9 = vld [vmem:[%s12719_s21 + $0x1540] ss:$16 sps:$4 sm:$0xff]   ;;  %v11825_v10 = vld [vmem:[%s12719_s21 + $0x1548] ss:$16 sps:$4 sm:$0xff]  }
 0x2f5   : > { %7432 = vmatmul.mubr.bf16.vlgmr.msra.gmra.mrb[0].mxu0 %v484_v15  ;;  %8568 = vmatmul.mubr.bf16.vlgmr.msra.gmra.mrb[0].mxu1 %v484_v15  ;;  %v11836_v15 = vld [vmem:[%s12719_s21 + $0x1584] ss:$16 sps:$4 sm:$0xff]  }
 0x2f6   : > { %7471 = vmatpush1.bf16.msra.mxu0 %v11762_v16  ;;  %8607 = vmatpush1.bf16.msra.mxu1 %v11765_v17  ;;  %v11839_v16 = vld [vmem:[%s12719_s21 + $0x158c] ss:$16 sps:$4 sm:$0xff]   ;;  %v11834_v17 = vld [vmem:[%s12719_s21 + $0x1580] ss:$16 sps:$4 sm:$0xff]  }
 0x2f7   : > { %7472 = vmatprep.subr.bf16.mxu0 %v11770_v18  ;;  %8608 = vmatprep.subr.bf16.mxu1 %v11773_v19  ;;  %v11837_v18 = vld [vmem:[%s12719_s21 + $0x1588] ss:$16 sps:$4 sm:$0xff]   ;;  %v11842_v19 = vld [vmem:[%s12719_s21 + $0x15a4] ss:$16 sps:$4 sm:$0xff]  }
 0x2f8   : > { %7441 = vmatprep.mubr.bf16.mxu0 %v517_v22  ;;  %8577 = vmatprep.mubr.bf16.mxu1 %v517_v22  ;;  %v11843_v22 = vld [vmem:[%s12719_s21 + $0x15a8] ss:$16 sps:$4 sm:$0xff]  }
 0x2fa   : > { %7473 = vmatpush1.bf16.msra.mxu0 %v11768_v20  ;;  %8609 = vmatpush1.bf16.msra.mxu1 %v11771_v21  ;;  %v11845_v20 = vld [vmem:[%s12719_s21 + $0x15ac] ss:$16 sps:$4 sm:$0xff]   ;;  %v11840_v21 = vld [vmem:[%s12719_s21 + $0x15a0] ss:$16 sps:$4 sm:$0xff]  }
 0x2fb   : > { %7474 = vmatprep.subr.bf16.mxu0 %v11776_v23  ;;  %8610 = vmatprep.subr.bf16.mxu1 %v11779_v24  ;;  %v11848_v23 = vld [vmem:[%s12719_s21 + $0x15c4] ss:$16 sps:$4 sm:$0xff]   ;;  %v11851_v24 = vld [vmem:[%s12719_s21 + $0x15cc] ss:$16 sps:$4 sm:$0xff]  }
 0x2fd   : > { %7442 = vmatmul.mubr.bf16.gmra.mrb[4].mxu0 %v516_v29  ;;  %8578 = vmatmul.mubr.bf16.gmra.mrb[4].mxu1 %v516_v29  ;;  %v11852_v29 = vld [vmem:[%s12719_s21 + $0x15e0] ss:$16 sps:$4 sm:$0xff]  }
 0x2fe   : > { %7475 = vmatpush1.bf16.msra.mxu0 %v11774_v30  ;;  %8611 = vmatpush1.bf16.msra.mxu1 %v11777_v31  ;;  %v11855_v30 = vld [vmem:[%s12719_s21 + $0x15e8] ss:$16 sps:$4 sm:$0xff]   ;;  %v262_v31 = vld [vmem:[#allocation2 + $0xa0] sm:$0xff] }
 0x2ff   : > { %7476 = vmatprep.subr.bf16.mxu0 %v11782_v32  ;;  %8612 = vmatprep.subr.bf16.mxu1 %v11785_v33  ;;  %v294_v32 = vld [vmem:[#allocation2 + $0x1a0] sm:$0xff] }
 0x300   : > { %7451 = vmatprep.mubr.bf16.mxu0 %v549_v36  ;;  %8587 = vmatprep.mubr.bf16.mxu1 %v549_v36  ;;  %v11860_v33 = vld [vmem:[%s12719_s21 + $0x1604] ss:$16 sps:$4 sm:$0xff]   ;;  %v327_v36 = vld [vmem:[#allocation2 + $0x2a8] sm:$0xff] }
 0x301   : > { %v519_v42 = vpack.c.bf16 %v359_v37, %v327_v36  ;;  %v11927_v36 = vld [vmem:[%s12719_s21 + $0x1768] ss:$16 sps:$4 sm:$0xff]   ;;  %v11932_v37 = vld [vmem:[%s12719_s21 + $0x1784] ss:$16 sps:$4 sm:$0xff]  }
 0x302   : > { %7477 = vmatpush1.bf16.msra.mxu0 %v11780_v34  ;;  %8613 = vmatpush1.bf16.msra.mxu1 %v11783_v35  ;;  %v11863_v34 = vld [vmem:[%s12719_s21 + $0x160c] ss:$16 sps:$4 sm:$0xff]   ;;  %v486_v35 = vpack.c.bf16 %v294_v32, %v262_v31  ;;  %v11918_v31 = vld [vmem:[%s12719_s21 + $0x1740] ss:$16 sps:$4 sm:$0xff]   ;;  %v11921_v32 = vld [vmem:[%s12719_s21 + $0x1748] ss:$16 sps:$4 sm:$0xff]  }
 0x303   : > { %7478 = vmatprep.subr.bf16.mxu0 %v11788_v39  ;;  %8614 = vmatprep.subr.bf16.mxu1 %v11791_v40  ;;  %v11861_v39 = vld [vmem:[%s12719_s21 + $0x1608] ss:$16 sps:$4 sm:$0xff]   ;;  %v11866_v40 = vld [vmem:[%s12719_s21 + $0x1624] ss:$16 sps:$4 sm:$0xff]  }
 0x305   : > { %7452 = vmatmul.mubr.bf16.gmra.mrb[8].mxu0 %v548_v41  ;;  %8588 = vmatmul.mubr.bf16.gmra.mrb[8].mxu1 %v548_v41  ;;  %v11869_v41 = vld [vmem:[%s12719_s21 + $0x162c] ss:$16 sps:$4 sm:$0xff]  }
 0x306   : > { %7479 = vmatpush1.bf16.msra.mxu0 %v11786_v43  ;;  %8615 = vmatpush1.bf16.msra.mxu1 %v11789_v44  ;;  %v11864_v43 = vld [vmem:[%s12719_s21 + $0x1620] ss:$16 sps:$4 sm:$0xff]   ;;  %v11867_v44 = vld [vmem:[%s12719_s21 + $0x1628] ss:$16 sps:$4 sm:$0xff]  }
 0x307   : > { %7480 = vmatprep.subr.bf16.mxu0 %v11794_v45  ;;  %8616 = vmatprep.subr.bf16.mxu1 %v11797_v46  ;;  %v326_v45 = vld [vmem:[#allocation2 + $0x2a0] sm:$0xff] }
 0x308   : > { %7461 = vmatprep.mubr.bf16.mxu0 %v581_v47  ;;  %8597 = vmatprep.mubr.bf16.mxu1 %v581_v47  ;;  %v358_v46 = vld [vmem:[#allocation2 + $0x3a0] sm:$0xff] }
 0x309   : > { %v11872_v47 = vld [vmem:[%s12719_s21 + $0x1644] ss:$16 sps:$4 sm:$0xff]  }
 0x30a   : > { %7481 = vmatpush1.bf16.msra.mxu0 %v11792_v48  ;;  %8617 = vmatpush1.bf16.msra.mxu1 %v11795_v49  ;;  %v11875_v48 = vld [vmem:[%s12719_s21 + $0x164c] ss:$16 sps:$4 sm:$0xff]   ;;  %v518_v49 = vpack.c.bf16 %v358_v46, %v326_v45  ;;  %v11944_v45 = vld [vmem:[%s12719_s21 + $0x17c4] ss:$16 sps:$4 sm:$0xff]  }
 0x30b   : > { %7482 = vmatprep.subr.bf16.mxu0 %v11800_v51  ;;  %8618 = vmatprep.subr.bf16.mxu1 %v11803_v52  ;;  %v423_v51 = vld [vmem:[#allocation2 + $0x5a8] sm:$0xff]  ;;  %v11870_v52 = vld [vmem:[%s12719_s21 + $0x1640] ss:$16 sps:$4 sm:$0xff]  }
 0x30c   : > { %v11947_v46 = vld [vmem:[%s12719_s21 + $0x17cc] ss:$16 sps:$4 sm:$0xff]  }
 0x30d   : > { %7462 = vmatmul.mubr.bf16.gmra.mrb[12].mxu0 %v580_v53  ;;  %8598 = vmatmul.mubr.bf16.gmra.mrb[12].mxu1 %v580_v53  ;;  %v11873_v53 = vld [vmem:[%s12719_s21 + $0x1648] ss:$16 sps:$4 sm:$0xff]  }
 0x30e   : > { %7483 = vmatpush1.bf16.msra.mxu0 %v11798_v56  ;;  %8619 = vmatpush1.bf16.msra.mxu1 %v11801_v57  ;;  %v551_v56 = vpack.c.bf16 %v423_v51, %v391_v50  ;;  %v11876_v57 = vld [vmem:[%s12719_s21 + $0x1660] ss:$16 sps:$4 sm:$0xff]   ;;  %v11953_v50 = vld [vmem:[%s12719_s21 + $0x17ec] ss:$16 sps:$4 sm:$0xff]  }
 0x30f   : > { %7484 = vmatprep.subr.bf16.mxu0 %v11806_v58  ;;  %8620 = vmatprep.subr.bf16.mxu1 %v11809_v59  ;;  %v11879_v58 = vld [vmem:[%s12719_s21 + $0x1668] ss:$16 sps:$4 sm:$0xff]   ;;  %v390_v59 = vld [vmem:[#allocation2 + $0x4a0] sm:$0xff] }
 0x310   : > { %7502 = vmatprep.mubr.bf16.mxu0 %v487_v60  ;;  %8638 = vmatprep.mubr.bf16.mxu1 %v487_v60  ;;  %v422_v60 = vld [vmem:[#allocation2 + $0x5a0] sm:$0xff] }
 0x311   : > { %v11948_v51 = vld [vmem:[%s12719_s21 + $0x17e0] ss:$16 sps:$4 sm:$0xff]  }
 0x312   : > { %7485 = vmatpush1.bf16.msra.mxu0 %v11804_v61  ;;  %8621 = vmatpush1.bf16.msra.mxu1 %v11807_v62  ;;  %v11884_v61 = vld [vmem:[%s12719_s21 + $0x1684] ss:$16 sps:$4 sm:$0xff]   ;;  %v11887_v62 = vld [vmem:[%s12719_s21 + $0x168c] ss:$16 sps:$4 sm:$0xff]  }
 0x313   : > { %7486 = vmatprep.subr.bf16.mxu0 %v11812_v63  ;;  %8622 = vmatprep.subr.bf16.mxu1 %v11815_v0  ;;  %v550_v63 = vpack.c.bf16 %v422_v60, %v390_v59  ;;  %v455_v0 = vld [vmem:[#allocation2 + $0x6a8] sm:$0x1]  ;;  %v361_v59 = vld [vmem:[#allocation2 + $0x3b8] sm:$0xff]  ;;  %v11954_v60 = vld [vmem:[%s12719_s21 + $0x1800] ss:$16 sps:$4 sm:$0xff]  }
 0x316   : > { %7487 = vmatpush1.bf16.msra.mxu0 %v11810_v1  ;;  %8623 = vmatpush1.bf16.msra.mxu1 %v11813_v2  ;;  %v11882_v1 = vld [vmem:[%s12719_s21 + $0x1680] ss:$16 sps:$4 sm:$0xff]   ;;  %v11885_v2 = vld [vmem:[%s12719_s21 + $0x1688] ss:$16 sps:$4 sm:$0xff]  }
 0x317   : > { %7488 = vmatprep.subr.bf16.mxu0 %v11818_v3  ;;  %8624 = vmatprep.subr.bf16.mxu1 %v11821_v4  ;;  %v11890_v3 = vld [vmem:[%s12719_s21 + $0x16a4] ss:$16 sps:$4 sm:$0xff]   ;;  %v11893_v4 = vld [vmem:[%s12719_s21 + $0x16ac] ss:$16 sps:$4 sm:$0xff]  }
 0x31a   : > { %7489 = vmatpush1.bf16.msra.mxu0 %v11816_v5  ;;  %8625 = vmatpush1.bf16.msra.mxu1 %v11819_v6  ;;  %v583_v5 = vpack.c.bf16 %v455_v0, %v455_v0  ;;  %v11888_v6 = vld [vmem:[%s12719_s21 + $0x16a0] ss:$16 sps:$4 sm:$0xff]  }
 0x31b   : > { %7490 = vmatprep.subr.bf16.mxu0 %v11824_v7  ;;  %8626 = vmatprep.subr.bf16.mxu1 %v11827_v8  ;;  %v11891_v7 = vld [vmem:[%s12719_s21 + $0x16a8] ss:$16 sps:$4 sm:$0xff]   ;;  %v454_v8 = vld [vmem:[#allocation2 + $0x6a0] sm:$0x1] }
 0x31e   : > { %7491 = vmatpush1.bf16.msra.mxu0 %v11822_v9  ;;  %8627 = vmatpush1.bf16.msra.mxu1 %v11825_v10  ;;  %v11896_v9 = vld [vmem:[%s12719_s21 + $0x16c4] ss:$16 sps:$4 sm:$0xff]   ;;  %v11899_v10 = vld [vmem:[%s12719_s21 + $0x16cc] ss:$16 sps:$4 sm:$0xff]  }
 0x31f   : > { %7492 = vmatprep.subr.bf16.mxu0 %v11830_v11  ;;  %8628 = vmatprep.subr.bf16.mxu1 %v11833_v12  ;;  %v582_v11 = vpack.c.bf16 %v454_v8, %v454_v8  ;;  %v265_v12 = vld [vmem:[#allocation2 + $0xb8] sm:$0xff] }
 0x320   : > { %v393_v8 = vld [vmem:[#allocation2 + $0x4b8] sm:$0xff] }
 0x322   : > { %7493 = vmatpush1.bf16.msra.mxu0 %v11828_v13  ;;  %8629 = vmatpush1.bf16.msra.mxu1 %v11831_v14  ;;  %v297_v13 = vld [vmem:[#allocation2 + $0x1b8] sm:$0xff]  ;;  %v11894_v14 = vld [vmem:[%s12719_s21 + $0x16c0] ss:$16 sps:$4 sm:$0xff]  }
 0x323   : > { %7494 = vmatprep.subr.bf16.mxu0 %v11836_v15  ;;  %8630 = vmatprep.subr.bf16.mxu1 %v11839_v16  ;;  %v11897_v15 = vld [vmem:[%s12719_s21 + $0x16c8] ss:$16 sps:$4 sm:$0xff]   ;;  %v11902_v16 = vld [vmem:[%s12719_s21 + $0x16e4] ss:$16 sps:$4 sm:$0xff]  }
 0x326   : > { %7495 = vmatpush1.bf16.msra.mxu0 %v11834_v17  ;;  %8631 = vmatpush1.bf16.msra.mxu1 %v11837_v18  ;;  %v11905_v17 = vld [vmem:[%s12719_s21 + $0x16ec] ss:$16 sps:$4 sm:$0xff]   ;;  %v489_v18 = vpack.c.bf16 %v297_v13, %v265_v12  ;;  %v11974_v12 = vld [vmem:[%s12719_s21 + $0x1864] ss:$16 sps:$4 sm:$0xff]  }
 0x327   : > { %7496 = vmatprep.subr.bf16.mxu0 %v11842_v19  ;;  %8632 = vmatprep.subr.bf16.mxu1 %v11845_v20  ;;  %v11900_v19 = vld [vmem:[%s12719_s21 + $0x16e0] ss:$16 sps:$4 sm:$0xff]   ;;  %v11903_v20 = vld [vmem:[%s12719_s21 + $0x16e8] ss:$16 sps:$4 sm:$0xff]   ;;  %v11977_v13 = vld [vmem:[%s12719_s21 + $0x186c] ss:$16 sps:$4 sm:$0xff]  }
 0x32a   : > { %7497 = vmatpush1.bf16.msra.mxu0 %v11840_v21  ;;  %8633 = vmatpush1.bf16.msra.mxu1 %v11843_v22  ;;  %v11908_v21 = vld [vmem:[%s12719_s21 + $0x1704] ss:$16 sps:$4 sm:$0xff]   ;;  %v11911_v22 = vld [vmem:[%s12719_s21 + $0x170c] ss:$16 sps:$4 sm:$0xff]  }
 0x32b   : > { %7498 = vmatprep.subr.bf16.mxu0 %v11848_v23  ;;  %8634 = vmatprep.subr.bf16.mxu1 %v11851_v24  ;;  %v11906_v23 = vld [vmem:[%s12719_s21 + $0x1700] ss:$16 sps:$4 sm:$0xff]   ;;  %v11909_v24 = vld [vmem:[%s12719_s21 + $0x1708] ss:$16 sps:$4 sm:$0xff]  }
 0x32e   : > { %7499 = vmatpush1.bf16.msra.mxu0 %v11846_v25  ;;  %8635 = vmatpush1.bf16.msra.mxu1 %v11849_v26  ;;  %v11914_v25 = vld [vmem:[%s12719_s21 + $0x1724] ss:$16 sps:$4 sm:$0xff]   ;;  %v11917_v26 = vld [vmem:[%s12719_s21 + $0x172c] ss:$16 sps:$4 sm:$0xff]  }
 0x32f   : > { %7500 = vmatprep.subr.bf16.mxu0 %v11854_v27  ;;  %8636 = vmatprep.subr.bf16.mxu1 %v11857_v28  ;;  %v11912_v27 = vld [vmem:[%s12719_s21 + $0x1720] ss:$16 sps:$4 sm:$0xff]   ;;  %v11915_v28 = vld [vmem:[%s12719_s21 + $0x1728] ss:$16 sps:$4 sm:$0xff]  }
 0x332   : > { %7501 = vmatpush1.bf16.msra.mxu0 %v11852_v29  ;;  %8637 = vmatpush1.bf16.msra.mxu1 %v11855_v30  ;;  %v11920_v29 = vld [vmem:[%s12719_s21 + $0x1744] ss:$16 sps:$4 sm:$0xff]   ;;  %v11923_v30 = vld [vmem:[%s12719_s21 + $0x174c] ss:$16 sps:$4 sm:$0xff]  }
 0x333   : > { %7541 = vmatprep.subr.bf16.mxu0 %v11860_v33  ;;  %8677 = vmatprep.subr.bf16.mxu1 %v11863_v34  ;;  %v11926_v33 = vld [vmem:[%s12719_s21 + $0x1764] ss:$16 sps:$4 sm:$0xff]   ;;  %v11929_v34 = vld [vmem:[%s12719_s21 + $0x176c] ss:$16 sps:$4 sm:$0xff]  }
 0x335   : > { %7503 = vmatmul.mubr.bf16.vlgmr.msra.gmra.mrb[0].mxu0 %v486_v35  ;;  %8639 = vmatmul.mubr.bf16.vlgmr.msra.gmra.mrb[0].mxu1 %v486_v35  ;;  %v11924_v35 = vld [vmem:[%s12719_s21 + $0x1760] ss:$16 sps:$4 sm:$0xff]  }
 0x336   : > { %7542 = vmatpush1.bf16.msra.mxu0 %v11858_v38  ;;  %8678 = vmatpush1.bf16.msra.mxu1 %v11861_v39  ;;  %v11935_v38 = vld [vmem:[%s12719_s21 + $0x178c] ss:$16 sps:$4 sm:$0xff]   ;;  %v11930_v39 = vld [vmem:[%s12719_s21 + $0x1780] ss:$16 sps:$4 sm:$0xff]  }
 0x337   : > { %7543 = vmatprep.subr.bf16.mxu0 %v11866_v40  ;;  %8679 = vmatprep.subr.bf16.mxu1 %v11869_v41  ;;  %v11933_v40 = vld [vmem:[%s12719_s21 + $0x1788] ss:$16 sps:$4 sm:$0xff]   ;;  %v11938_v41 = vld [vmem:[%s12719_s21 + $0x17a4] ss:$16 sps:$4 sm:$0xff]  }
 0x338   : > { %7512 = vmatprep.mubr.bf16.mxu0 %v519_v42  ;;  %8648 = vmatprep.mubr.bf16.mxu1 %v519_v42  ;;  %v11941_v42 = vld [vmem:[%s12719_s21 + $0x17ac] ss:$16 sps:$4 sm:$0xff]  }
 0x33a   : > { %7544 = vmatpush1.bf16.msra.mxu0 %v11864_v43  ;;  %8680 = vmatpush1.bf16.msra.mxu1 %v11867_v44  ;;  %v11936_v43 = vld [vmem:[%s12719_s21 + $0x17a0] ss:$16 sps:$4 sm:$0xff]   ;;  %v11939_v44 = vld [vmem:[%s12719_s21 + $0x17a8] ss:$16 sps:$4 sm:$0xff]  }
 0x33b   : > { %7545 = vmatprep.subr.bf16.mxu0 %v11872_v47  ;;  %8681 = vmatprep.subr.bf16.mxu1 %v11875_v48  ;;  %v11942_v47 = vld [vmem:[%s12719_s21 + $0x17c0] ss:$16 sps:$4 sm:$0xff]   ;;  %v11945_v48 = vld [vmem:[%s12719_s21 + $0x17c8] ss:$16 sps:$4 sm:$0xff]  }
 0x33d   : > { %7513 = vmatmul.mubr.bf16.gmra.mrb[4].mxu0 %v518_v49  ;;  %8649 = vmatmul.mubr.bf16.gmra.mrb[4].mxu1 %v518_v49  ;;  %v11950_v49 = vld [vmem:[%s12719_s21 + $0x17e4] ss:$16 sps:$4 sm:$0xff]  }
 0x33e   : > { %7546 = vmatpush1.bf16.msra.mxu0 %v11870_v52  ;;  %8682 = vmatpush1.bf16.msra.mxu1 %v11873_v53  ;;  %v11951_v52 = vld [vmem:[%s12719_s21 + $0x17e8] ss:$16 sps:$4 sm:$0xff]   ;;  %v264_v53 = vld [vmem:[#allocation2 + $0xb0] sm:$0xff] }
 0x33f   : > { %7547 = vmatprep.subr.bf16.mxu0 %v11878_v54  ;;  %8683 = vmatprep.subr.bf16.mxu1 %v11881_v55  ;;  %v296_v54 = vld [vmem:[#allocation2 + $0x1b0] sm:$0xff] }
 0x340   : > { %7522 = vmatprep.mubr.bf16.mxu0 %v551_v56  ;;  %8658 = vmatprep.mubr.bf16.mxu1 %v551_v56  ;;  %v11956_v55 = vld [vmem:[%s12719_s21 + $0x1804] ss:$16 sps:$4 sm:$0xff]   ;;  %v11959_v56 = vld [vmem:[%s12719_s21 + $0x180c] ss:$16 sps:$4 sm:$0xff]  }
 0x342   : > { %7548 = vmatpush1.bf16.msra.mxu0 %v11876_v57  ;;  %8684 = vmatpush1.bf16.msra.mxu1 %v11879_v58  ;;  %v488_v57 = vpack.c.bf16 %v296_v54, %v264_v53  ;;  %v329_v58 = vld [vmem:[#allocation2 + $0x2b8] sm:$0xff]  ;;  %v12014_v53 = vld [vmem:[%s12719_s21 + $0x1940] ss:$16 sps:$4 sm:$0xff]  }
 0x343   : > { %7549 = vmatprep.subr.bf16.mxu0 %v11884_v61  ;;  %8685 = vmatprep.subr.bf16.mxu1 %v11887_v62  ;;  %v11957_v61 = vld [vmem:[%s12719_s21 + $0x1808] ss:$16 sps:$4 sm:$0xff]   ;;  %v11962_v62 = vld [vmem:[%s12719_s21 + $0x1824] ss:$16 sps:$4 sm:$0xff]   ;;  %v521_v0 = vpack.c.bf16 %v361_v59, %v329_v58 }
 0x344   : > { %v12017_v54 = vld [vmem:[%s12719_s21 + $0x1948] ss:$16 sps:$4 sm:$0xff]   ;;  %v12028_v59 = vld [vmem:[%s12719_s21 + $0x1984] ss:$16 sps:$4 sm:$0xff]  }
 0x345   : > { %7523 = vmatmul.mubr.bf16.gmra.mrb[8].mxu0 %v550_v63  ;;  %8659 = vmatmul.mubr.bf16.gmra.mrb[8].mxu1 %v550_v63  ;;  %v11965_v63 = vld [vmem:[%s12719_s21 + $0x182c] ss:$16 sps:$4 sm:$0xff]   ;;  %v12023_v58 = vld [vmem:[%s12719_s21 + $0x1968] ss:$16 sps:$4 sm:$0xff]  }
 0x346   : > { %7550 = vmatpush1.bf16.msra.mxu0 %v11882_v1  ;;  %8686 = vmatpush1.bf16.msra.mxu1 %v11885_v2  ;;  %v11960_v1 = vld [vmem:[%s12719_s21 + $0x1820] ss:$16 sps:$4 sm:$0xff]   ;;  %v11963_v2 = vld [vmem:[%s12719_s21 + $0x1828] ss:$16 sps:$4 sm:$0xff]  }
 0x347   : > { %7551 = vmatprep.subr.bf16.mxu0 %v11890_v3  ;;  %8687 = vmatprep.subr.bf16.mxu1 %v11893_v4  ;;  %v328_v3 = vld [vmem:[#allocation2 + $0x2b0] sm:$0xff] }
 0x348   : > { %7532 = vmatprep.mubr.bf16.mxu0 %v583_v5  ;;  %8668 = vmatprep.mubr.bf16.mxu1 %v583_v5  ;;  %v360_v4 = vld [vmem:[#allocation2 + $0x3b0] sm:$0xff] }
 0x349   : > { %v11968_v5 = vld [vmem:[%s12719_s21 + $0x1844] ss:$16 sps:$4 sm:$0xff]  }
 0x34a   : > { %7552 = vmatpush1.bf16.msra.mxu0 %v11888_v6  ;;  %8688 = vmatpush1.bf16.msra.mxu1 %v11891_v7  ;;  %v11971_v6 = vld [vmem:[%s12719_s21 + $0x184c] ss:$16 sps:$4 sm:$0xff]   ;;  %v520_v7 = vpack.c.bf16 %v360_v4, %v328_v3  ;;  %v12040_v3 = vld [vmem:[%s12719_s21 + $0x19c4] ss:$16 sps:$4 sm:$0xff]  }
 0x34b   : > { %7553 = vmatprep.subr.bf16.mxu0 %v11896_v9  ;;  %8689 = vmatprep.subr.bf16.mxu1 %v11899_v10  ;;  %v425_v9 = vld [vmem:[#allocation2 + $0x5b8] sm:$0xff]  ;;  %v11966_v10 = vld [vmem:[%s12719_s21 + $0x1840] ss:$16 sps:$4 sm:$0xff]  }
 0x34c   : > { %v12043_v4 = vld [vmem:[%s12719_s21 + $0x19cc] ss:$16 sps:$4 sm:$0xff]  }
 0x34d   : > { %7533 = vmatmul.mubr.bf16.gmra.mrb[12].mxu0 %v582_v11  ;;  %8669 = vmatmul.mubr.bf16.gmra.mrb[12].mxu1 %v582_v11  ;;  %v11969_v11 = vld [vmem:[%s12719_s21 + $0x1848] ss:$16 sps:$4 sm:$0xff]  }
 0x34e   : > { %7554 = vmatpush1.bf16.msra.mxu0 %v11894_v14  ;;  %8690 = vmatpush1.bf16.msra.mxu1 %v11897_v15  ;;  %v553_v14 = vpack.c.bf16 %v425_v9, %v393_v8  ;;  %v11972_v15 = vld [vmem:[%s12719_s21 + $0x1860] ss:$16 sps:$4 sm:$0xff]   ;;  %v12049_v8 = vld [vmem:[%s12719_s21 + $0x19ec] ss:$16 sps:$4 sm:$0xff]  }
 0x34f   : > { %7555 = vmatprep.subr.bf16.mxu0 %v11902_v16  ;;  %8691 = vmatprep.subr.bf16.mxu1 %v11905_v17  ;;  %v11975_v16 = vld [vmem:[%s12719_s21 + $0x1868] ss:$16 sps:$4 sm:$0xff]   ;;  %v392_v17 = vld [vmem:[#allocation2 + $0x4b0] sm:$0xff] }
 0x350   : > { %7573 = vmatprep.mubr.bf16.mxu0 %v489_v18  ;;  %8709 = vmatprep.mubr.bf16.mxu1 %v489_v18  ;;  %v424_v18 = vld [vmem:[#allocation2 + $0x5b0] sm:$0xff] }
 0x351   : > { %v12044_v9 = vld [vmem:[%s12719_s21 + $0x19e0] ss:$16 sps:$4 sm:$0xff]  }
 0x352   : > { %7556 = vmatpush1.bf16.msra.mxu0 %v11900_v19  ;;  %8692 = vmatpush1.bf16.msra.mxu1 %v11903_v20  ;;  %v11980_v19 = vld [vmem:[%s12719_s21 + $0x1884] ss:$16 sps:$4 sm:$0xff]   ;;  %v11983_v20 = vld [vmem:[%s12719_s21 + $0x188c] ss:$16 sps:$4 sm:$0xff]  }
 0x353   : > { %7557 = vmatprep.subr.bf16.mxu0 %v11908_v21  ;;  %8693 = vmatprep.subr.bf16.mxu1 %v11911_v22  ;;  %v552_v21 = vpack.c.bf16 %v424_v18, %v392_v17  ;;  %v457_v22 = vld [vmem:[#allocation2 + $0x6b8] sm:$0x1]  ;;  %v363_v17 = vld [vmem:[#allocation2 + $0x3c8] sm:$0xff]  ;;  %v12050_v18 = vld [vmem:[%s12719_s21 + $0x1a00] ss:$16 sps:$4 sm:$0xff]  }
 0x356   : > { %7558 = vmatpush1.bf16.msra.mxu0 %v11906_v23  ;;  %8694 = vmatpush1.bf16.msra.mxu1 %v11909_v24  ;;  %v11978_v23 = vld [vmem:[%s12719_s21 + $0x1880] ss:$16 sps:$4 sm:$0xff]   ;;  %v11981_v24 = vld [vmem:[%s12719_s21 + $0x1888] ss:$16 sps:$4 sm:$0xff]  }
 0x357   : > { %7559 = vmatprep.subr.bf16.mxu0 %v11914_v25  ;;  %8695 = vmatprep.subr.bf16.mxu1 %v11917_v26  ;;  %v11986_v25 = vld [vmem:[%s12719_s21 + $0x18a4] ss:$16 sps:$4 sm:$0xff]   ;;  %v11989_v26 = vld [vmem:[%s12719_s21 + $0x18ac] ss:$16 sps:$4 sm:$0xff]  }
 0x35a   : > { %7560 = vmatpush1.bf16.msra.mxu0 %v11912_v27  ;;  %8696 = vmatpush1.bf16.msra.mxu1 %v11915_v28  ;;  %v585_v27 = vpack.c.bf16 %v457_v22, %v457_v22  ;;  %v11984_v28 = vld [vmem:[%s12719_s21 + $0x18a0] ss:$16 sps:$4 sm:$0xff]  }
 0x35b   : > { %7561 = vmatprep.subr.bf16.mxu0 %v11920_v29  ;;  %8697 = vmatprep.subr.bf16.mxu1 %v11923_v30  ;;  %v11987_v29 = vld [vmem:[%s12719_s21 + $0x18a8] ss:$16 sps:$4 sm:$0xff]   ;;  %v456_v30 = vld [vmem:[#allocation2 + $0x6b0] sm:$0x1] }
 0x35e   : > { %7562 = vmatpush1.bf16.msra.mxu0 %v11918_v31  ;;  %8698 = vmatpush1.bf16.msra.mxu1 %v11921_v32  ;;  %v11992_v31 = vld [vmem:[%s12719_s21 + $0x18c4] ss:$16 sps:$4 sm:$0xff]   ;;  %v11995_v32 = vld [vmem:[%s12719_s21 + $0x18cc] ss:$16 sps:$4 sm:$0xff]  }
 0x35f   : > { %7563 = vmatprep.subr.bf16.mxu0 %v11926_v33  ;;  %8699 = vmatprep.subr.bf16.mxu1 %v11929_v34  ;;  %v584_v33 = vpack.c.bf16 %v456_v30, %v456_v30  ;;  %v267_v34 = vld [vmem:[#allocation2 + $0xc8] sm:$0xff] }
 0x360   : > { %v395_v30 = vld [vmem:[#allocation2 + $0x4c8] sm:$0xff] }
 0x362   : > { %7564 = vmatpush1.bf16.msra.mxu0 %v11924_v35  ;;  %8700 = vmatpush1.bf16.msra.mxu1 %v11927_v36  ;;  %v299_v35 = vld [vmem:[#allocation2 + $0x1c8] sm:$0xff]  ;;  %v11990_v36 = vld [vmem:[%s12719_s21 + $0x18c0] ss:$16 sps:$4 sm:$0xff]  }
 0x363   : > { %7565 = vmatprep.subr.bf16.mxu0 %v11932_v37  ;;  %8701 = vmatprep.subr.bf16.mxu1 %v11935_v38  ;;  %v11993_v37 = vld [vmem:[%s12719_s21 + $0x18c8] ss:$16 sps:$4 sm:$0xff]   ;;  %v11998_v38 = vld [vmem:[%s12719_s21 + $0x18e4] ss:$16 sps:$4 sm:$0xff]  }
 0x366   : > { %7566 = vmatpush1.bf16.msra.mxu0 %v11930_v39  ;;  %8702 = vmatpush1.bf16.msra.mxu1 %v11933_v40  ;;  %v12001_v39 = vld [vmem:[%s12719_s21 + $0x18ec] ss:$16 sps:$4 sm:$0xff]   ;;  %v491_v40 = vpack.c.bf16 %v299_v35, %v267_v34  ;;  %v12070_v34 = vld [vmem:[%s12719_s21 + $0x1a64] ss:$16 sps:$4 sm:$0xff]  }
 0x367   : > { %7567 = vmatprep.subr.bf16.mxu0 %v11938_v41  ;;  %8703 = vmatprep.subr.bf16.mxu1 %v11941_v42  ;;  %v11996_v41 = vld [vmem:[%s12719_s21 + $0x18e0] ss:$16 sps:$4 sm:$0xff]   ;;  %v11999_v42 = vld [vmem:[%s12719_s21 + $0x18e8] ss:$16 sps:$4 sm:$0xff]   ;;  %v12073_v35 = vld [vmem:[%s12719_s21 + $0x1a6c] ss:$16 sps:$4 sm:$0xff]  }
 0x36a   : > { %7568 = vmatpush1.bf16.msra.mxu0 %v11936_v43  ;;  %8704 = vmatpush1.bf16.msra.mxu1 %v11939_v44  ;;  %v12004_v43 = vld [vmem:[%s12719_s21 + $0x1904] ss:$16 sps:$4 sm:$0xff]   ;;  %v12007_v44 = vld [vmem:[%s12719_s21 + $0x190c] ss:$16 sps:$4 sm:$0xff]  }
 0x36b   : > { %7569 = vmatprep.subr.bf16.mxu0 %v11944_v45  ;;  %8705 = vmatprep.subr.bf16.mxu1 %v11947_v46  ;;  %v12002_v45 = vld [vmem:[%s12719_s21 + $0x1900] ss:$16 sps:$4 sm:$0xff]   ;;  %v12005_v46 = vld [vmem:[%s12719_s21 + $0x1908] ss:$16 sps:$4 sm:$0xff]  }
 0x36e   : > { %7570 = vmatpush1.bf16.msra.mxu0 %v11942_v47  ;;  %8706 = vmatpush1.bf16.msra.mxu1 %v11945_v48  ;;  %v12010_v47 = vld [vmem:[%s12719_s21 + $0x1924] ss:$16 sps:$4 sm:$0xff]   ;;  %v12013_v48 = vld [vmem:[%s12719_s21 + $0x192c] ss:$16 sps:$4 sm:$0xff]  }
 0x36f   : > { %7571 = vmatprep.subr.bf16.mxu0 %v11950_v49  ;;  %8707 = vmatprep.subr.bf16.mxu1 %v11953_v50  ;;  %v12008_v49 = vld [vmem:[%s12719_s21 + $0x1920] ss:$16 sps:$4 sm:$0xff]   ;;  %v12011_v50 = vld [vmem:[%s12719_s21 + $0x1928] ss:$16 sps:$4 sm:$0xff]  }
 0x372   : > { %7572 = vmatpush1.bf16.msra.mxu0 %v11948_v51  ;;  %8708 = vmatpush1.bf16.msra.mxu1 %v11951_v52  ;;  %v12016_v51 = vld [vmem:[%s12719_s21 + $0x1944] ss:$16 sps:$4 sm:$0xff]   ;;  %v12019_v52 = vld [vmem:[%s12719_s21 + $0x194c] ss:$16 sps:$4 sm:$0xff]  }
 0x373   : > { %7612 = vmatprep.subr.bf16.mxu0 %v11956_v55  ;;  %8748 = vmatprep.subr.bf16.mxu1 %v11959_v56  ;;  %v12022_v55 = vld [vmem:[%s12719_s21 + $0x1964] ss:$16 sps:$4 sm:$0xff]   ;;  %v12025_v56 = vld [vmem:[%s12719_s21 + $0x196c] ss:$16 sps:$4 sm:$0xff]  }
 0x375   : > { %7574 = vmatmul.mubr.bf16.vlgmr.msra.gmra.mrb[0].mxu0 %v488_v57  ;;  %8710 = vmatmul.mubr.bf16.vlgmr.msra.gmra.mrb[0].mxu1 %v488_v57  ;;  %v12020_v57 = vld [vmem:[%s12719_s21 + $0x1960] ss:$16 sps:$4 sm:$0xff]  }
 0x376   : > { %7613 = vmatpush1.bf16.msra.mxu0 %v11954_v60  ;;  %8749 = vmatpush1.bf16.msra.mxu1 %v11957_v61  ;;  %v12031_v60 = vld [vmem:[%s12719_s21 + $0x198c] ss:$16 sps:$4 sm:$0xff]   ;;  %v12026_v61 = vld [vmem:[%s12719_s21 + $0x1980] ss:$16 sps:$4 sm:$0xff]  }
 0x377   : > { %7614 = vmatprep.subr.bf16.mxu0 %v11962_v62  ;;  %8750 = vmatprep.subr.bf16.mxu1 %v11965_v63  ;;  %v12029_v62 = vld [vmem:[%s12719_s21 + $0x1988] ss:$16 sps:$4 sm:$0xff]   ;;  %v12034_v63 = vld [vmem:[%s12719_s21 + $0x19a4] ss:$16 sps:$4 sm:$0xff]  }
 0x378   : > { %7583 = vmatprep.mubr.bf16.mxu0 %v521_v0  ;;  %8719 = vmatprep.mubr.bf16.mxu1 %v521_v0  ;;  %v12037_v0 = vld [vmem:[%s12719_s21 + $0x19ac] ss:$16 sps:$4 sm:$0xff]  }
 0x37a   : > { %7615 = vmatpush1.bf16.msra.mxu0 %v11960_v1  ;;  %8751 = vmatpush1.bf16.msra.mxu1 %v11963_v2  ;;  %v12032_v1 = vld [vmem:[%s12719_s21 + $0x19a0] ss:$16 sps:$4 sm:$0xff]   ;;  %v12035_v2 = vld [vmem:[%s12719_s21 + $0x19a8] ss:$16 sps:$4 sm:$0xff]  }
 0x37b   : > { %7616 = vmatprep.subr.bf16.mxu0 %v11968_v5  ;;  %8752 = vmatprep.subr.bf16.mxu1 %v11971_v6  ;;  %v12038_v5 = vld [vmem:[%s12719_s21 + $0x19c0] ss:$16 sps:$4 sm:$0xff]   ;;  %v12041_v6 = vld [vmem:[%s12719_s21 + $0x19c8] ss:$16 sps:$4 sm:$0xff]  }
 0x37d   : > { %7584 = vmatmul.mubr.bf16.gmra.mrb[4].mxu0 %v520_v7  ;;  %8720 = vmatmul.mubr.bf16.gmra.mrb[4].mxu1 %v520_v7  ;;  %v12046_v7 = vld [vmem:[%s12719_s21 + $0x19e4] ss:$16 sps:$4 sm:$0xff]  }
 0x37e   : > { %7617 = vmatpush1.bf16.msra.mxu0 %v11966_v10  ;;  %8753 = vmatpush1.bf16.msra.mxu1 %v11969_v11  ;;  %v12047_v10 = vld [vmem:[%s12719_s21 + $0x19e8] ss:$16 sps:$4 sm:$0xff]   ;;  %v266_v11 = vld [vmem:[#allocation2 + $0xc0] sm:$0xff] }
 0x37f   : > { %7618 = vmatprep.subr.bf16.mxu0 %v11974_v12  ;;  %8754 = vmatprep.subr.bf16.mxu1 %v11977_v13  ;;  %v298_v12 = vld [vmem:[#allocation2 + $0x1c0] sm:$0xff] }
 0x380   : > { %7593 = vmatprep.mubr.bf16.mxu0 %v553_v14  ;;  %8729 = vmatprep.mubr.bf16.mxu1 %v553_v14  ;;  %v12052_v13 = vld [vmem:[%s12719_s21 + $0x1a04] ss:$16 sps:$4 sm:$0xff]   ;;  %v12055_v14 = vld [vmem:[%s12719_s21 + $0x1a0c] ss:$16 sps:$4 sm:$0xff]  }
 0x382   : > { %7619 = vmatpush1.bf16.msra.mxu0 %v11972_v15  ;;  %8755 = vmatpush1.bf16.msra.mxu1 %v11975_v16  ;;  %v490_v15 = vpack.c.bf16 %v298_v12, %v266_v11  ;;  %v331_v16 = vld [vmem:[#allocation2 + $0x2c8] sm:$0xff]  ;;  %v12110_v11 = vld [vmem:[%s12719_s21 + $0x1b40] ss:$16 sps:$4 sm:$0xff]  }
 0x383   : > { %7620 = vmatprep.subr.bf16.mxu0 %v11980_v19  ;;  %8756 = vmatprep.subr.bf16.mxu1 %v11983_v20  ;;  %v12053_v19 = vld [vmem:[%s12719_s21 + $0x1a08] ss:$16 sps:$4 sm:$0xff]   ;;  %v12058_v20 = vld [vmem:[%s12719_s21 + $0x1a24] ss:$16 sps:$4 sm:$0xff]   ;;  %v523_v22 = vpack.c.bf16 %v363_v17, %v331_v16 }
 0x384   : > { %v12113_v12 = vld [vmem:[%s12719_s21 + $0x1b48] ss:$16 sps:$4 sm:$0xff]   ;;  %v12124_v17 = vld [vmem:[%s12719_s21 + $0x1b84] ss:$16 sps:$4 sm:$0xff]  }
 0x385   : > { %7594 = vmatmul.mubr.bf16.gmra.mrb[8].mxu0 %v552_v21  ;;  %8730 = vmatmul.mubr.bf16.gmra.mrb[8].mxu1 %v552_v21  ;;  %v12061_v21 = vld [vmem:[%s12719_s21 + $0x1a2c] ss:$16 sps:$4 sm:$0xff]   ;;  %v12119_v16 = vld [vmem:[%s12719_s21 + $0x1b68] ss:$16 sps:$4 sm:$0xff]  }
 0x386   : > { %7621 = vmatpush1.bf16.msra.mxu0 %v11978_v23  ;;  %8757 = vmatpush1.bf16.msra.mxu1 %v11981_v24  ;;  %v12056_v23 = vld [vmem:[%s12719_s21 + $0x1a20] ss:$16 sps:$4 sm:$0xff]   ;;  %v12059_v24 = vld [vmem:[%s12719_s21 + $0x1a28] ss:$16 sps:$4 sm:$0xff]  }
 0x387   : > { %7622 = vmatprep.subr.bf16.mxu0 %v11986_v25  ;;  %8758 = vmatprep.subr.bf16.mxu1 %v11989_v26  ;;  %v330_v25 = vld [vmem:[#allocation2 + $0x2c0] sm:$0xff] }
 0x388   : > { %7603 = vmatprep.mubr.bf16.mxu0 %v585_v27  ;;  %8739 = vmatprep.mubr.bf16.mxu1 %v585_v27  ;;  %v362_v26 = vld [vmem:[#allocation2 + $0x3c0] sm:$0xff] }
 0x389   : > { %v12064_v27 = vld [vmem:[%s12719_s21 + $0x1a44] ss:$16 sps:$4 sm:$0xff]  }
 0x38a   : > { %7623 = vmatpush1.bf16.msra.mxu0 %v11984_v28  ;;  %8759 = vmatpush1.bf16.msra.mxu1 %v11987_v29  ;;  %v12067_v28 = vld [vmem:[%s12719_s21 + $0x1a4c] ss:$16 sps:$4 sm:$0xff]   ;;  %v522_v29 = vpack.c.bf16 %v362_v26, %v330_v25  ;;  %v12136_v25 = vld [vmem:[%s12719_s21 + $0x1bc4] ss:$16 sps:$4 sm:$0xff]  }
 0x38b   : > { %7624 = vmatprep.subr.bf16.mxu0 %v11992_v31  ;;  %8760 = vmatprep.subr.bf16.mxu1 %v11995_v32  ;;  %v427_v31 = vld [vmem:[#allocation2 + $0x5c8] sm:$0xff]  ;;  %v12062_v32 = vld [vmem:[%s12719_s21 + $0x1a40] ss:$16 sps:$4 sm:$0xff]  }
 0x38c   : > { %v12139_v26 = vld [vmem:[%s12719_s21 + $0x1bcc] ss:$16 sps:$4 sm:$0xff]  }
 0x38d   : > { %7604 = vmatmul.mubr.bf16.gmra.mrb[12].mxu0 %v584_v33  ;;  %8740 = vmatmul.mubr.bf16.gmra.mrb[12].mxu1 %v584_v33  ;;  %v12065_v33 = vld [vmem:[%s12719_s21 + $0x1a48] ss:$16 sps:$4 sm:$0xff]  }
 0x38e   : > { %7625 = vmatpush1.bf16.msra.mxu0 %v11990_v36  ;;  %8761 = vmatpush1.bf16.msra.mxu1 %v11993_v37  ;;  %v555_v36 = vpack.c.bf16 %v427_v31, %v395_v30  ;;  %v12068_v37 = vld [vmem:[%s12719_s21 + $0x1a60] ss:$16 sps:$4 sm:$0xff]   ;;  %v12145_v30 = vld [vmem:[%s12719_s21 + $0x1bec] ss:$16 sps:$4 sm:$0xff]  }
 0x38f   : > { %7626 = vmatprep.subr.bf16.mxu0 %v11998_v38  ;;  %8762 = vmatprep.subr.bf16.mxu1 %v12001_v39  ;;  %v12071_v38 = vld [vmem:[%s12719_s21 + $0x1a68] ss:$16 sps:$4 sm:$0xff]   ;;  %v394_v39 = vld [vmem:[#allocation2 + $0x4c0] sm:$0xff] }
 0x390   : > { %7644 = vmatprep.mubr.bf16.mxu0 %v491_v40  ;;  %8780 = vmatprep.mubr.bf16.mxu1 %v491_v40  ;;  %v426_v40 = vld [vmem:[#allocation2 + $0x5c0] sm:$0xff] }
 0x391   : > { %v12140_v31 = vld [vmem:[%s12719_s21 + $0x1be0] ss:$16 sps:$4 sm:$0xff]  }
 0x392   : > { %7627 = vmatpush1.bf16.msra.mxu0 %v11996_v41  ;;  %8763 = vmatpush1.bf16.msra.mxu1 %v11999_v42  ;;  %v12076_v41 = vld [vmem:[%s12719_s21 + $0x1a84] ss:$16 sps:$4 sm:$0xff]   ;;  %v12079_v42 = vld [vmem:[%s12719_s21 + $0x1a8c] ss:$16 sps:$4 sm:$0xff]  }
 0x393   : > { %7628 = vmatprep.subr.bf16.mxu0 %v12004_v43  ;;  %8764 = vmatprep.subr.bf16.mxu1 %v12007_v44  ;;  %v554_v43 = vpack.c.bf16 %v426_v40, %v394_v39  ;;  %v459_v44 = vld [vmem:[#allocation2 + $0x6c8] sm:$0x1]  ;;  %v365_v39 = vld [vmem:[#allocation2 + $0x3d8] sm:$0xff]  ;;  %v12146_v40 = vld [vmem:[%s12719_s21 + $0x1c00] ss:$16 sps:$4 sm:$0xff]  }
 0x396   : > { %7629 = vmatpush1.bf16.msra.mxu0 %v12002_v45  ;;  %8765 = vmatpush1.bf16.msra.mxu1 %v12005_v46  ;;  %v12074_v45 = vld [vmem:[%s12719_s21 + $0x1a80] ss:$16 sps:$4 sm:$0xff]   ;;  %v12077_v46 = vld [vmem:[%s12719_s21 + $0x1a88] ss:$16 sps:$4 sm:$0xff]  }
 0x397   : > { %7630 = vmatprep.subr.bf16.mxu0 %v12010_v47  ;;  %8766 = vmatprep.subr.bf16.mxu1 %v12013_v48  ;;  %v12082_v47 = vld [vmem:[%s12719_s21 + $0x1aa4] ss:$16 sps:$4 sm:$0xff]   ;;  %v12085_v48 = vld [vmem:[%s12719_s21 + $0x1aac] ss:$16 sps:$4 sm:$0xff]  }
 0x39a   : > { %7631 = vmatpush1.bf16.msra.mxu0 %v12008_v49  ;;  %8767 = vmatpush1.bf16.msra.mxu1 %v12011_v50  ;;  %v587_v49 = vpack.c.bf16 %v459_v44, %v459_v44  ;;  %v12080_v50 = vld [vmem:[%s12719_s21 + $0x1aa0] ss:$16 sps:$4 sm:$0xff]  }
 0x39b   : > { %7632 = vmatprep.subr.bf16.mxu0 %v12016_v51  ;;  %8768 = vmatprep.subr.bf16.mxu1 %v12019_v52  ;;  %v12083_v51 = vld [vmem:[%s12719_s21 + $0x1aa8] ss:$16 sps:$4 sm:$0xff]   ;;  %v458_v52 = vld [vmem:[#allocation2 + $0x6c0] sm:$0x1] }
 0x39e   : > { %7633 = vmatpush1.bf16.msra.mxu0 %v12014_v53  ;;  %8769 = vmatpush1.bf16.msra.mxu1 %v12017_v54  ;;  %v12088_v53 = vld [vmem:[%s12719_s21 + $0x1ac4] ss:$16 sps:$4 sm:$0xff]   ;;  %v12091_v54 = vld [vmem:[%s12719_s21 + $0x1acc] ss:$16 sps:$4 sm:$0xff]  }
 0x39f   : > { %7634 = vmatprep.subr.bf16.mxu0 %v12022_v55  ;;  %8770 = vmatprep.subr.bf16.mxu1 %v12025_v56  ;;  %v586_v55 = vpack.c.bf16 %v458_v52, %v458_v52  ;;  %v269_v56 = vld [vmem:[#allocation2 + $0xd8] sm:$0xff] }
 0x3a0   : > { %v397_v52 = vld [vmem:[#allocation2 + $0x4d8] sm:$0xff] }
 0x3a2   : > { %7635 = vmatpush1.bf16.msra.mxu0 %v12020_v57  ;;  %8771 = vmatpush1.bf16.msra.mxu1 %v12023_v58  ;;  %v301_v57 = vld [vmem:[#allocation2 + $0x1d8] sm:$0xff]  ;;  %v12086_v58 = vld [vmem:[%s12719_s21 + $0x1ac0] ss:$16 sps:$4 sm:$0xff]  }
 0x3a3   : > { %7636 = vmatprep.subr.bf16.mxu0 %v12028_v59  ;;  %8772 = vmatprep.subr.bf16.mxu1 %v12031_v60  ;;  %v12089_v59 = vld [vmem:[%s12719_s21 + $0x1ac8] ss:$16 sps:$4 sm:$0xff]   ;;  %v12094_v60 = vld [vmem:[%s12719_s21 + $0x1ae4] ss:$16 sps:$4 sm:$0xff]  }
 0x3a6   : > { %7637 = vmatpush1.bf16.msra.mxu0 %v12026_v61  ;;  %8773 = vmatpush1.bf16.msra.mxu1 %v12029_v62  ;;  %v12097_v61 = vld [vmem:[%s12719_s21 + $0x1aec] ss:$16 sps:$4 sm:$0xff]   ;;  %v493_v62 = vpack.c.bf16 %v301_v57, %v269_v56  ;;  %v12166_v56 = vld [vmem:[%s12719_s21 + $0x1c64] ss:$16 sps:$4 sm:$0xff]  }
 0x3a7   : > { %7638 = vmatprep.subr.bf16.mxu0 %v12034_v63  ;;  %8774 = vmatprep.subr.bf16.mxu1 %v12037_v0  ;;  %v12092_v63 = vld [vmem:[%s12719_s21 + $0x1ae0] ss:$16 sps:$4 sm:$0xff]   ;;  %v12095_v0 = vld [vmem:[%s12719_s21 + $0x1ae8] ss:$16 sps:$4 sm:$0xff]   ;;  %v12169_v57 = vld [vmem:[%s12719_s21 + $0x1c6c] ss:$16 sps:$4 sm:$0xff]  }
 0x3aa   : > { %7639 = vmatpush1.bf16.msra.mxu0 %v12032_v1  ;;  %8775 = vmatpush1.bf16.msra.mxu1 %v12035_v2  ;;  %v12100_v1 = vld [vmem:[%s12719_s21 + $0x1b04] ss:$16 sps:$4 sm:$0xff]   ;;  %v12103_v2 = vld [vmem:[%s12719_s21 + $0x1b0c] ss:$16 sps:$4 sm:$0xff]  }
 0x3ab   : > { %7640 = vmatprep.subr.bf16.mxu0 %v12040_v3  ;;  %8776 = vmatprep.subr.bf16.mxu1 %v12043_v4  ;;  %v12098_v3 = vld [vmem:[%s12719_s21 + $0x1b00] ss:$16 sps:$4 sm:$0xff]   ;;  %v12101_v4 = vld [vmem:[%s12719_s21 + $0x1b08] ss:$16 sps:$4 sm:$0xff]  }
 0x3ae   : > { %7641 = vmatpush1.bf16.msra.mxu0 %v12038_v5  ;;  %8777 = vmatpush1.bf16.msra.mxu1 %v12041_v6  ;;  %v12106_v5 = vld [vmem:[%s12719_s21 + $0x1b24] ss:$16 sps:$4 sm:$0xff]   ;;  %v12109_v6 = vld [vmem:[%s12719_s21 + $0x1b2c] ss:$16 sps:$4 sm:$0xff]  }
 0x3af   : > { %7642 = vmatprep.subr.bf16.mxu0 %v12046_v7  ;;  %8778 = vmatprep.subr.bf16.mxu1 %v12049_v8  ;;  %v12104_v7 = vld [vmem:[%s12719_s21 + $0x1b20] ss:$16 sps:$4 sm:$0xff]   ;;  %v12107_v8 = vld [vmem:[%s12719_s21 + $0x1b28] ss:$16 sps:$4 sm:$0xff]  }
 0x3b2   : > { %7643 = vmatpush1.bf16.msra.mxu0 %v12044_v9  ;;  %8779 = vmatpush1.bf16.msra.mxu1 %v12047_v10  ;;  %v12112_v9 = vld [vmem:[%s12719_s21 + $0x1b44] ss:$16 sps:$4 sm:$0xff]   ;;  %v12115_v10 = vld [vmem:[%s12719_s21 + $0x1b4c] ss:$16 sps:$4 sm:$0xff]  }
 0x3b3   : > { %7683 = vmatprep.subr.bf16.mxu0 %v12052_v13  ;;  %8819 = vmatprep.subr.bf16.mxu1 %v12055_v14  ;;  %v12118_v13 = vld [vmem:[%s12719_s21 + $0x1b64] ss:$16 sps:$4 sm:$0xff]   ;;  %v12121_v14 = vld [vmem:[%s12719_s21 + $0x1b6c] ss:$16 sps:$4 sm:$0xff]  }
 0x3b5   : > { %7645 = vmatmul.mubr.bf16.vlgmr.msra.gmra.mrb[0].mxu0 %v490_v15  ;;  %8781 = vmatmul.mubr.bf16.vlgmr.msra.gmra.mrb[0].mxu1 %v490_v15  ;;  %v12116_v15 = vld [vmem:[%s12719_s21 + $0x1b60] ss:$16 sps:$4 sm:$0xff]  }
 0x3b6   : > { %7684 = vmatpush1.bf16.msra.mxu0 %v12050_v18  ;;  %8820 = vmatpush1.bf16.msra.mxu1 %v12053_v19  ;;  %v12127_v18 = vld [vmem:[%s12719_s21 + $0x1b8c] ss:$16 sps:$4 sm:$0xff]   ;;  %v12122_v19 = vld [vmem:[%s12719_s21 + $0x1b80] ss:$16 sps:$4 sm:$0xff]  }
 0x3b7   : > { %7685 = vmatprep.subr.bf16.mxu0 %v12058_v20  ;;  %8821 = vmatprep.subr.bf16.mxu1 %v12061_v21  ;;  %v12125_v20 = vld [vmem:[%s12719_s21 + $0x1b88] ss:$16 sps:$4 sm:$0xff]   ;;  %v12130_v21 = vld [vmem:[%s12719_s21 + $0x1ba4] ss:$16 sps:$4 sm:$0xff]  }
 0x3b8   : > { %7654 = vmatprep.mubr.bf16.mxu0 %v523_v22  ;;  %8790 = vmatprep.mubr.bf16.mxu1 %v523_v22  ;;  %v12133_v22 = vld [vmem:[%s12719_s21 + $0x1bac] ss:$16 sps:$4 sm:$0xff]  }
 0x3ba   : > { %7686 = vmatpush1.bf16.msra.mxu0 %v12056_v23  ;;  %8822 = vmatpush1.bf16.msra.mxu1 %v12059_v24  ;;  %v12128_v23 = vld [vmem:[%s12719_s21 + $0x1ba0] ss:$16 sps:$4 sm:$0xff]   ;;  %v12131_v24 = vld [vmem:[%s12719_s21 + $0x1ba8] ss:$16 sps:$4 sm:$0xff]  }
 0x3bb   : > { %7687 = vmatprep.subr.bf16.mxu0 %v12064_v27  ;;  %8823 = vmatprep.subr.bf16.mxu1 %v12067_v28  ;;  %v12134_v27 = vld [vmem:[%s12719_s21 + $0x1bc0] ss:$16 sps:$4 sm:$0xff]   ;;  %v12137_v28 = vld [vmem:[%s12719_s21 + $0x1bc8] ss:$16 sps:$4 sm:$0xff]  }
 0x3bd   : > { %7655 = vmatmul.mubr.bf16.gmra.mrb[4].mxu0 %v522_v29  ;;  %8791 = vmatmul.mubr.bf16.gmra.mrb[4].mxu1 %v522_v29  ;;  %v12142_v29 = vld [vmem:[%s12719_s21 + $0x1be4] ss:$16 sps:$4 sm:$0xff]  }
 0x3be   : > { %7688 = vmatpush1.bf16.msra.mxu0 %v12062_v32  ;;  %8824 = vmatpush1.bf16.msra.mxu1 %v12065_v33  ;;  %v12143_v32 = vld [vmem:[%s12719_s21 + $0x1be8] ss:$16 sps:$4 sm:$0xff]   ;;  %v268_v33 = vld [vmem:[#allocation2 + $0xd0] sm:$0xff] }
 0x3bf   : > { %7689 = vmatprep.subr.bf16.mxu0 %v12070_v34  ;;  %8825 = vmatprep.subr.bf16.mxu1 %v12073_v35  ;;  %v300_v34 = vld [vmem:[#allocation2 + $0x1d0] sm:$0xff] }
 0x3c0   : > { %7664 = vmatprep.mubr.bf16.mxu0 %v555_v36  ;;  %8800 = vmatprep.mubr.bf16.mxu1 %v555_v36  ;;  %v12148_v35 = vld [vmem:[%s12719_s21 + $0x1c04] ss:$16 sps:$4 sm:$0xff]   ;;  %v12151_v36 = vld [vmem:[%s12719_s21 + $0x1c0c] ss:$16 sps:$4 sm:$0xff]  }
 0x3c2   : > { %7690 = vmatpush1.bf16.msra.mxu0 %v12068_v37  ;;  %8826 = vmatpush1.bf16.msra.mxu1 %v12071_v38  ;;  %v492_v37 = vpack.c.bf16 %v300_v34, %v268_v33  ;;  %v333_v38 = vld [vmem:[#allocation2 + $0x2d8] sm:$0xff]  ;;  %v12206_v33 = vld [vmem:[%s12719_s21 + $0x1d40] ss:$16 sps:$4 sm:$0xff]  }
 0x3c3   : > { %7691 = vmatprep.subr.bf16.mxu0 %v12076_v41  ;;  %8827 = vmatprep.subr.bf16.mxu1 %v12079_v42  ;;  %v12149_v41 = vld [vmem:[%s12719_s21 + $0x1c08] ss:$16 sps:$4 sm:$0xff]   ;;  %v12154_v42 = vld [vmem:[%s12719_s21 + $0x1c24] ss:$16 sps:$4 sm:$0xff]   ;;  %v525_v44 = vpack.c.bf16 %v365_v39, %v333_v38 }
 0x3c4   : > { %v12209_v34 = vld [vmem:[%s12719_s21 + $0x1d48] ss:$16 sps:$4 sm:$0xff]   ;;  %v12220_v39 = vld [vmem:[%s12719_s21 + $0x1d84] ss:$16 sps:$4 sm:$0xff]  }
 0x3c5   : > { %7665 = vmatmul.mubr.bf16.gmra.mrb[8].mxu0 %v554_v43  ;;  %8801 = vmatmul.mubr.bf16.gmra.mrb[8].mxu1 %v554_v43  ;;  %v12157_v43 = vld [vmem:[%s12719_s21 + $0x1c2c] ss:$16 sps:$4 sm:$0xff]   ;;  %v12215_v38 = vld [vmem:[%s12719_s21 + $0x1d68] ss:$16 sps:$4 sm:$0xff]  }
 0x3c6   : > { %7692 = vmatpush1.bf16.msra.mxu0 %v12074_v45  ;;  %8828 = vmatpush1.bf16.msra.mxu1 %v12077_v46  ;;  %v12152_v45 = vld [vmem:[%s12719_s21 + $0x1c20] ss:$16 sps:$4 sm:$0xff]   ;;  %v12155_v46 = vld [vmem:[%s12719_s21 + $0x1c28] ss:$16 sps:$4 sm:$0xff]  }
 0x3c7   : > { %7693 = vmatprep.subr.bf16.mxu0 %v12082_v47  ;;  %8829 = vmatprep.subr.bf16.mxu1 %v12085_v48  ;;  %v332_v47 = vld [vmem:[#allocation2 + $0x2d0] sm:$0xff] }
 0x3c8   : > { %7674 = vmatprep.mubr.bf16.mxu0 %v587_v49  ;;  %8810 = vmatprep.mubr.bf16.mxu1 %v587_v49  ;;  %v364_v48 = vld [vmem:[#allocation2 + $0x3d0] sm:$0xff] }
 0x3c9   : > { %v12160_v49 = vld [vmem:[%s12719_s21 + $0x1c44] ss:$16 sps:$4 sm:$0xff]  }
 0x3ca   : > { %7694 = vmatpush1.bf16.msra.mxu0 %v12080_v50  ;;  %8830 = vmatpush1.bf16.msra.mxu1 %v12083_v51  ;;  %v12163_v50 = vld [vmem:[%s12719_s21 + $0x1c4c] ss:$16 sps:$4 sm:$0xff]   ;;  %v524_v51 = vpack.c.bf16 %v364_v48, %v332_v47  ;;  %v12232_v47 = vld [vmem:[%s12719_s21 + $0x1dc4] ss:$16 sps:$4 sm:$0xff]  }
 0x3cb   : > { %7695 = vmatprep.subr.bf16.mxu0 %v12088_v53  ;;  %8831 = vmatprep.subr.bf16.mxu1 %v12091_v54  ;;  %v429_v53 = vld [vmem:[#allocation2 + $0x5d8] sm:$0xff]  ;;  %v12158_v54 = vld [vmem:[%s12719_s21 + $0x1c40] ss:$16 sps:$4 sm:$0xff]  }
 0x3cc   : > { %v12235_v48 = vld [vmem:[%s12719_s21 + $0x1dcc] ss:$16 sps:$4 sm:$0xff]  }
 0x3cd   : > { %7675 = vmatmul.mubr.bf16.gmra.mrb[12].mxu0 %v586_v55  ;;  %8811 = vmatmul.mubr.bf16.gmra.mrb[12].mxu1 %v586_v55  ;;  %v12161_v55 = vld [vmem:[%s12719_s21 + $0x1c48] ss:$16 sps:$4 sm:$0xff]  }
 0x3ce   : > { %7696 = vmatpush1.bf16.msra.mxu0 %v12086_v58  ;;  %8832 = vmatpush1.bf16.msra.mxu1 %v12089_v59  ;;  %v557_v58 = vpack.c.bf16 %v429_v53, %v397_v52  ;;  %v12164_v59 = vld [vmem:[%s12719_s21 + $0x1c60] ss:$16 sps:$4 sm:$0xff]   ;;  %v12241_v52 = vld [vmem:[%s12719_s21 + $0x1dec] ss:$16 sps:$4 sm:$0xff]  }
 0x3cf   : > { %7697 = vmatprep.subr.bf16.mxu0 %v12094_v60  ;;  %8833 = vmatprep.subr.bf16.mxu1 %v12097_v61  ;;  %v12167_v60 = vld [vmem:[%s12719_s21 + $0x1c68] ss:$16 sps:$4 sm:$0xff]   ;;  %v396_v61 = vld [vmem:[#allocation2 + $0x4d0] sm:$0xff] }
 0x3d0   : > { %7715 = vmatprep.mubr.bf16.mxu0 %v493_v62  ;;  %8851 = vmatprep.mubr.bf16.mxu1 %v493_v62  ;;  %v428_v62 = vld [vmem:[#allocation2 + $0x5d0] sm:$0xff] }
 0x3d1   : > { %v12236_v53 = vld [vmem:[%s12719_s21 + $0x1de0] ss:$16 sps:$4 sm:$0xff]  }
 0x3d2   : > { %7698 = vmatpush1.bf16.msra.mxu0 %v12092_v63  ;;  %8834 = vmatpush1.bf16.msra.mxu1 %v12095_v0  ;;  %v12172_v63 = vld [vmem:[%s12719_s21 + $0x1c84] ss:$16 sps:$4 sm:$0xff]   ;;  %v12175_v0 = vld [vmem:[%s12719_s21 + $0x1c8c] ss:$16 sps:$4 sm:$0xff]  }
 0x3d3   : > { %7699 = vmatprep.subr.bf16.mxu0 %v12100_v1  ;;  %8835 = vmatprep.subr.bf16.mxu1 %v12103_v2  ;;  %v556_v1 = vpack.c.bf16 %v428_v62, %v396_v61  ;;  %v461_v2 = vld [vmem:[#allocation2 + $0x6d8] sm:$0x1]  ;;  %v367_v61 = vld [vmem:[#allocation2 + $0x3e8] sm:$0xff]  ;;  %v12242_v62 = vld [vmem:[%s12719_s21 + $0x1e00] ss:$16 sps:$4 sm:$0xff]  }
 0x3d6   : > { %7700 = vmatpush1.bf16.msra.mxu0 %v12098_v3  ;;  %8836 = vmatpush1.bf16.msra.mxu1 %v12101_v4  ;;  %v12170_v3 = vld [vmem:[%s12719_s21 + $0x1c80] ss:$16 sps:$4 sm:$0xff]   ;;  %v12173_v4 = vld [vmem:[%s12719_s21 + $0x1c88] ss:$16 sps:$4 sm:$0xff]  }
 0x3d7   : > { %7701 = vmatprep.subr.bf16.mxu0 %v12106_v5  ;;  %8837 = vmatprep.subr.bf16.mxu1 %v12109_v6  ;;  %v12178_v5 = vld [vmem:[%s12719_s21 + $0x1ca4] ss:$16 sps:$4 sm:$0xff]   ;;  %v12181_v6 = vld [vmem:[%s12719_s21 + $0x1cac] ss:$16 sps:$4 sm:$0xff]  }
 0x3da   : > { %7702 = vmatpush1.bf16.msra.mxu0 %v12104_v7  ;;  %8838 = vmatpush1.bf16.msra.mxu1 %v12107_v8  ;;  %v589_v7 = vpack.c.bf16 %v461_v2, %v461_v2  ;;  %v12176_v8 = vld [vmem:[%s12719_s21 + $0x1ca0] ss:$16 sps:$4 sm:$0xff]  }
 0x3db   : > { %7703 = vmatprep.subr.bf16.mxu0 %v12112_v9  ;;  %8839 = vmatprep.subr.bf16.mxu1 %v12115_v10  ;;  %v12179_v9 = vld [vmem:[%s12719_s21 + $0x1ca8] ss:$16 sps:$4 sm:$0xff]   ;;  %v460_v10 = vld [vmem:[#allocation2 + $0x6d0] sm:$0x1] }
 0x3de   : > { %7704 = vmatpush1.bf16.msra.mxu0 %v12110_v11  ;;  %8840 = vmatpush1.bf16.msra.mxu1 %v12113_v12  ;;  %v12184_v11 = vld [vmem:[%s12719_s21 + $0x1cc4] ss:$16 sps:$4 sm:$0xff]   ;;  %v12187_v12 = vld [vmem:[%s12719_s21 + $0x1ccc] ss:$16 sps:$4 sm:$0xff]  }
 0x3df   : > { %7705 = vmatprep.subr.bf16.mxu0 %v12118_v13  ;;  %8841 = vmatprep.subr.bf16.mxu1 %v12121_v14  ;;  %v588_v13 = vpack.c.bf16 %v460_v10, %v460_v10  ;;  %v271_v14 = vld [vmem:[#allocation2 + $0xe8] sm:$0xff] }
 0x3e0   : > { %v399_v10 = vld [vmem:[#allocation2 + $0x4e8] sm:$0xff] }
 0x3e2   : > { %7706 = vmatpush1.bf16.msra.mxu0 %v12116_v15  ;;  %8842 = vmatpush1.bf16.msra.mxu1 %v12119_v16  ;;  %v303_v15 = vld [vmem:[#allocation2 + $0x1e8] sm:$0xff]  ;;  %v12182_v16 = vld [vmem:[%s12719_s21 + $0x1cc0] ss:$16 sps:$4 sm:$0xff]  }
 0x3e3   : > { %7707 = vmatprep.subr.bf16.mxu0 %v12124_v17  ;;  %8843 = vmatprep.subr.bf16.mxu1 %v12127_v18  ;;  %v12185_v17 = vld [vmem:[%s12719_s21 + $0x1cc8] ss:$16 sps:$4 sm:$0xff]   ;;  %v12190_v18 = vld [vmem:[%s12719_s21 + $0x1ce4] ss:$16 sps:$4 sm:$0xff]  }
 0x3e6   : > { %7708 = vmatpush1.bf16.msra.mxu0 %v12122_v19  ;;  %8844 = vmatpush1.bf16.msra.mxu1 %v12125_v20  ;;  %v12193_v19 = vld [vmem:[%s12719_s21 + $0x1cec] ss:$16 sps:$4 sm:$0xff]   ;;  %v495_v20 = vpack.c.bf16 %v303_v15, %v271_v14  ;;  %v12262_v14 = vld [vmem:[%s12719_s21 + $0x1e64] ss:$16 sps:$4 sm:$0xff]  }
 0x3e7   : > { %7709 = vmatprep.subr.bf16.mxu0 %v12130_v21  ;;  %8845 = vmatprep.subr.bf16.mxu1 %v12133_v22  ;;  %v12188_v21 = vld [vmem:[%s12719_s21 + $0x1ce0] ss:$16 sps:$4 sm:$0xff]   ;;  %v12191_v22 = vld [vmem:[%s12719_s21 + $0x1ce8] ss:$16 sps:$4 sm:$0xff]   ;;  %v12265_v15 = vld [vmem:[%s12719_s21 + $0x1e6c] ss:$16 sps:$4 sm:$0xff]  }
 0x3ea   : > { %7710 = vmatpush1.bf16.msra.mxu0 %v12128_v23  ;;  %8846 = vmatpush1.bf16.msra.mxu1 %v12131_v24  ;;  %v12196_v23 = vld [vmem:[%s12719_s21 + $0x1d04] ss:$16 sps:$4 sm:$0xff]   ;;  %v12199_v24 = vld [vmem:[%s12719_s21 + $0x1d0c] ss:$16 sps:$4 sm:$0xff]  }
 0x3eb   : > { %7711 = vmatprep.subr.bf16.mxu0 %v12136_v25  ;;  %8847 = vmatprep.subr.bf16.mxu1 %v12139_v26  ;;  %v12194_v25 = vld [vmem:[%s12719_s21 + $0x1d00] ss:$16 sps:$4 sm:$0xff]   ;;  %v12197_v26 = vld [vmem:[%s12719_s21 + $0x1d08] ss:$16 sps:$4 sm:$0xff]  }
 0x3ee   : > { %7712 = vmatpush1.bf16.msra.mxu0 %v12134_v27  ;;  %8848 = vmatpush1.bf16.msra.mxu1 %v12137_v28  ;;  %v12202_v27 = vld [vmem:[%s12719_s21 + $0x1d24] ss:$16 sps:$4 sm:$0xff]   ;;  %v12205_v28 = vld [vmem:[%s12719_s21 + $0x1d2c] ss:$16 sps:$4 sm:$0xff]  }
 0x3ef   : > { %7713 = vmatprep.subr.bf16.mxu0 %v12142_v29  ;;  %8849 = vmatprep.subr.bf16.mxu1 %v12145_v30  ;;  %v12200_v29 = vld [vmem:[%s12719_s21 + $0x1d20] ss:$16 sps:$4 sm:$0xff]   ;;  %v12203_v30 = vld [vmem:[%s12719_s21 + $0x1d28] ss:$16 sps:$4 sm:$0xff]  }
 0x3f2   : > { %7714 = vmatpush1.bf16.msra.mxu0 %v12140_v31  ;;  %8850 = vmatpush1.bf16.msra.mxu1 %v12143_v32  ;;  %v12208_v31 = vld [vmem:[%s12719_s21 + $0x1d44] ss:$16 sps:$4 sm:$0xff]   ;;  %v12211_v32 = vld [vmem:[%s12719_s21 + $0x1d4c] ss:$16 sps:$4 sm:$0xff]  }
 0x3f3   : > { %7754 = vmatprep.subr.bf16.mxu0 %v12148_v35  ;;  %8890 = vmatprep.subr.bf16.mxu1 %v12151_v36  ;;  %v12214_v35 = vld [vmem:[%s12719_s21 + $0x1d64] ss:$16 sps:$4 sm:$0xff]   ;;  %v12217_v36 = vld [vmem:[%s12719_s21 + $0x1d6c] ss:$16 sps:$4 sm:$0xff]  }
 0x3f5   : > { %7716 = vmatmul.mubr.bf16.vlgmr.msra.gmra.mrb[0].mxu0 %v492_v37  ;;  %8852 = vmatmul.mubr.bf16.vlgmr.msra.gmra.mrb[0].mxu1 %v492_v37  ;;  %v12212_v37 = vld [vmem:[%s12719_s21 + $0x1d60] ss:$16 sps:$4 sm:$0xff]  }
 0x3f6   : > { %7755 = vmatpush1.bf16.msra.mxu0 %v12146_v40  ;;  %8891 = vmatpush1.bf16.msra.mxu1 %v12149_v41  ;;  %v12223_v40 = vld [vmem:[%s12719_s21 + $0x1d8c] ss:$16 sps:$4 sm:$0xff]   ;;  %v12218_v41 = vld [vmem:[%s12719_s21 + $0x1d80] ss:$16 sps:$4 sm:$0xff]  }
 0x3f7   : > { %7756 = vmatprep.subr.bf16.mxu0 %v12154_v42  ;;  %8892 = vmatprep.subr.bf16.mxu1 %v12157_v43  ;;  %v12221_v42 = vld [vmem:[%s12719_s21 + $0x1d88] ss:$16 sps:$4 sm:$0xff]   ;;  %v12226_v43 = vld [vmem:[%s12719_s21 + $0x1da4] ss:$16 sps:$4 sm:$0xff]  }
 0x3f8   : > { %7725 = vmatprep.mubr.bf16.mxu0 %v525_v44  ;;  %8861 = vmatprep.mubr.bf16.mxu1 %v525_v44  ;;  %v12229_v44 = vld [vmem:[%s12719_s21 + $0x1dac] ss:$16 sps:$4 sm:$0xff]  }
 0x3fa   : > { %7757 = vmatpush1.bf16.msra.mxu0 %v12152_v45  ;;  %8893 = vmatpush1.bf16.msra.mxu1 %v12155_v46  ;;  %v12224_v45 = vld [vmem:[%s12719_s21 + $0x1da0] ss:$16 sps:$4 sm:$0xff]   ;;  %v12227_v46 = vld [vmem:[%s12719_s21 + $0x1da8] ss:$16 sps:$4 sm:$0xff]  }
 0x3fb   : > { %7758 = vmatprep.subr.bf16.mxu0 %v12160_v49  ;;  %8894 = vmatprep.subr.bf16.mxu1 %v12163_v50  ;;  %v12230_v49 = vld [vmem:[%s12719_s21 + $0x1dc0] ss:$16 sps:$4 sm:$0xff]   ;;  %v12233_v50 = vld [vmem:[%s12719_s21 + $0x1dc8] ss:$16 sps:$4 sm:$0xff]  }
 0x3fd   : > { %7726 = vmatmul.mubr.bf16.gmra.mrb[4].mxu0 %v524_v51  ;;  %8862 = vmatmul.mubr.bf16.gmra.mrb[4].mxu1 %v524_v51  ;;  %v12238_v51 = vld [vmem:[%s12719_s21 + $0x1de4] ss:$16 sps:$4 sm:$0xff]  }
 0x3fe   : > { %7759 = vmatpush1.bf16.msra.mxu0 %v12158_v54  ;;  %8895 = vmatpush1.bf16.msra.mxu1 %v12161_v55  ;;  %v12239_v54 = vld [vmem:[%s12719_s21 + $0x1de8] ss:$16 sps:$4 sm:$0xff]   ;;  %v270_v55 = vld [vmem:[#allocation2 + $0xe0] sm:$0xff] }
 0x3ff   : > { %7760 = vmatprep.subr.bf16.mxu0 %v12166_v56  ;;  %8896 = vmatprep.subr.bf16.mxu1 %v12169_v57  ;;  %v302_v56 = vld [vmem:[#allocation2 + $0x1e0] sm:$0xff] }
 0x400   : > { %7735 = vmatprep.mubr.bf16.mxu0 %v557_v58  ;;  %8871 = vmatprep.mubr.bf16.mxu1 %v557_v58  ;;  %v12244_v57 = vld [vmem:[%s12719_s21 + $0x1e04] ss:$16 sps:$4 sm:$0xff]   ;;  %v12247_v58 = vld [vmem:[%s12719_s21 + $0x1e0c] ss:$16 sps:$4 sm:$0xff]  }
 0x402   : > { %7761 = vmatpush1.bf16.msra.mxu0 %v12164_v59  ;;  %8897 = vmatpush1.bf16.msra.mxu1 %v12167_v60  ;;  %v494_v59 = vpack.c.bf16 %v302_v56, %v270_v55  ;;  %v335_v60 = vld [vmem:[#allocation2 + $0x2e8] sm:$0xff]  ;;  %v12302_v55 = vld [vmem:[%s12719_s21 + $0x1f40] ss:$16 sps:$4 sm:$0xff]  }
 0x403   : > { %7762 = vmatprep.subr.bf16.mxu0 %v12172_v63  ;;  %8898 = vmatprep.subr.bf16.mxu1 %v12175_v0  ;;  %v12245_v63 = vld [vmem:[%s12719_s21 + $0x1e08] ss:$16 sps:$4 sm:$0xff]   ;;  %v12250_v0 = vld [vmem:[%s12719_s21 + $0x1e24] ss:$16 sps:$4 sm:$0xff]   ;;  %v527_v2 = vpack.c.bf16 %v367_v61, %v335_v60 }
 0x404   : > { %v12305_v56 = vld [vmem:[%s12719_s21 + $0x1f48] ss:$16 sps:$4 sm:$0xff]   ;;  %v12316_v61 = vld [vmem:[%s12719_s21 + $0x1f84] ss:$16 sps:$4 sm:$0xff]  }
 0x405   : > { %7736 = vmatmul.mubr.bf16.gmra.mrb[8].mxu0 %v556_v1  ;;  %8872 = vmatmul.mubr.bf16.gmra.mrb[8].mxu1 %v556_v1  ;;  %v12253_v1 = vld [vmem:[%s12719_s21 + $0x1e2c] ss:$16 sps:$4 sm:$0xff]   ;;  %v12311_v60 = vld [vmem:[%s12719_s21 + $0x1f68] ss:$16 sps:$4 sm:$0xff]  }
 0x406   : > { %7763 = vmatpush1.bf16.msra.mxu0 %v12170_v3  ;;  %8899 = vmatpush1.bf16.msra.mxu1 %v12173_v4  ;;  %v12248_v3 = vld [vmem:[%s12719_s21 + $0x1e20] ss:$16 sps:$4 sm:$0xff]   ;;  %v12251_v4 = vld [vmem:[%s12719_s21 + $0x1e28] ss:$16 sps:$4 sm:$0xff]  }
 0x407   : > { %7764 = vmatprep.subr.bf16.mxu0 %v12178_v5  ;;  %8900 = vmatprep.subr.bf16.mxu1 %v12181_v6  ;;  %v334_v5 = vld [vmem:[#allocation2 + $0x2e0] sm:$0xff] }
 0x408   : > { %7745 = vmatprep.mubr.bf16.mxu0 %v589_v7  ;;  %8881 = vmatprep.mubr.bf16.mxu1 %v589_v7  ;;  %v366_v6 = vld [vmem:[#allocation2 + $0x3e0] sm:$0xff] }
 0x409   : > { %v12256_v7 = vld [vmem:[%s12719_s21 + $0x1e44] ss:$16 sps:$4 sm:$0xff]  }
 0x40a   : > { %7765 = vmatpush1.bf16.msra.mxu0 %v12176_v8  ;;  %8901 = vmatpush1.bf16.msra.mxu1 %v12179_v9  ;;  %v12259_v8 = vld [vmem:[%s12719_s21 + $0x1e4c] ss:$16 sps:$4 sm:$0xff]   ;;  %v526_v9 = vpack.c.bf16 %v366_v6, %v334_v5  ;;  %v12328_v5 = vld [vmem:[%s12719_s21 + $0x1fc4] ss:$16 sps:$4 sm:$0xff]  }
 0x40b   : > { %7766 = vmatprep.subr.bf16.mxu0 %v12184_v11  ;;  %8902 = vmatprep.subr.bf16.mxu1 %v12187_v12  ;;  %v431_v11 = vld [vmem:[#allocation2 + $0x5e8] sm:$0xff]  ;;  %v12254_v12 = vld [vmem:[%s12719_s21 + $0x1e40] ss:$16 sps:$4 sm:$0xff]  }
 0x40c   : > { %v12331_v6 = vld [vmem:[%s12719_s21 + $0x1fcc] ss:$16 sps:$4 sm:$0xff]  }
 0x40d   : > { %7746 = vmatmul.mubr.bf16.gmra.mrb[12].mxu0 %v588_v13  ;;  %8882 = vmatmul.mubr.bf16.gmra.mrb[12].mxu1 %v588_v13  ;;  %v12257_v13 = vld [vmem:[%s12719_s21 + $0x1e48] ss:$16 sps:$4 sm:$0xff]  }
 0x40e   : > { %7767 = vmatpush1.bf16.msra.mxu0 %v12182_v16  ;;  %8903 = vmatpush1.bf16.msra.mxu1 %v12185_v17  ;;  %v559_v16 = vpack.c.bf16 %v431_v11, %v399_v10  ;;  %v12260_v17 = vld [vmem:[%s12719_s21 + $0x1e60] ss:$16 sps:$4 sm:$0xff]   ;;  %v12337_v10 = vld [vmem:[%s12719_s21 + $0x1fec] ss:$16 sps:$4 sm:$0xff]  }
 0x40f   : > { %7768 = vmatprep.subr.bf16.mxu0 %v12190_v18  ;;  %8904 = vmatprep.subr.bf16.mxu1 %v12193_v19  ;;  %v12263_v18 = vld [vmem:[%s12719_s21 + $0x1e68] ss:$16 sps:$4 sm:$0xff]   ;;  %v398_v19 = vld [vmem:[#allocation2 + $0x4e0] sm:$0xff] }
 0x410   : > { %7786 = vmatprep.mubr.bf16.mxu0 %v495_v20  ;;  %8922 = vmatprep.mubr.bf16.mxu1 %v495_v20  ;;  %v430_v20 = vld [vmem:[#allocation2 + $0x5e0] sm:$0xff] }
 0x411   : > { %v12332_v11 = vld [vmem:[%s12719_s21 + $0x1fe0] ss:$16 sps:$4 sm:$0xff]  }
 0x412   : > { %7769 = vmatpush1.bf16.msra.mxu0 %v12188_v21  ;;  %8905 = vmatpush1.bf16.msra.mxu1 %v12191_v22  ;;  %v12268_v21 = vld [vmem:[%s12719_s21 + $0x1e84] ss:$16 sps:$4 sm:$0xff]   ;;  %v12271_v22 = vld [vmem:[%s12719_s21 + $0x1e8c] ss:$16 sps:$4 sm:$0xff]  }
 0x413   : > { %7770 = vmatprep.subr.bf16.mxu0 %v12196_v23  ;;  %8906 = vmatprep.subr.bf16.mxu1 %v12199_v24  ;;  %v558_v23 = vpack.c.bf16 %v430_v20, %v398_v19  ;;  %v463_v24 = vld [vmem:[#allocation2 + $0x6e8] sm:$0x1]  ;;  %v336_v19 = vld [vmem:[#allocation2 + $0x2f0] sm:$0xff] }
 0x414   : > { %v368_v20 = vld [vmem:[#allocation2 + $0x3f0] sm:$0xff] }
 0x416   : > { %7771 = vmatpush1.bf16.msra.mxu0 %v12194_v25  ;;  %8907 = vmatpush1.bf16.msra.mxu1 %v12197_v26  ;;  %v12266_v25 = vld [vmem:[%s12719_s21 + $0x1e80] ss:$16 sps:$4 sm:$0xff]   ;;  %v12269_v26 = vld [vmem:[%s12719_s21 + $0x1e88] ss:$16 sps:$4 sm:$0xff]  }
 0x417   : > { %7772 = vmatprep.subr.bf16.mxu0 %v12202_v27  ;;  %8908 = vmatprep.subr.bf16.mxu1 %v12205_v28  ;;  %v12274_v27 = vld [vmem:[%s12719_s21 + $0x1ea4] ss:$16 sps:$4 sm:$0xff]   ;;  %v12277_v28 = vld [vmem:[%s12719_s21 + $0x1eac] ss:$16 sps:$4 sm:$0xff]  }
 0x41a   : > { %7773 = vmatpush1.bf16.msra.mxu0 %v12200_v29  ;;  %8909 = vmatpush1.bf16.msra.mxu1 %v12203_v30  ;;  %v591_v29 = vpack.c.bf16 %v463_v24, %v463_v24  ;;  %v12272_v30 = vld [vmem:[%s12719_s21 + $0x1ea0] ss:$16 sps:$4 sm:$0xff]  }
 0x41b   : > { %7774 = vmatprep.subr.bf16.mxu0 %v12208_v31  ;;  %8910 = vmatprep.subr.bf16.mxu1 %v12211_v32  ;;  %v12275_v31 = vld [vmem:[%s12719_s21 + $0x1ea8] ss:$16 sps:$4 sm:$0xff]   ;;  %v462_v32 = vld [vmem:[#allocation2 + $0x6e0] sm:$0x1] }
 0x41e   : > { %7775 = vmatpush1.bf16.msra.mxu0 %v12206_v33  ;;  %8911 = vmatpush1.bf16.msra.mxu1 %v12209_v34  ;;  %v12280_v33 = vld [vmem:[%s12719_s21 + $0x1ec4] ss:$16 sps:$4 sm:$0xff]   ;;  %v12283_v34 = vld [vmem:[%s12719_s21 + $0x1ecc] ss:$16 sps:$4 sm:$0xff]  }
 0x41f   : > { %7776 = vmatprep.subr.bf16.mxu0 %v12214_v35  ;;  %8912 = vmatprep.subr.bf16.mxu1 %v12217_v36  ;;  %v590_v35 = vpack.c.bf16 %v462_v32, %v462_v32  ;;  %v273_v36 = vld [vmem:[#allocation2 + $0xf8] sm:$0xff]  ;;  %v1620_v32 = vlaneseq }
 0x422   : > { %7777 = vmatpush1.bf16.msra.mxu0 %v12212_v37  ;;  %8913 = vmatpush1.bf16.msra.mxu1 %v12215_v38  ;;  %v305_v37 = vld [vmem:[#allocation2 + $0x1f8] sm:$0xff]  ;;  %v12278_v38 = vld [vmem:[%s12719_s21 + $0x1ec0] ss:$16 sps:$4 sm:$0xff]  }
 0x423   : > { %7778 = vmatprep.subr.bf16.mxu0 %v12220_v39  ;;  %8914 = vmatprep.subr.bf16.mxu1 %v12223_v40  ;;  %v12281_v39 = vld [vmem:[%s12719_s21 + $0x1ec8] ss:$16 sps:$4 sm:$0xff]   ;;  %v12286_v40 = vld [vmem:[%s12719_s21 + $0x1ee4] ss:$16 sps:$4 sm:$0xff]  }
 0x426   : > { %7779 = vmatpush1.bf16.msra.mxu0 %v12218_v41  ;;  %8915 = vmatpush1.bf16.msra.mxu1 %v12221_v42  ;;  %v12289_v41 = vld [vmem:[%s12719_s21 + $0x1eec] ss:$16 sps:$4 sm:$0xff]   ;;  %v497_v42 = vpack.c.bf16 %v305_v37, %v273_v36  ;;  %v1618_v36 = vld [vmem:[%s211_s27] sm:$0xf] }
 0x427   : > { %7780 = vmatprep.subr.bf16.mxu0 %v12226_v43  ;;  %8916 = vmatprep.subr.bf16.mxu1 %v12229_v44  ;;  %v12284_v43 = vld [vmem:[%s12719_s21 + $0x1ee0] ss:$16 sps:$4 sm:$0xff]   ;;  %v12287_v44 = vld [vmem:[%s12719_s21 + $0x1ee8] ss:$16 sps:$4 sm:$0xff]  }
 0x42a   : > { %7781 = vmatpush1.bf16.msra.mxu0 %v12224_v45  ;;  %8917 = vmatpush1.bf16.msra.mxu1 %v12227_v46  ;;  %v12292_v45 = vld [vmem:[%s12719_s21 + $0x1f04] ss:$16 sps:$4 sm:$0xff]   ;;  %v12295_v46 = vld [vmem:[%s12719_s21 + $0x1f0c] ss:$16 sps:$4 sm:$0xff]  }
 0x42b   : > { %7782 = vmatprep.subr.bf16.mxu0 %v12232_v47  ;;  %8918 = vmatprep.subr.bf16.mxu1 %v12235_v48  ;;  %v12290_v47 = vld [vmem:[%s12719_s21 + $0x1f00] ss:$16 sps:$4 sm:$0xff]   ;;  %v12293_v48 = vld [vmem:[%s12719_s21 + $0x1f08] ss:$16 sps:$4 sm:$0xff]  }
 0x42e   : > { %7783 = vmatpush1.bf16.msra.mxu0 %v12230_v49  ;;  %8919 = vmatpush1.bf16.msra.mxu1 %v12233_v50  ;;  %v12298_v49 = vld [vmem:[%s12719_s21 + $0x1f24] ss:$16 sps:$4 sm:$0xff]   ;;  %v12301_v50 = vld [vmem:[%s12719_s21 + $0x1f2c] ss:$16 sps:$4 sm:$0xff]  }
 0x42f   : > { %7784 = vmatprep.subr.bf16.mxu0 %v12238_v51  ;;  %8920 = vmatprep.subr.bf16.mxu1 %v12241_v52  ;;  %v12296_v51 = vld [vmem:[%s12719_s21 + $0x1f20] ss:$16 sps:$4 sm:$0xff]   ;;  %v12299_v52 = vld [vmem:[%s12719_s21 + $0x1f28] ss:$16 sps:$4 sm:$0xff]  }
 0x432   : > { %7785 = vmatpush1.bf16.msra.mxu0 %v12236_v53  ;;  %8921 = vmatpush1.bf16.msra.mxu1 %v12239_v54  ;;  %v12304_v53 = vld [vmem:[%s12719_s21 + $0x1f44] ss:$16 sps:$4 sm:$0xff]   ;;  %v12307_v54 = vld [vmem:[%s12719_s21 + $0x1f4c] ss:$16 sps:$4 sm:$0xff]  }
 0x433   : > { %7825 = vmatprep.subr.bf16.mxu0 %v12244_v57  ;;  %8961 = vmatprep.subr.bf16.mxu1 %v12247_v58  ;;  %v12310_v57 = vld [vmem:[%s12719_s21 + $0x1f64] ss:$16 sps:$4 sm:$0xff]   ;;  %v12313_v58 = vld [vmem:[%s12719_s21 + $0x1f6c] ss:$16 sps:$4 sm:$0xff]  }
 0x435   : > { %7787 = vmatmul.mubr.bf16.vlgmr.msra.gmra.mrb[0].mxu0 %v494_v59  ;;  %8923 = vmatmul.mubr.bf16.vlgmr.msra.gmra.mrb[0].mxu1 %v494_v59  ;;  %v12308_v59 = vld [vmem:[%s12719_s21 + $0x1f60] ss:$16 sps:$4 sm:$0xff]  }
 0x436   : > { %7826 = vmatpush1.bf16.msra.mxu0 %v12242_v62  ;;  %8962 = vmatpush1.bf16.msra.mxu1 %v12245_v63  ;;  %v12319_v62 = vld [vmem:[%s12719_s21 + $0x1f8c] ss:$16 sps:$4 sm:$0xff]   ;;  %v12314_v63 = vld [vmem:[%s12719_s21 + $0x1f80] ss:$16 sps:$4 sm:$0xff]  }
 0x437   : > { %7827 = vmatprep.subr.bf16.mxu0 %v12250_v0  ;;  %8963 = vmatprep.subr.bf16.mxu1 %v12253_v1  ;;  %v12317_v0 = vld [vmem:[%s12719_s21 + $0x1f88] ss:$16 sps:$4 sm:$0xff]   ;;  %v12322_v1 = vld [vmem:[%s12719_s21 + $0x1fa4] ss:$16 sps:$4 sm:$0xff]  }
 0x438   : > { %7796 = vmatprep.mubr.bf16.mxu0 %v527_v2  ;;  %8932 = vmatprep.mubr.bf16.mxu1 %v527_v2  ;;  %v12325_v2 = vld [vmem:[%s12719_s21 + $0x1fac] ss:$16 sps:$4 sm:$0xff]  }
 0x43a   : > { %7828 = vmatpush1.bf16.msra.mxu0 %v12248_v3  ;;  %8964 = vmatpush1.bf16.msra.mxu1 %v12251_v4  ;;  %v12320_v3 = vld [vmem:[%s12719_s21 + $0x1fa0] ss:$16 sps:$4 sm:$0xff]   ;;  %v12323_v4 = vld [vmem:[%s12719_s21 + $0x1fa8] ss:$16 sps:$4 sm:$0xff]  }
 0x43b   : > { %7829 = vmatprep.subr.bf16.mxu0 %v12256_v7  ;;  %8965 = vmatprep.subr.bf16.mxu1 %v12259_v8  ;;  %v12326_v7 = vld [vmem:[%s12719_s21 + $0x1fc0] ss:$16 sps:$4 sm:$0xff]   ;;  %v12329_v8 = vld [vmem:[%s12719_s21 + $0x1fc8] ss:$16 sps:$4 sm:$0xff]  }
 0x43d   : > { %7797 = vmatmul.mubr.bf16.gmra.mrb[4].mxu0 %v526_v9  ;;  %8933 = vmatmul.mubr.bf16.gmra.mrb[4].mxu1 %v526_v9  ;;  %v12334_v9 = vld [vmem:[%s12719_s21 + $0x1fe4] ss:$16 sps:$4 sm:$0xff]  }
 0x43e   : > { %7830 = vmatpush1.bf16.msra.mxu0 %v12254_v12  ;;  %8966 = vmatpush1.bf16.msra.mxu1 %v12257_v13  ;;  %v12335_v12 = vld [vmem:[%s12719_s21 + $0x1fe8] ss:$16 sps:$4 sm:$0xff]   ;;  %v272_v13 = vld [vmem:[#allocation2 + $0xf0] sm:$0xff] }
 0x43f   : > { %7831 = vmatprep.subr.bf16.mxu0 %v12262_v14  ;;  %8967 = vmatprep.subr.bf16.mxu1 %v12265_v15  ;;  %v304_v14 = vld [vmem:[#allocation2 + $0x1f0] sm:$0xff]  ;;  %v337_v15 = vld [vmem:[#allocation2 + $0x2f8] sm:$0xff] }
 0x440   : > { %7806 = vmatprep.mubr.bf16.mxu0 %v559_v16  ;;  %8942 = vmatprep.mubr.bf16.mxu1 %v559_v16  ;;  %v369_v16 = vld [vmem:[#allocation2 + $0x3f8] sm:$0xff] }
 0x442   : > { %7832 = vmatpush1.bf16.msra.mxu0 %v12260_v17  ;;  %8968 = vmatpush1.bf16.msra.mxu1 %v12263_v18  ;;  %v496_v17 = vpack.c.bf16 %v304_v14, %v272_v13  ;;  %v529_v18 = vpack.c.bf16 %v369_v16, %v337_v15 }
 0x443   : > { %7833 = vmatprep.subr.bf16.mxu0 %v12268_v21  ;;  %8969 = vmatprep.subr.bf16.mxu1 %v12271_v22  ;;  %v401_v21 = vld [vmem:[#allocation2 + $0x4f8] sm:$0xff] }
 0x444   : > { %v433_v22 = vld [vmem:[#allocation2 + $0x5f8] sm:$0xff] }
 0x445   : > { %7807 = vmatmul.mubr.bf16.gmra.mrb[8].mxu0 %v558_v23  ;;  %8943 = vmatmul.mubr.bf16.gmra.mrb[8].mxu1 %v558_v23  ;;  %v528_v23 = vpack.c.bf16 %v368_v20, %v336_v19  ;;  %v561_v24 = vpack.c.bf16 %v433_v22, %v401_v21 }
 0x446   : > { %7834 = vmatpush1.bf16.msra.mxu0 %v12266_v25  ;;  %8970 = vmatpush1.bf16.msra.mxu1 %v12269_v26  ;;  %v400_v25 = vld [vmem:[#allocation2 + $0x4f0] sm:$0xff] }
 0x447   : > { %7835 = vmatprep.subr.bf16.mxu0 %v12274_v27  ;;  %8971 = vmatprep.subr.bf16.mxu1 %v12277_v28  ;;  %v432_v26 = vld [vmem:[#allocation2 + $0x5f0] sm:$0xff]  ;;  %v465_v27 = vld [vmem:[#allocation2 + $0x6f8] sm:$0x1] }
 0x448   : > { %7816 = vmatprep.mubr.bf16.mxu0 %v591_v29  ;;  %8952 = vmatprep.mubr.bf16.mxu1 %v591_v29  ;;  %v560_v28 = vpack.c.bf16 %v432_v26, %v400_v25  ;;  %v593_v29 = vpack.c.bf16 %v465_v27, %v465_v27 }
 0x44a   : > { %7836 = vmatpush1.bf16.msra.mxu0 %v12272_v30  ;;  %8972 = vmatpush1.bf16.msra.mxu1 %v12275_v31  ;;  %v464_v30 = vld [vmem:[#allocation2 + $0x6f0] sm:$0x1] }
 0x44b   : > { %7837 = vmatprep.subr.bf16.mxu0 %v12280_v33  ;;  %8973 = vmatprep.subr.bf16.mxu1 %v12283_v34  ;;  %v592_v31 = vpack.c.bf16 %v464_v30, %v464_v30  ;;  %v1621_v33 = vshrl.u32 %v1620_v32, 7 }
 0x44d   : > { %7817 = vmatmul.mubr.bf16.gmra.mrb[12].mxu0 %v590_v35  ;;  %8953 = vmatmul.mubr.bf16.gmra.mrb[12].mxu1 %v590_v35  ;;  %v1622_v34 = vsub.s32 0, %v1621_v33  ;;  %v1630_v35 = vsub.s32 2, %v1621_v33  ;;  %v1626_v37 = vsub.s32 1, %v1621_v33 }
 0x44e   : > { %7838 = vmatpush1.bf16.msra.mxu0 %v12278_v38  ;;  %8974 = vmatpush1.bf16.msra.mxu1 %v12281_v39  ;;  %v1634_v38 = vsub.s32 3, %v1621_v33 }
 0x44f   : > { %7839 = vmatprep.subr.bf16.mxu0 %v12286_v40  ;;  %8975 = vmatprep.subr.bf16.mxu1 %v12289_v41  ;;  %v13751_v39 = vrot.slane %v1618_v36, %v1622_v34  ;;  %v13753_v40 = vrot.slane %v1618_v36, %v1630_v35  ;;  %v13755_v41 = vrot.slane %v1618_v36, %v1626_v37 }
 0x450   : > { %7857 = vmatprep.mubr.bf16.mxu0 %v497_v42  ;;  %8993 = vmatprep.mubr.bf16.mxu1 %v497_v42  ;;  %v13757_v42 = vrot.slane %v1618_v36, %v1634_v38 }
 0x452   : > { %7840 = vmatpush1.bf16.msra.mxu0 %v12284_v43  ;;  %8976 = vmatpush1.bf16.msra.mxu1 %v12287_v44 }
 0x453   : > { %7841 = vmatprep.subr.bf16.mxu0 %v12292_v45  ;;  %8977 = vmatprep.subr.bf16.mxu1 %v12295_v46 }
 0x456   : > { %7842 = vmatpush1.bf16.msra.mxu0 %v12290_v47  ;;  %8978 = vmatpush1.bf16.msra.mxu1 %v12293_v48 }
 0x457   : > { %7843 = vmatprep.subr.bf16.mxu0 %v12298_v49  ;;  %8979 = vmatprep.subr.bf16.mxu1 %v12301_v50 }
 0x45a   : > { %7844 = vmatpush1.bf16.msra.mxu0 %v12296_v51  ;;  %8980 = vmatpush1.bf16.msra.mxu1 %v12299_v52 }
 0x45b   : > { %7845 = vmatprep.subr.bf16.mxu0 %v12304_v53  ;;  %8981 = vmatprep.subr.bf16.mxu1 %v12307_v54 }
 0x45e   : > { %7846 = vmatpush1.bf16.msra.mxu0 %v12302_v55  ;;  %8982 = vmatpush1.bf16.msra.mxu1 %v12305_v56 }
 0x45f   : > { %7847 = vmatprep.subr.bf16.mxu0 %v12310_v57  ;;  %8983 = vmatprep.subr.bf16.mxu1 %v12313_v58 }
 0x462   : > { %7848 = vmatpush1.bf16.msra.mxu0 %v12308_v59  ;;  %8984 = vmatpush1.bf16.msra.mxu1 %v12311_v60 }
 0x463   : > { %7849 = vmatprep.subr.bf16.mxu0 %v12316_v61  ;;  %8985 = vmatprep.subr.bf16.mxu1 %v12319_v62 }
 0x466   : > { %7850 = vmatpush1.bf16.msra.mxu0 %v12314_v63  ;;  %8986 = vmatpush1.bf16.msra.mxu1 %v12317_v0 }
 0x467   : > { %7851 = vmatprep.subr.bf16.mxu0 %v12322_v1  ;;  %8987 = vmatprep.subr.bf16.mxu1 %v12325_v2 }
 0x46a   : > { %7852 = vmatpush1.bf16.msra.mxu0 %v12320_v3  ;;  %8988 = vmatpush1.bf16.msra.mxu1 %v12323_v4 }
 0x46b   : > { %7853 = vmatprep.subr.bf16.mxu0 %v12328_v5  ;;  %8989 = vmatprep.subr.bf16.mxu1 %v12331_v6 }
 0x46e   : > { %7854 = vmatpush1.bf16.msra.mxu0 %v12326_v7  ;;  %8990 = vmatpush1.bf16.msra.mxu1 %v12329_v8 }
 0x46f   : > { %7855 = vmatprep.subr.bf16.mxu0 %v12334_v9  ;;  %8991 = vmatprep.subr.bf16.mxu1 %v12337_v10 }
 0x472   : > { %7856 = vmatpush1.bf16.msra.mxu0 %v12332_v11  ;;  %8992 = vmatpush1.bf16.msra.mxu1 %v12335_v12 }
 0x475   : > { %7858 = vmatmul.mubr.bf16.vlgmr.msra.gmra.mrb[0].mxu0 %v496_v17  ;;  %8994 = vmatmul.mubr.bf16.vlgmr.msra.gmra.mrb[0].mxu1 %v496_v17 }
 0x476   : > { %7867 = vmatprep.mubr.bf16.mxu0 %v529_v18  ;;  %9003 = vmatprep.mubr.bf16.mxu1 %v529_v18 }
 0x47d   : > { %7868 = vmatmul.mubr.bf16.gmra.mrb[4].mxu0 %v528_v23  ;;  %9004 = vmatmul.mubr.bf16.gmra.mrb[4].mxu1 %v528_v23 }
 0x47e   : > { %7877 = vmatprep.mubr.bf16.mxu0 %v561_v24  ;;  %9013 = vmatprep.mubr.bf16.mxu1 %v561_v24 }
 0x485   : > { %7878 = vmatmul.mubr.bf16.gmra.mrb[8].mxu0 %v560_v28  ;;  %9014 = vmatmul.mubr.bf16.gmra.mrb[8].mxu1 %v560_v28 }
 0x486   : > { %7887 = vmatprep.mubr.bf16.mxu0 %v593_v29  ;;  %9023 = vmatprep.mubr.bf16.mxu1 %v593_v29 }
 0x48d   : > { %7888 = vmatmul.mubr.bf16.gmra.mrb[12].mxu0 %v592_v31  ;;  %9024 = vmatmul.mubr.bf16.gmra.mrb[12].mxu1 %v592_v31 }
 0x548   : > { %v7859_v43 = vpop.f32.mrb[0].mxu0  ;;  %v8995_v44 = vpop.f32.mrb[0].mxu1 }
 0x549   : > { %v10224_v45 = vadd.f32 %v7859_v43, %v13751_v39  ;;  %v10238_v46 = vadd.f32 %v8995_v44, %v13753_v40  ;;  %v7861_v47 = vpop.f32.mrb[1].mxu0  ;;  %v8997_v48 = vpop.f32.mrb[1].mxu1 }
 0x54a   : > { %v10225_v49 = vadd.f32 %v7861_v47, %v13755_v41  ;;  %v10239_v50 = vadd.f32 %v8997_v48, %v13757_v42  ;;  %v7863_v51 = vpop.f32.mrb[2].mxu0  ;;  %v8999_v52 = vpop.f32.mrb[2].mxu1 }
 0x54b   : > { %9032 = vst [vmem:[%s13763_s17] sm:$0xff] %v10224_v45  ;;  %9034 = vst [vmem:[%s13763_s17 + $0x10] sm:$0xff] %v10238_v46  ;;  %v10226_v53 = vadd.f32 %v7863_v51, %v13751_v39  ;;  %v10240_v54 = vadd.f32 %v8999_v52, %v13753_v40  ;;  %v7865_v55 = vpop.f32.mrb[3].mxu0  ;;  %v9001_v56 = vpop.f32.mrb[3].mxu1 }
 0x54c   : > { %9033 = vst [vmem:[%s13763_s17 + $0x8] sm:$0xff] %v10225_v49  ;;  %9035 = vst [vmem:[%s13763_s17 + $0x18] sm:$0xff] %v10239_v50  ;;  %v10227_v57 = vadd.f32 %v7865_v55, %v13755_v41  ;;  %v10241_v58 = vadd.f32 %v9001_v56, %v13757_v42 }
 0x54d   : > { %9036 = vst [vmem:[%s13763_s17 + $0x20] sm:$0xff] %v10226_v53  ;;  %9038 = vst [vmem:[%s13763_s17 + $0x30] sm:$0xff] %v10240_v54 }
 0x54e   : > { %9037 = vst [vmem:[%s13763_s17 + $0x28] sm:$0xff] %v10227_v57  ;;  %9039 = vst [vmem:[%s13763_s17 + $0x38] sm:$0xff] %v10241_v58 }
 0x550   : > { %v7869_v59 = vpop.f32.mrb[4].mxu0  ;;  %v9005_v60 = vpop.f32.mrb[4].mxu1 }
 0x551   : > { %v10228_v61 = vadd.f32 %v7869_v59, %v13751_v39  ;;  %v10242_v62 = vadd.f32 %v9005_v60, %v13753_v40  ;;  %v7871_v63 = vpop.f32.mrb[5].mxu0  ;;  %v9007_v0 = vpop.f32.mrb[5].mxu1 }
 0x552   : > { %v10229_v1 = vadd.f32 %v7871_v63, %v13755_v41  ;;  %v10243_v2 = vadd.f32 %v9007_v0, %v13757_v42  ;;  %v7873_v3 = vpop.f32.mrb[6].mxu0  ;;  %v9009_v4 = vpop.f32.mrb[6].mxu1 }
 0x553   : > { %9040 = vst [vmem:[%s13763_s17 + $0x40] sm:$0xff] %v10228_v61  ;;  %9042 = vst [vmem:[%s13763_s17 + $0x50] sm:$0xff] %v10242_v62  ;;  %v10230_v5 = vadd.f32 %v7873_v3, %v13751_v39  ;;  %v10244_v6 = vadd.f32 %v9009_v4, %v13753_v40  ;;  %v7875_v7 = vpop.f32.mrb[7].mxu0  ;;  %v9011_v8 = vpop.f32.mrb[7].mxu1 }
 0x554   : > { %9041 = vst [vmem:[%s13763_s17 + $0x48] sm:$0xff] %v10229_v1  ;;  %9043 = vst [vmem:[%s13763_s17 + $0x58] sm:$0xff] %v10243_v2  ;;  %v10231_v9 = vadd.f32 %v7875_v7, %v13755_v41  ;;  %v10245_v10 = vadd.f32 %v9011_v8, %v13757_v42 }
 0x555   : > { %9044 = vst [vmem:[%s13763_s17 + $0x60] sm:$0xff] %v10230_v5  ;;  %9046 = vst [vmem:[%s13763_s17 + $0x70] sm:$0xff] %v10244_v6 }
 0x556   : > { %9045 = vst [vmem:[%s13763_s17 + $0x68] sm:$0xff] %v10231_v9  ;;  %9047 = vst [vmem:[%s13763_s17 + $0x78] sm:$0xff] %v10245_v10 }
 0x558   : > { %v7879_v11 = vpop.f32.mrb[8].mxu0  ;;  %v9015_v12 = vpop.f32.mrb[8].mxu1 }
 0x559   : > { %v10232_v13 = vadd.f32 %v7879_v11, %v13751_v39  ;;  %v10246_v14 = vadd.f32 %v9015_v12, %v13753_v40  ;;  %v7881_v15 = vpop.f32.mrb[9].mxu0  ;;  %v9017_v16 = vpop.f32.mrb[9].mxu1 }
 0x55a   : > { %v10233_v17 = vadd.f32 %v7881_v15, %v13755_v41  ;;  %v10247_v18 = vadd.f32 %v9017_v16, %v13757_v42  ;;  %v7883_v19 = vpop.f32.mrb[10].mxu0  ;;  %v9019_v20 = vpop.f32.mrb[10].mxu1 }
 0x55b   : > { %9048 = vst [vmem:[%s13763_s17 + $0x80] sm:$0xff] %v10232_v13  ;;  %9050 = vst [vmem:[%s13763_s17 + $0x90] sm:$0xff] %v10246_v14  ;;  %v10234_v21 = vadd.f32 %v7883_v19, %v13751_v39  ;;  %v10248_v22 = vadd.f32 %v9019_v20, %v13753_v40  ;;  %v7885_v23 = vpop.f32.mrb[11].mxu0  ;;  %v9021_v24 = vpop.f32.mrb[11].mxu1 }
 0x55c   : > { %9049 = vst [vmem:[%s13763_s17 + $0x88] sm:$0xff] %v10233_v17  ;;  %9051 = vst [vmem:[%s13763_s17 + $0x98] sm:$0xff] %v10247_v18  ;;  %v10235_v25 = vadd.f32 %v7885_v23, %v13755_v41  ;;  %v10249_v26 = vadd.f32 %v9021_v24, %v13757_v42 }
 0x55d   : > { %9052 = vst [vmem:[%s13763_s17 + $0xa0] sm:$0xff] %v10234_v21  ;;  %9054 = vst [vmem:[%s13763_s17 + $0xb0] sm:$0xff] %v10248_v22 }
 0x55e   : > { %9053 = vst [vmem:[%s13763_s17 + $0xa8] sm:$0xff] %v10235_v25  ;;  %9055 = vst [vmem:[%s13763_s17 + $0xb8] sm:$0xff] %v10249_v26 }
 0x560   : > { %v7889_v27 = vpop.f32.mrb[12].mxu0  ;;  %v9025_v28 = vpop.f32.mrb[12].mxu1 }
 0x561   : > { %v10236_v29 = vadd.f32 %v7889_v27, %v13751_v39  ;;  %v10250_v30 = vadd.f32 %v9025_v28, %v13753_v40  ;;  %v7891_v31 = vpop.f32.mrb[13].mxu0  ;;  %v9027_v32 = vpop.f32.mrb[13].mxu1 }
 0x562   : > { %v10237_v33 = vadd.f32 %v7891_v31, %v13755_v41  ;;  %v10251_v34 = vadd.f32 %v9027_v32, %v13757_v42  ;;  %v7893_v35 = vpop.f32.mrb[14].mxu0  ;;  %v9029_v36 = vpop.f32.mrb[14].mxu1 }
 0x563   : > { %9056 = vst [vmem:[%s13763_s17 + $0xc0] sm:$0x1] %v10236_v29  ;;  %9058 = vst [vmem:[%s13763_s17 + $0xd0] sm:$0x1] %v10250_v30  ;;  %v7894_v37 = vpop.f32.mrb[15].mxu0  ;;  %v9030_v38 = vpop.f32.mrb[15].mxu1 }
 0x564   : > { %9057 = vst [vmem:[%s13763_s17 + $0xc8] sm:$0x1] %v10237_v33  ;;  %9059 = vst [vmem:[%s13763_s17 + $0xd8] sm:$0x1] %v10251_v34 }
 0x565   : > { %12439 = shalt.err (!%p12436_p7)
}
 0x566   : > { %s12440_s18 = scalar_lea.hbm %s13814_s11, 3584  ;;  %s12444_s21 = scalar_lea.hbm %s13871_s3, 7168 }
 0x567   : > { %p12441_p9 = scmp.ne.s32.totalorder %s13814_s11, %s12440_s18  ;;  %p12445_p3 = scmp.lt.u32.totalorder %s13814_s11, %s13871_s3 }
 0x568   : > { %p12446_p1 = scmp.lt.u32.totalorder %s12444_s21, %s12440_s18  ;;  %p12448_p2 = scmp.lt.u32.totalorder %s12440_s18, %s13814_s11 }
 0x569   : > { %p12442_p12 = pnand %p12441_p9, %p13894_p4 }
 0x56a   : > { %p12447_p10 = por %p12446_p1, %p12445_p3 }
 0x56b   : > { %p12443_p6 = pneg %p12442_p12 }
 0x56c   : > { %p12449_p0 = por %p12448_p2, %p12447_p10 }
 0x56e   : > { %p12450_p11 = pnand %p12449_p0, %p12443_p6 }
 0x570   : > { %12453 = shalt.err (!%p12450_p11)
}
 0x571   : > { %s12506_s4 = smov 512   ;;  %s12507_s17 = smov 1024  }
 0x572   : > { %s12508_s20 = smov 32  }
 0x573   : > { %10741 = dma.vmem_to_hbm [thread:$0]  (%p13894_p4), %s13818_s5, 3584, %s13814_s11, %s9061_s24, %s12506_s4, %s12507_s17, %s12508_s20  }
 0x574 PF: > { %s9089_s9 = sand.u32 1, %s12484_s12   ;;  %p13895_p13 = scmp.ne.s32.totalorder %s13883_s28, 0 }
 0x575   : > { %p13896_p8 = scmp.ge.s32.totalorder %s12496_s15, 2  ;;  %s9090_s10 = scalar_lea.sflag [#allocation4], %s9089_s9 }
 0x577   : > { %p10755_p5 = pnand %p13896_p8, %p13895_p13 }
 0x579   : > { %12479 = dma.done.wait (!%p10755_p5), %s9090_s10, 3584  }
 0x57a   : > { %12481 = vsyncadd (!%p10755_p5), %s9090_s10, 4294963712  ;;  %p17_p7 = scmp.ge.s32.totalorder %s12550_s16, 4   ;;  %s13897_s12 = smov %s12488_s13 }
 0x57b   : > { %s13898_s13 = smov %s12492_s14  ;;  %s13899_s14 = smov %s12560_s19 }
 0x57c   : > { %s13900_s15 = smov %s12550_s16  ;;  %19 = sbr.rel (!%p17_p7) target bundleno = 6 (0x6), region = 93 }
 0x583   :  { %9095 = vsyncpa [#allocation3], 1 }
 0x584   :  { %9097 = vsyncpa [#allocation3 + $0x1], 1 }
 0x585   :  { %9098 = vsyncpa [#allocation6], 1 }
 0x586   :  { %9100 = vsyncpa [#allocation6 + $0x1], 1 }
 0x587   :  { %9101 = vsyncpa [#allocation4], 1 }
 0x588   :  { %9103 = vsyncpa [#allocation4 + $0x1], 1 }

</bundles_post_ra>
